<compile_context>
chip_gen: v5e
topology: v5e:2x2
jax: 0.10.0
libtpu: 0.0.40
codegen_flags: <defaults>
</compile_context>

<pallas_src>
import math
import functools

import jax
import jax.numpy as jnp
from jax.experimental import pallas as pl
from jax.experimental.pallas import tpu as pltpu

LN_EPS = 1e-5
NEG_INF = -1e30  # finite "-inf": avoids NaN softmax; epipolar mask always allows diag


def _layernorm(z, gamma, beta):
    mu = jnp.mean(z, axis=-1, keepdims=True)
    var = jnp.mean((z - mu) ** 2, axis=-1, keepdims=True)
    return (z - mu) * jax.lax.rsqrt(var + LN_EPS) * gamma + beta


def epix_kernel(t_ref, mask_ref, g1_ref, b1_ref,
                wq_ref, wk_ref, wv_ref, wo_ref,
                g2_ref, b2_ref, w1_ref, w2_ref,
                o_ref, *, num_heads, head_dim, bf16_softmax):
    TN, S, E = t_ref.shape
    H, D = num_heads, head_dim

    mask = mask_ref[...]                              # (S, S) bf16: 0 / -1e30

    t_b = t_ref[...].reshape(TN * S, E)               # bf16 MXU operand (value input)
    t = t_b.astype(jnp.float32)                       # f32 residual base

    # ---- self.norm -> fused Q/K/V projections (full-width (E,E) matmuls).
    tnrm = _layernorm(t, g1_ref[...], b1_ref[...]).astype(jnp.bfloat16)
    q = jnp.dot(tnrm, wq_ref[...], preferred_element_type=jnp.float32)  # 1/sqrt(D) folded
    k = jnp.dot(tnrm, wk_ref[...], preferred_element_type=jnp.float32)
    v = jnp.dot(t_b, wv_ref[...], preferred_element_type=jnp.float32)
    q3 = q.astype(jnp.bfloat16).reshape(TN, S, E)
    k3 = k.astype(jnp.bfloat16).reshape(TN, S, E)
    v3 = v.astype(jnp.bfloat16).reshape(TN, S, E)

    # ---- per-head scores / softmax / PV (batched over TN). Head outputs are
    # laid contiguously on lanes (concat) so ONE fused (TN*S,E)@(E,E)
    # out-projection follows (no per-head K=D accumulation matmuls).
    # TODO(synk): for large S, tile this block flash-style over the KV axis
    # (online max/sum) so activations stay O(TN*S*(D+Tk)) instead of (TN,S,S).
    head_outs = []
    for hh in range(H):
        lo = hh * D
        qh = q3[:, :, lo:lo + D]
        kh = k3[:, :, lo:lo + D]
        vh = v3[:, :, lo:lo + D]
        s = jnp.einsum('nqd,nkd->nqk', qh, kh,
                       preferred_element_type=jnp.float32) + mask[None]   # (TN,S,S) f32
        m = jnp.max(s, axis=-1, keepdims=True)
        if bf16_softmax:
            # bf16 EUP/VPU path (v6e / v7x); row-sum accumulated in f32.
            p = jnp.exp((s - m).astype(jnp.bfloat16))
            l = jnp.sum(p, axis=-1, keepdims=True, dtype=jnp.float32)
        else:
            # f32 path (v5e has no bf16 VPU/EUP).
            p = jnp.exp(s - m)
            l = jnp.sum(p, axis=-1, keepdims=True)
            p = p.astype(jnp.bfloat16)
        oh = jnp.einsum('nqk,nkd->nqd', p, vh,
                        preferred_element_type=jnp.float32)               # (TN,S,D) f32
        # deferred softmax normalization: one multiply over (TN,S,D), not (TN,S,S)
        head_outs.append(oh * pl.reciprocal(l, approx=True))
    o = jnp.concatenate(head_outs, axis=-1).reshape(TN * S, E)            # heads on lanes

    attn = jnp.dot(o.astype(jnp.bfloat16), wo_ref[...],
                   preferred_element_type=jnp.float32)                    # (TN*S, E)
    t = attn + t                                      # residual 1 (f32)

    # ---- feed_forward: LN -> Linear(E,2E) -> ReLU -> Linear(2E,E); dropout = id
    tn2 = _layernorm(t, g2_ref[...], b2_ref[...]).astype(jnp.bfloat16)
    h1 = jnp.dot(tn2, w1_ref[...], preferred_element_type=jnp.float32)
    h1 = jnp.maximum(h1, 0.0).astype(jnp.bfloat16)
    h2 = jnp.dot(h1, w2_ref[...], preferred_element_type=jnp.float32)
    t = h2 + t                                        # residual 2 (f32)

    o_ref[...] = t.reshape(TN, S, E).astype(o_ref.dtype)


def gen_mask(h, w, maxdisp=6, neg=-jnp.inf):
    """Epipolar mask (h*w, h*w): 0 where attention is allowed, `neg` otherwise."""
    qi = jnp.arange(h).reshape(h, 1, 1, 1)
    qj = jnp.arange(w).reshape(1, w, 1, 1)
    ki = jnp.arange(h).reshape(1, 1, h, 1)
    kj = jnp.arange(w).reshape(1, 1, 1, w)
    allowed = jnp.abs(ki - qi) * maxdisp >= jnp.abs(kj - qj)
    mask = jnp.where(allowed, 0.0, neg).astype(jnp.float32)
    return mask.reshape(h * w, h * w)


def init_params(key, channels, emb_dim):
    E, C = emb_dim, channels
    ks = jax.random.split(key, 6)
    scale = 0.05
    return dict(
        w_in=scale * jax.random.normal(ks[0], (E, C), jnp.float32),
        g1=jnp.ones((1, E), jnp.float32),
        b1=jnp.zeros((1, E), jnp.float32),
        in_proj=scale * jax.random.normal(ks[1], (3 * E, E), jnp.float32),
        wo=scale * jax.random.normal(ks[2], (E, E), jnp.float32),
        g2=jnp.ones((1, E), jnp.float32),
        b2=jnp.zeros((1, E), jnp.float32),
        w1=scale * jax.random.normal(ks[3], (2 * E, E), jnp.float32),
        w2=scale * jax.random.normal(ks[4], (E, 2 * E), jnp.float32),
        w_out=scale * jax.random.normal(ks[5], (C, E), jnp.float32),
    )


def _hw_config():
    """Generation-aware VMEM limit, softmax dtype and rows-per-step target."""
    try:
        vmem_cap = pltpu.get_tpu_info().vmem_capacity_bytes
    except Exception:
        vmem_cap = 64 * 1024 * 1024
    try:
        kind = jax.devices()[0].device_kind.lower()
    except Exception:
        kind = ""
    big_vmem = vmem_cap >= 96 * 1024 * 1024            # v5e / v6e: 128 MiB physical
    vmem_limit = (100 if big_vmem else 36) * 1024 * 1024   # v7x (64 MiB): stay well under
    bf16_softmax = any(tag in kind for tag in ("v6", "v7", "tpu7"))
    rows_target = 512 if big_vmem else 256             # MXU-M rows per grid step
    return vmem_limit, bf16_softmax, rows_target


def epix_trans_forward(buffer, params, num_heads, *, maxdisp=6, tn_cap=64):
    b, c, u, v, h, w = buffer.shape
    S = v * w
    N = b * u * h
    E = params["w_in"].shape[0]
    H = num_heads
    D = E // H
    cdt = jnp.bfloat16

    vmem_limit, bf16_softmax, rows_target = _hw_config()

    # ---- batch tile TN: fill the MXU M dim (~rows_target rows/step), keep the
    # (TN,S,S) attention temporaries inside a VMEM activation budget, keep >= ~4
    # grid steps so each TensorCore gets several pipelined steps, and pad
    # awkward N with dummy rows instead of collapsing TN toward 1.
    per_tn_bytes = 12 * S * S + 24 * S * E
    tn_budget = max(1, (vmem_limit // 2) // per_tn_bytes)
    TN = max(1, min(tn_cap, tn_budget, max(1, rows_target // S), N))
    if pl.cdiv(N, TN) < 4:
        TN = max(1, min(TN, pl.cdiv(N, 4)))
    N_pad = pl.cdiv(N, TN) * TN
    grid = N_pad // TN

    # ---- layout plumbing + lane-sparse projections kept in XLA --------------
    # linear_in / linear_out contract over C (tiny): doing them in XLA keeps the
    # Pallas kernel's DMA and stores lane-dense over E instead of C.
    tokens = jnp.transpose(buffer, (3, 5, 0, 2, 4, 1)).reshape(S, N, c)
    x = jnp.transpose(tokens, (1, 0, 2)).astype(jnp.float32)            # (N, S, C)
    t_in = jnp.einsum('nsc,ec->nse', x, params["w_in"])                  # (N, S, E)
    if N_pad != N:
        t_in = jnp.concatenate(
            [t_in, jnp.zeros((N_pad - N, S, E), t_in.dtype)], axis=0)
    t_in = t_in.astype(cdt)

    # Pre-transposed (in, out) weight layouts; 1/sqrt(D) folded into Wq.
    wq = params["in_proj"][0 * E:1 * E]
    wk = params["in_proj"][1 * E:2 * E]
    wv = params["in_proj"][2 * E:3 * E]
    wq_t = (wq * (1.0 / math.sqrt(D))).T.astype(cdt)    # (E, E)
    wk_t = wk.T.astype(cdt)                             # (E, E)
    wv_t = wv.T.astype(cdt)                             # (E, E)
    wo_t = params["wo"].T.astype(cdt)                   # (E, E)
    w1_t = params["w1"].T.astype(cdt)                   # (E, 2E)
    w2_t = params["w2"].T.astype(cdt)                   # (2E, E)

    # Epipolar mask precomputed once (bf16, finite -1e30); constant-index block
    # -> fetched once per core, no per-step synthesis work.
    mask = gen_mask(v, w, maxdisp, neg=NEG_INF).astype(cdt)              # (S, S)

    kernel = functools.partial(epix_kernel, num_heads=H, head_dim=D,
                               bf16_softmax=bf16_softmax)

    flops = int(16 * N_pad * S * E * E + 4 * N_pad * S * S * E)
    transcendentals = int(N_pad * H * S * S)
    weight_bytes = int(2 * (8 * E * E + S * S) + 4 * 4 * E)   # fetched once
    bytes_accessed = int(4 * N_pad * S * E + weight_bytes)

    def _call(single_buffer_consts):
        def cspec(shape):
            zeros = (0,) * len(shape)
            if single_buffer_consts:
                return pl.BlockSpec(shape, lambda i, _z=zeros: _z,
                                    pipeline_mode=pl.Buffered(1))
            return pl.BlockSpec(shape, lambda i, _z=zeros: _z)

        return pl.pallas_call(
            kernel,
            out_shape=jax.ShapeDtypeStruct((N_pad, S, E), cdt),
            grid_spec=pltpu.PrefetchScalarGridSpec(
                num_scalar_prefetch=0,
                grid=(grid,),
                in_specs=[
                    pl.BlockSpec((TN, S, E), lambda i: (i, 0, 0)),   # t tile
                    cspec((S, S)),                                   # epipolar mask
                    cspec((1, E)), cspec((1, E)),                    # g1, b1
                    cspec((E, E)), cspec((E, E)),                    # wq^T, wk^T
                    cspec((E, E)), cspec((E, E)),                    # wv^T, wo^T
                    cspec((1, E)), cspec((1, E)),                    # g2, b2
                    cspec((E, 2 * E)), cspec((2 * E, E)),            # w1^T, w2^T
                ],
                out_specs=pl.BlockSpec((TN, S, E), lambda i: (i, 0, 0)),
            ),
            compiler_params=pltpu.CompilerParams(
                dimension_semantics=("parallel",),
                vmem_limit_bytes=vmem_limit),
            cost_estimate=pl.CostEstimate(flops=flops,
                                          transcendentals=transcendentals,
                                          bytes_accessed=bytes_accessed),
        )(t_in, mask,
          params["g1"], params["b1"],
          wq_t, wk_t, wv_t, wo_t,
          params["g2"], params["b2"],
          w1_t, w2_t)

    try:
        res = _call(True)
    except Exception:
        # TODO(synk): pipeline_mode=pl.Buffered(1) not supported on this JAX
        # version; fall back to default (double-buffered) constant blocks.
        res = _call(False)

    # ---- linear_out (lane-sparse over C) + inverse permutation in XLA -------
    out_tok = jnp.einsum('nse,ce->nsc', res[:N].astype(jnp.float32),
                         params["w_out"])                                # (N, S, C)
    out = jnp.transpose(out_tok, (1, 0, 2)).reshape(v, w, b, u, h, c)
    return jnp.transpose(out, (2, 5, 3, 0, 4, 1))


def epix_trans_reference(buffer, params, num_heads):
    """Pure-JAX f32 reference of the same forward pass (for correctness check)."""
    b, c, u, v, h, w = buffer.shape
    S, N = v * w, b * u * h
    E = params["w_in"].shape[0]
    D = E // num_heads
    mask = gen_mask(v, w)

    x = jnp.transpose(buffer, (3, 5, 0, 2, 4, 1)).reshape(S, N, c)
    x = jnp.transpose(x, (1, 0, 2)).astype(jnp.float32)            # (N, S, C)

    t = x @ params["w_in"].T
    tn = _layernorm(t, params["g1"][0], params["b1"][0])
    wq = params["in_proj"][:E]
    wk = params["in_proj"][E:2 * E]
    wv = params["in_proj"][2 * E:]
    q = tn @ wq.T
    k = tn @ wk.T
    vv = t @ wv.T
    q = q.reshape(N, S, num_heads, D).transpose(0, 2, 1, 3)
    k = k.reshape(N, S, num_heads, D).transpose(0, 2, 1, 3)
    vv = vv.reshape(N, S, num_heads, D).transpose(0, 2, 1, 3)
    s = jnp.einsum("nhqd,nhkd->nhqk", q, k) / math.sqrt(D) + mask
    p = jax.nn.softmax(s, axis=-1)
    o = jnp.einsum("nhqk,nhkd->nhqd", p, vv).transpose(0, 2, 1, 3).reshape(N, S, E)
    t = o @ params["wo"].T + t
    tn2 = _layernorm(t, params["g2"][0], params["b2"][0])
    t = jnp.maximum(tn2 @ params["w1"].T, 0.0) @ params["w2"].T + t
    out = t @ params["w_out"].T                                    # (N, S, C)
    out = jnp.transpose(out, (1, 0, 2)).reshape(v, w, b, u, h, c)
    return jnp.transpose(out, (2, 5, 3, 0, 4, 1))


if __name__ == "__main__":
    # small shapes consistent with buffer = (b, c, u, v, h, w)
    b, c, u, v, h, w = 2, 4, 2, 4, 4, 4
    emb_dim = 32
    num_heads = 4

    key = jax.random.PRNGKey(0)
    k_buf, k_par = jax.random.split(key)
    buffer = jax.random.normal(k_buf, (b, c, u, v, h, w), jnp.float32)
    params = init_params(k_par, c, emb_dim)

    out = jax.block_until_ready(epix_trans_forward(buffer, params, num_heads))
    ref = jax.block_until_ready(epix_trans_reference(buffer, params, num_heads))

    assert out.shape == (b, c, u, v, h, w)
    # bf16 MXU operands / bf16 kernel I/O / approx reciprocal vs f32 reference.
    assert jnp.allclose(out, ref, atol=2e-2, rtol=2e-2), \
        "kernel mismatch vs JAX reference"

    print("KERNEL_OK")
</pallas_src>

<mosaic_0001>
module attributes {stable_mosaic.version = 11 : i64} {
  func.func @epix_kernel(%arg0: i32, %arg1: memref<4x16x32xbf16, #tpu.memory_space<vmem>>, %arg2: memref<16x16xbf16, #tpu.memory_space<vmem>>, %arg3: memref<1x32xf32, #tpu.memory_space<vmem>>, %arg4: memref<1x32xf32, #tpu.memory_space<vmem>>, %arg5: memref<32x32xbf16, #tpu.memory_space<vmem>>, %arg6: memref<32x32xbf16, #tpu.memory_space<vmem>>, %arg7: memref<32x32xbf16, #tpu.memory_space<vmem>>, %arg8: memref<32x32xbf16, #tpu.memory_space<vmem>>, %arg9: memref<1x32xf32, #tpu.memory_space<vmem>>, %arg10: memref<1x32xf32, #tpu.memory_space<vmem>>, %arg11: memref<32x64xbf16, #tpu.memory_space<vmem>>, %arg12: memref<64x32xbf16, #tpu.memory_space<vmem>>, %arg13: memref<4x16x32xbf16, #tpu.memory_space<vmem>>) attributes {dimension_semantics = [#tpu.dimension_semantics<parallel>], iteration_bounds = array<i64: 4>, scalar_prefetch = 0 : i64, scratch_operands = 0 : i64, tpu.core_type = #tpu.core_type<tc>, window_params = [{transform_indices = @transform_0, window_bounds = array<i64: 4, 16, 32>}, {pipeline_mode = #tpu.pipeline_mode<synchronous>, transform_indices = @transform_1, window_bounds = array<i64: 16, 16>}, {pipeline_mode = #tpu.pipeline_mode<synchronous>, transform_indices = @transform_2, window_bounds = array<i64: 1, 32>}, {pipeline_mode = #tpu.pipeline_mode<synchronous>, transform_indices = @transform_3, window_bounds = array<i64: 1, 32>}, {pipeline_mode = #tpu.pipeline_mode<synchronous>, transform_indices = @transform_4, window_bounds = array<i64: 32, 32>}, {pipeline_mode = #tpu.pipeline_mode<synchronous>, transform_indices = @transform_5, window_bounds = array<i64: 32, 32>}, {pipeline_mode = #tpu.pipeline_mode<synchronous>, transform_indices = @transform_6, window_bounds = array<i64: 32, 32>}, {pipeline_mode = #tpu.pipeline_mode<synchronous>, transform_indices = @transform_7, window_bounds = array<i64: 32, 32>}, {pipeline_mode = #tpu.pipeline_mode<synchronous>, transform_indices = @transform_8, window_bounds = array<i64: 1, 32>}, {pipeline_mode = #tpu.pipeline_mode<synchronous>, transform_indices = @transform_9, window_bounds = array<i64: 1, 32>}, {pipeline_mode = #tpu.pipeline_mode<synchronous>, transform_indices = @transform_10, window_bounds = array<i64: 32, 64>}, {pipeline_mode = #tpu.pipeline_mode<synchronous>, transform_indices = @transform_11, window_bounds = array<i64: 64, 32>}, {transform_indices = @transform_12, window_bounds = array<i64: 4, 16, 32>}]} {
    %c0 = arith.constant 0 : index
    %c0_0 = arith.constant 0 : index
    %0 = vector.load %arg2[%c0, %c0_0] : memref<16x16xbf16, #tpu.memory_space<vmem>>, vector<16x16xbf16>
    %c0_1 = arith.constant 0 : index
    %c0_2 = arith.constant 0 : index
    %c0_3 = arith.constant 0 : index
    %1 = vector.load %arg1[%c0_1, %c0_2, %c0_3] : memref<4x16x32xbf16, #tpu.memory_space<vmem>>, vector<4x16x32xbf16>
    %2 = vector.shape_cast %1 : vector<4x16x32xbf16> to vector<64x32xbf16>
    %3 = arith.extf %2 : vector<64x32xbf16> to vector<64x32xf32>
    %c0_4 = arith.constant 0 : index
    %c0_5 = arith.constant 0 : index
    %4 = vector.load %arg3[%c0_4, %c0_5] : memref<1x32xf32, #tpu.memory_space<vmem>>, vector<1x32xf32>
    %c0_6 = arith.constant 0 : index
    %c0_7 = arith.constant 0 : index
    %5 = vector.load %arg4[%c0_6, %c0_7] : memref<1x32xf32, #tpu.memory_space<vmem>>, vector<1x32xf32>
    %cst = arith.constant dense<0.000000e+00> : vector<64xf32>
    %6 = vector.multi_reduction <add>, %3, %cst [1] : vector<64x32xf32> to vector<64xf32>
    %7 = vector.shape_cast %6 : vector<64xf32> to vector<64x1xf32>
    %cst_8 = arith.constant 3.200000e+01 : f32
    %8 = vector.broadcast %cst_8 : f32 to vector<64x1xf32>
    %9 = arith.divf %7, %8 : vector<64x1xf32>
    %10 = vector.broadcast %9 : vector<64x1xf32> to vector<64x32xf32>
    %11 = arith.subf %3, %10 : vector<64x32xf32>
    %12 = arith.mulf %11, %11 : vector<64x32xf32>
    %cst_9 = arith.constant dense<0.000000e+00> : vector<64xf32>
    %13 = vector.multi_reduction <add>, %12, %cst_9 [1] : vector<64x32xf32> to vector<64xf32>
    %14 = vector.shape_cast %13 : vector<64xf32> to vector<64x1xf32>
    %cst_10 = arith.constant 3.200000e+01 : f32
    %15 = vector.broadcast %cst_10 : f32 to vector<64x1xf32>
    %16 = arith.divf %14, %15 : vector<64x1xf32>
    %17 = vector.broadcast %9 : vector<64x1xf32> to vector<64x32xf32>
    %18 = arith.subf %3, %17 : vector<64x32xf32>
    %cst_11 = arith.constant 9.99999974E-6 : f32
    %19 = vector.broadcast %cst_11 : f32 to vector<64x1xf32>
    %20 = arith.addf %16, %19 : vector<64x1xf32>
    %21 = math.rsqrt %20 : vector<64x1xf32>
    %22 = vector.broadcast %21 : vector<64x1xf32> to vector<64x32xf32>
    %23 = arith.mulf %18, %22 : vector<64x32xf32>
    %24 = vector.broadcast %4 : vector<1x32xf32> to vector<64x32xf32>
    %25 = arith.mulf %23, %24 : vector<64x32xf32>
    %26 = vector.broadcast %5 : vector<1x32xf32> to vector<64x32xf32>
    %27 = arith.addf %25, %26 : vector<64x32xf32>
    %28 = arith.truncf %27 : vector<64x32xf32> to vector<64x32xbf16>
    %c0_12 = arith.constant 0 : index
    %c0_13 = arith.constant 0 : index
    %29 = vector.load %arg5[%c0_12, %c0_13] : memref<32x32xbf16, #tpu.memory_space<vmem>>, vector<32x32xbf16>
    %cst_14 = arith.constant dense<0.000000e+00> : vector<64x32xf32>
    %30 = tpu.matmul %28, %29, %cst_14 {dimension_numbers = #tpu.dot_dimension_numbers<[1], [0], [0], [1], [0, 0, 1, 1], [], []>} : vector<64x32xbf16>, vector<32x32xbf16>, vector<64x32xf32> -> vector<64x32xf32>
    %c0_15 = arith.constant 0 : index
    %c0_16 = arith.constant 0 : index
    %31 = vector.load %arg6[%c0_15, %c0_16] : memref<32x32xbf16, #tpu.memory_space<vmem>>, vector<32x32xbf16>
    %cst_17 = arith.constant dense<0.000000e+00> : vector<64x32xf32>
    %32 = tpu.matmul %28, %31, %cst_17 {dimension_numbers = #tpu.dot_dimension_numbers<[1], [0], [0], [1], [0, 0, 1, 1], [], []>} : vector<64x32xbf16>, vector<32x32xbf16>, vector<64x32xf32> -> vector<64x32xf32>
    %c0_18 = arith.constant 0 : index
    %c0_19 = arith.constant 0 : index
    %33 = vector.load %arg7[%c0_18, %c0_19] : memref<32x32xbf16, #tpu.memory_space<vmem>>, vector<32x32xbf16>
    %cst_20 = arith.constant dense<0.000000e+00> : vector<64x32xf32>
    %34 = tpu.matmul %2, %33, %cst_20 {dimension_numbers = #tpu.dot_dimension_numbers<[1], [0], [0], [1], [0, 0, 1, 1], [], []>} : vector<64x32xbf16>, vector<32x32xbf16>, vector<64x32xf32> -> vector<64x32xf32>
    %35 = arith.truncf %30 : vector<64x32xf32> to vector<64x32xbf16>
    %36 = vector.shape_cast %35 : vector<64x32xbf16> to vector<4x16x32xbf16>
    %37 = arith.truncf %32 : vector<64x32xf32> to vector<64x32xbf16>
    %38 = vector.shape_cast %37 : vector<64x32xbf16> to vector<4x16x32xbf16>
    %39 = arith.truncf %34 : vector<64x32xf32> to vector<64x32xbf16>
    %40 = vector.shape_cast %39 : vector<64x32xbf16> to vector<4x16x32xbf16>
    %41 = vector.extract_strided_slice %36 {offsets = [0, 0, 0], sizes = [4, 16, 8], strides = [1, 1, 1]} : vector<4x16x32xbf16> to vector<4x16x8xbf16>
    %42 = vector.extract_strided_slice %38 {offsets = [0, 0, 0], sizes = [4, 16, 8], strides = [1, 1, 1]} : vector<4x16x32xbf16> to vector<4x16x8xbf16>
    %43 = vector.extract_strided_slice %40 {offsets = [0, 0, 0], sizes = [4, 16, 8], strides = [1, 1, 1]} : vector<4x16x32xbf16> to vector<4x16x8xbf16>
    "tpu.trace_start"() <{level = 10 : i32, message = "nqd,nkd->nqk"}> : () -> ()
    %cst_21 = arith.constant dense<0.000000e+00> : vector<4x16x16xf32>
    %44 = tpu.matmul %41, %42, %cst_21 {dimension_numbers = #tpu.dot_dimension_numbers<[2], [2], [1], [1], [0, 0, 0, 1, 1, 1], [0], [0]>} : vector<4x16x8xbf16>, vector<4x16x8xbf16>, vector<4x16x16xf32> -> vector<4x16x16xf32>
    "tpu.trace_stop"() : () -> ()
    %45 = vector.shape_cast %0 : vector<16x16xbf16> to vector<1x16x16xbf16>
    %46 = arith.extf %45 : vector<1x16x16xbf16> to vector<1x16x16xf32>
    %47 = vector.broadcast %46 : vector<1x16x16xf32> to vector<4x16x16xf32>
    %48 = arith.addf %44, %47 : vector<4x16x16xf32>
    %cst_22 = arith.constant dense<0xFF800000> : vector<4x16xf32>
    %49 = vector.multi_reduction <maximumf>, %48, %cst_22 [2] : vector<4x16x16xf32> to vector<4x16xf32>
    %50 = vector.shape_cast %49 : vector<4x16xf32> to vector<4x16x1xf32>
    %51 = vector.broadcast %50 : vector<4x16x1xf32> to vector<4x16x16xf32>
    %52 = arith.subf %48, %51 : vector<4x16x16xf32>
    %53 = math.exp %52 : vector<4x16x16xf32>
    %cst_23 = arith.constant dense<0.000000e+00> : vector<4x16xf32>
    %54 = vector.multi_reduction <add>, %53, %cst_23 [2] : vector<4x16x16xf32> to vector<4x16xf32>
    %55 = vector.shape_cast %54 : vector<4x16xf32> to vector<4x16x1xf32>
    %56 = arith.truncf %53 : vector<4x16x16xf32> to vector<4x16x16xbf16>
    "tpu.trace_start"() <{level = 10 : i32, message = "nqk,nkd->nqd"}> : () -> ()
    %cst_24 = arith.constant dense<0.000000e+00> : vector<4x16x8xf32>
    %57 = tpu.matmul %56, %43, %cst_24 {dimension_numbers = #tpu.dot_dimension_numbers<[2], [1], [1], [2], [0, 0, 0, 1, 1, 2], [0], [0]>} : vector<4x16x16xbf16>, vector<4x16x8xbf16>, vector<4x16x8xf32> -> vector<4x16x8xf32>
    "tpu.trace_stop"() : () -> ()
    %58 = tpu.reciprocal %55 {approx = true} : vector<4x16x1xf32> -> vector<4x16x1xf32>
    %59 = vector.broadcast %58 : vector<4x16x1xf32> to vector<4x16x8xf32>
    %60 = arith.mulf %57, %59 : vector<4x16x8xf32>
    %61 = vector.extract_strided_slice %36 {offsets = [0, 0, 8], sizes = [4, 16, 8], strides = [1, 1, 1]} : vector<4x16x32xbf16> to vector<4x16x8xbf16>
    %62 = vector.extract_strided_slice %38 {offsets = [0, 0, 8], sizes = [4, 16, 8], strides = [1, 1, 1]} : vector<4x16x32xbf16> to vector<4x16x8xbf16>
    %63 = vector.extract_strided_slice %40 {offsets = [0, 0, 8], sizes = [4, 16, 8], strides = [1, 1, 1]} : vector<4x16x32xbf16> to vector<4x16x8xbf16>
    "tpu.trace_start"() <{level = 10 : i32, message = "nqd,nkd->nqk"}> : () -> ()
    %cst_25 = arith.constant dense<0.000000e+00> : vector<4x16x16xf32>
    %64 = tpu.matmul %61, %62, %cst_25 {dimension_numbers = #tpu.dot_dimension_numbers<[2], [2], [1], [1], [0, 0, 0, 1, 1, 1], [0], [0]>} : vector<4x16x8xbf16>, vector<4x16x8xbf16>, vector<4x16x16xf32> -> vector<4x16x16xf32>
    "tpu.trace_stop"() : () -> ()
    %65 = vector.shape_cast %0 : vector<16x16xbf16> to vector<1x16x16xbf16>
    %66 = arith.extf %65 : vector<1x16x16xbf16> to vector<1x16x16xf32>
    %67 = vector.broadcast %66 : vector<1x16x16xf32> to vector<4x16x16xf32>
    %68 = arith.addf %64, %67 : vector<4x16x16xf32>
    %cst_26 = arith.constant dense<0xFF800000> : vector<4x16xf32>
    %69 = vector.multi_reduction <maximumf>, %68, %cst_26 [2] : vector<4x16x16xf32> to vector<4x16xf32>
    %70 = vector.shape_cast %69 : vector<4x16xf32> to vector<4x16x1xf32>
    %71 = vector.broadcast %70 : vector<4x16x1xf32> to vector<4x16x16xf32>
    %72 = arith.subf %68, %71 : vector<4x16x16xf32>
    %73 = math.exp %72 : vector<4x16x16xf32>
    %cst_27 = arith.constant dense<0.000000e+00> : vector<4x16xf32>
    %74 = vector.multi_reduction <add>, %73, %cst_27 [2] : vector<4x16x16xf32> to vector<4x16xf32>
    %75 = vector.shape_cast %74 : vector<4x16xf32> to vector<4x16x1xf32>
    %76 = arith.truncf %73 : vector<4x16x16xf32> to vector<4x16x16xbf16>
    "tpu.trace_start"() <{level = 10 : i32, message = "nqk,nkd->nqd"}> : () -> ()
    %cst_28 = arith.constant dense<0.000000e+00> : vector<4x16x8xf32>
    %77 = tpu.matmul %76, %63, %cst_28 {dimension_numbers = #tpu.dot_dimension_numbers<[2], [1], [1], [2], [0, 0, 0, 1, 1, 2], [0], [0]>} : vector<4x16x16xbf16>, vector<4x16x8xbf16>, vector<4x16x8xf32> -> vector<4x16x8xf32>
    "tpu.trace_stop"() : () -> ()
    %78 = tpu.reciprocal %75 {approx = true} : vector<4x16x1xf32> -> vector<4x16x1xf32>
    %79 = vector.broadcast %78 : vector<4x16x1xf32> to vector<4x16x8xf32>
    %80 = arith.mulf %77, %79 : vector<4x16x8xf32>
    %81 = vector.extract_strided_slice %36 {offsets = [0, 0, 16], sizes = [4, 16, 8], strides = [1, 1, 1]} : vector<4x16x32xbf16> to vector<4x16x8xbf16>
    %82 = vector.extract_strided_slice %38 {offsets = [0, 0, 16], sizes = [4, 16, 8], strides = [1, 1, 1]} : vector<4x16x32xbf16> to vector<4x16x8xbf16>
    %83 = vector.extract_strided_slice %40 {offsets = [0, 0, 16], sizes = [4, 16, 8], strides = [1, 1, 1]} : vector<4x16x32xbf16> to vector<4x16x8xbf16>
    "tpu.trace_start"() <{level = 10 : i32, message = "nqd,nkd->nqk"}> : () -> ()
    %cst_29 = arith.constant dense<0.000000e+00> : vector<4x16x16xf32>
    %84 = tpu.matmul %81, %82, %cst_29 {dimension_numbers = #tpu.dot_dimension_numbers<[2], [2], [1], [1], [0, 0, 0, 1, 1, 1], [0], [0]>} : vector<4x16x8xbf16>, vector<4x16x8xbf16>, vector<4x16x16xf32> -> vector<4x16x16xf32>
    "tpu.trace_stop"() : () -> ()
    %85 = vector.shape_cast %0 : vector<16x16xbf16> to vector<1x16x16xbf16>
    %86 = arith.extf %85 : vector<1x16x16xbf16> to vector<1x16x16xf32>
    %87 = vector.broadcast %86 : vector<1x16x16xf32> to vector<4x16x16xf32>
    %88 = arith.addf %84, %87 : vector<4x16x16xf32>
    %cst_30 = arith.constant dense<0xFF800000> : vector<4x16xf32>
    %89 = vector.multi_reduction <maximumf>, %88, %cst_30 [2] : vector<4x16x16xf32> to vector<4x16xf32>
    %90 = vector.shape_cast %89 : vector<4x16xf32> to vector<4x16x1xf32>
    %91 = vector.broadcast %90 : vector<4x16x1xf32> to vector<4x16x16xf32>
    %92 = arith.subf %88, %91 : vector<4x16x16xf32>
    %93 = math.exp %92 : vector<4x16x16xf32>
    %cst_31 = arith.constant dense<0.000000e+00> : vector<4x16xf32>
    %94 = vector.multi_reduction <add>, %93, %cst_31 [2] : vector<4x16x16xf32> to vector<4x16xf32>
    %95 = vector.shape_cast %94 : vector<4x16xf32> to vector<4x16x1xf32>
    %96 = arith.truncf %93 : vector<4x16x16xf32> to vector<4x16x16xbf16>
    "tpu.trace_start"() <{level = 10 : i32, message = "nqk,nkd->nqd"}> : () -> ()
    %cst_32 = arith.constant dense<0.000000e+00> : vector<4x16x8xf32>
    %97 = tpu.matmul %96, %83, %cst_32 {dimension_numbers = #tpu.dot_dimension_numbers<[2], [1], [1], [2], [0, 0, 0, 1, 1, 2], [0], [0]>} : vector<4x16x16xbf16>, vector<4x16x8xbf16>, vector<4x16x8xf32> -> vector<4x16x8xf32>
    "tpu.trace_stop"() : () -> ()
    %98 = tpu.reciprocal %95 {approx = true} : vector<4x16x1xf32> -> vector<4x16x1xf32>
    %99 = vector.broadcast %98 : vector<4x16x1xf32> to vector<4x16x8xf32>
    %100 = arith.mulf %97, %99 : vector<4x16x8xf32>
    %101 = vector.extract_strided_slice %36 {offsets = [0, 0, 24], sizes = [4, 16, 8], strides = [1, 1, 1]} : vector<4x16x32xbf16> to vector<4x16x8xbf16>
    %102 = vector.extract_strided_slice %38 {offsets = [0, 0, 24], sizes = [4, 16, 8], strides = [1, 1, 1]} : vector<4x16x32xbf16> to vector<4x16x8xbf16>
    %103 = vector.extract_strided_slice %40 {offsets = [0, 0, 24], sizes = [4, 16, 8], strides = [1, 1, 1]} : vector<4x16x32xbf16> to vector<4x16x8xbf16>
    "tpu.trace_start"() <{level = 10 : i32, message = "nqd,nkd->nqk"}> : () -> ()
    %cst_33 = arith.constant dense<0.000000e+00> : vector<4x16x16xf32>
    %104 = tpu.matmul %101, %102, %cst_33 {dimension_numbers = #tpu.dot_dimension_numbers<[2], [2], [1], [1], [0, 0, 0, 1, 1, 1], [0], [0]>} : vector<4x16x8xbf16>, vector<4x16x8xbf16>, vector<4x16x16xf32> -> vector<4x16x16xf32>
    "tpu.trace_stop"() : () -> ()
    %105 = vector.shape_cast %0 : vector<16x16xbf16> to vector<1x16x16xbf16>
    %106 = arith.extf %105 : vector<1x16x16xbf16> to vector<1x16x16xf32>
    %107 = vector.broadcast %106 : vector<1x16x16xf32> to vector<4x16x16xf32>
    %108 = arith.addf %104, %107 : vector<4x16x16xf32>
    %cst_34 = arith.constant dense<0xFF800000> : vector<4x16xf32>
    %109 = vector.multi_reduction <maximumf>, %108, %cst_34 [2] : vector<4x16x16xf32> to vector<4x16xf32>
    %110 = vector.shape_cast %109 : vector<4x16xf32> to vector<4x16x1xf32>
    %111 = vector.broadcast %110 : vector<4x16x1xf32> to vector<4x16x16xf32>
    %112 = arith.subf %108, %111 : vector<4x16x16xf32>
    %113 = math.exp %112 : vector<4x16x16xf32>
    %cst_35 = arith.constant dense<0.000000e+00> : vector<4x16xf32>
    %114 = vector.multi_reduction <add>, %113, %cst_35 [2] : vector<4x16x16xf32> to vector<4x16xf32>
    %115 = vector.shape_cast %114 : vector<4x16xf32> to vector<4x16x1xf32>
    %116 = arith.truncf %113 : vector<4x16x16xf32> to vector<4x16x16xbf16>
    "tpu.trace_start"() <{level = 10 : i32, message = "nqk,nkd->nqd"}> : () -> ()
    %cst_36 = arith.constant dense<0.000000e+00> : vector<4x16x8xf32>
    %117 = tpu.matmul %116, %103, %cst_36 {dimension_numbers = #tpu.dot_dimension_numbers<[2], [1], [1], [2], [0, 0, 0, 1, 1, 2], [0], [0]>} : vector<4x16x16xbf16>, vector<4x16x8xbf16>, vector<4x16x8xf32> -> vector<4x16x8xf32>
    "tpu.trace_stop"() : () -> ()
    %118 = tpu.reciprocal %115 {approx = true} : vector<4x16x1xf32> -> vector<4x16x1xf32>
    %119 = vector.broadcast %118 : vector<4x16x1xf32> to vector<4x16x8xf32>
    %120 = arith.mulf %117, %119 : vector<4x16x8xf32>
    %121 = tpu.concatenate %60, %80, %100, %120 in 2 : vector<4x16x8xf32>, vector<4x16x8xf32>, vector<4x16x8xf32>, vector<4x16x8xf32> -> vector<4x16x32xf32>
    %122 = vector.shape_cast %121 : vector<4x16x32xf32> to vector<64x32xf32>
    %123 = arith.truncf %122 : vector<64x32xf32> to vector<64x32xbf16>
    %c0_37 = arith.constant 0 : index
    %c0_38 = arith.constant 0 : index
    %124 = vector.load %arg8[%c0_37, %c0_38] : memref<32x32xbf16, #tpu.memory_space<vmem>>, vector<32x32xbf16>
    %cst_39 = arith.constant dense<0.000000e+00> : vector<64x32xf32>
    %125 = tpu.matmul %123, %124, %cst_39 {dimension_numbers = #tpu.dot_dimension_numbers<[1], [0], [0], [1], [0, 0, 1, 1], [], []>} : vector<64x32xbf16>, vector<32x32xbf16>, vector<64x32xf32> -> vector<64x32xf32>
    %126 = arith.addf %125, %3 : vector<64x32xf32>
    %c0_40 = arith.constant 0 : index
    %c0_41 = arith.constant 0 : index
    %127 = vector.load %arg9[%c0_40, %c0_41] : memref<1x32xf32, #tpu.memory_space<vmem>>, vector<1x32xf32>
    %c0_42 = arith.constant 0 : index
    %c0_43 = arith.constant 0 : index
    %128 = vector.load %arg10[%c0_42, %c0_43] : memref<1x32xf32, #tpu.memory_space<vmem>>, vector<1x32xf32>
    %cst_44 = arith.constant dense<0.000000e+00> : vector<64xf32>
    %129 = vector.multi_reduction <add>, %126, %cst_44 [1] : vector<64x32xf32> to vector<64xf32>
    %130 = vector.shape_cast %129 : vector<64xf32> to vector<64x1xf32>
    %cst_45 = arith.constant 3.200000e+01 : f32
    %131 = vector.broadcast %cst_45 : f32 to vector<64x1xf32>
    %132 = arith.divf %130, %131 : vector<64x1xf32>
    %133 = vector.broadcast %132 : vector<64x1xf32> to vector<64x32xf32>
    %134 = arith.subf %126, %133 : vector<64x32xf32>
    %135 = arith.mulf %134, %134 : vector<64x32xf32>
    %cst_46 = arith.constant dense<0.000000e+00> : vector<64xf32>
    %136 = vector.multi_reduction <add>, %135, %cst_46 [1] : vector<64x32xf32> to vector<64xf32>
    %137 = vector.shape_cast %136 : vector<64xf32> to vector<64x1xf32>
    %cst_47 = arith.constant 3.200000e+01 : f32
    %138 = vector.broadcast %cst_47 : f32 to vector<64x1xf32>
    %139 = arith.divf %137, %138 : vector<64x1xf32>
    %140 = vector.broadcast %132 : vector<64x1xf32> to vector<64x32xf32>
    %141 = arith.subf %126, %140 : vector<64x32xf32>
    %cst_48 = arith.constant 9.99999974E-6 : f32
    %142 = vector.broadcast %cst_48 : f32 to vector<64x1xf32>
    %143 = arith.addf %139, %142 : vector<64x1xf32>
    %144 = math.rsqrt %143 : vector<64x1xf32>
    %145 = vector.broadcast %144 : vector<64x1xf32> to vector<64x32xf32>
    %146 = arith.mulf %141, %145 : vector<64x32xf32>
    %147 = vector.broadcast %127 : vector<1x32xf32> to vector<64x32xf32>
    %148 = arith.mulf %146, %147 : vector<64x32xf32>
    %149 = vector.broadcast %128 : vector<1x32xf32> to vector<64x32xf32>
    %150 = arith.addf %148, %149 : vector<64x32xf32>
    %151 = arith.truncf %150 : vector<64x32xf32> to vector<64x32xbf16>
    %c0_49 = arith.constant 0 : index
    %c0_50 = arith.constant 0 : index
    %152 = vector.load %arg11[%c0_49, %c0_50] : memref<32x64xbf16, #tpu.memory_space<vmem>>, vector<32x64xbf16>
    %cst_51 = arith.constant dense<0.000000e+00> : vector<64x64xf32>
    %153 = tpu.matmul %151, %152, %cst_51 {dimension_numbers = #tpu.dot_dimension_numbers<[1], [0], [0], [1], [0, 0, 1, 1], [], []>} : vector<64x32xbf16>, vector<32x64xbf16>, vector<64x64xf32> -> vector<64x64xf32>
    %cst_52 = arith.constant 0.000000e+00 : f32
    %154 = vector.broadcast %cst_52 : f32 to vector<64x64xf32>
    %155 = arith.maximumf %153, %154 : vector<64x64xf32>
    %156 = arith.truncf %155 : vector<64x64xf32> to vector<64x64xbf16>
    %c0_53 = arith.constant 0 : index
    %c0_54 = arith.constant 0 : index
    %157 = vector.load %arg12[%c0_53, %c0_54] : memref<64x32xbf16, #tpu.memory_space<vmem>>, vector<64x32xbf16>
    %cst_55 = arith.constant dense<0.000000e+00> : vector<64x32xf32>
    %158 = tpu.matmul %156, %157, %cst_55 {dimension_numbers = #tpu.dot_dimension_numbers<[1], [0], [0], [1], [0, 0, 1, 1], [], []>} : vector<64x64xbf16>, vector<64x32xbf16>, vector<64x32xf32> -> vector<64x32xf32>
    %159 = arith.addf %158, %126 : vector<64x32xf32>
    %160 = vector.shape_cast %159 : vector<64x32xf32> to vector<4x16x32xf32>
    %161 = arith.truncf %160 : vector<4x16x32xf32> to vector<4x16x32xbf16>
    %c0_56 = arith.constant 0 : index
    %c0_57 = arith.constant 0 : index
    %c0_58 = arith.constant 0 : index
    %162 = vector.load %arg13[%c0_56, %c0_57, %c0_58] : memref<4x16x32xbf16, #tpu.memory_space<vmem>>, vector<4x16x32xbf16>
    tpu.vector_store %arg13[%c0_56, %c0_57, %c0_58], %161 {strides = array<i32>} : memref<4x16x32xbf16, #tpu.memory_space<vmem>>, vector<4x16x32xbf16>,
    return
  }
  func.func @transform_0(%arg0: i32) -> (i32, i32, i32) {
    %c0_i32 = arith.constant 0 : i32
    %c0_i32_0 = arith.constant 0 : i32
    %c0_i32_1 = arith.constant 0 : i32
    return %arg0, %c0_i32, %c0_i32_0 : i32, i32, i32
  }
  func.func @transform_1(%arg0: i32) -> (i32, i32) {
    %c0_i32 = arith.constant 0 : i32
    %c0_i32_0 = arith.constant 0 : i32
    %c0_i32_1 = arith.constant 0 : i32
    return %c0_i32, %c0_i32_0 : i32, i32
  }
  func.func @transform_2(%arg0: i32) -> (i32, i32) {
    %c0_i32 = arith.constant 0 : i32
    %c0_i32_0 = arith.constant 0 : i32
    %c0_i32_1 = arith.constant 0 : i32
    return %c0_i32, %c0_i32_0 : i32, i32
  }
  func.func @transform_3(%arg0: i32) -> (i32, i32) {
    %c0_i32 = arith.constant 0 : i32
    %c0_i32_0 = arith.constant 0 : i32
    %c0_i32_1 = arith.constant 0 : i32
    return %c0_i32, %c0_i32_0 : i32, i32
  }
  func.func @transform_4(%arg0: i32) -> (i32, i32) {
    %c0_i32 = arith.constant 0 : i32
    %c0_i32_0 = arith.constant 0 : i32
    %c0_i32_1 = arith.constant 0 : i32
    return %c0_i32, %c0_i32_0 : i32, i32
  }
  func.func @transform_5(%arg0: i32) -> (i32, i32) {
    %c0_i32 = arith.constant 0 : i32
    %c0_i32_0 = arith.constant 0 : i32
    %c0_i32_1 = arith.constant 0 : i32
    return %c0_i32, %c0_i32_0 : i32, i32
  }
  func.func @transform_6(%arg0: i32) -> (i32, i32) {
    %c0_i32 = arith.constant 0 : i32
    %c0_i32_0 = arith.constant 0 : i32
    %c0_i32_1 = arith.constant 0 : i32
    return %c0_i32, %c0_i32_0 : i32, i32
  }
  func.func @transform_7(%arg0: i32) -> (i32, i32) {
    %c0_i32 = arith.constant 0 : i32
    %c0_i32_0 = arith.constant 0 : i32
    %c0_i32_1 = arith.constant 0 : i32
    return %c0_i32, %c0_i32_0 : i32, i32
  }
  func.func @transform_8(%arg0: i32) -> (i32, i32) {
    %c0_i32 = arith.constant 0 : i32
    %c0_i32_0 = arith.constant 0 : i32
    %c0_i32_1 = arith.constant 0 : i32
    return %c0_i32, %c0_i32_0 : i32, i32
  }
  func.func @transform_9(%arg0: i32) -> (i32, i32) {
    %c0_i32 = arith.constant 0 : i32
    %c0_i32_0 = arith.constant 0 : i32
    %c0_i32_1 = arith.constant 0 : i32
    return %c0_i32, %c0_i32_0 : i32, i32
  }
  func.func @transform_10(%arg0: i32) -> (i32, i32) {
    %c0_i32 = arith.constant 0 : i32
    %c0_i32_0 = arith.constant 0 : i32
    %c0_i32_1 = arith.constant 0 : i32
    return %c0_i32, %c0_i32_0 : i32, i32
  }
  func.func @transform_11(%arg0: i32) -> (i32, i32) {
    %c0_i32 = arith.constant 0 : i32
    %c0_i32_0 = arith.constant 0 : i32
    %c0_i32_1 = arith.constant 0 : i32
    return %c0_i32, %c0_i32_0 : i32, i32
  }
  func.func @transform_12(%arg0: i32) -> (i32, i32, i32) {
    %c0_i32 = arith.constant 0 : i32
    %c0_i32_0 = arith.constant 0 : i32
    %c0_i32_1 = arith.constant 0 : i32
    return %arg0, %c0_i32, %c0_i32_0 : i32, i32, i32
  }
}

module attributes {stable_mosaic.version = 11 : i64} {
  func.func @epix_kernel(%arg0: i32, %arg1: memref<4x16x32xbf16, #tpu.memory_space<vmem>>, %arg2: memref<16x16xbf16, #tpu.memory_space<vmem>>, %arg3: memref<1x32xf32, #tpu.memory_space<vmem>>, %arg4: memref<1x32xf32, #tpu.memory_space<vmem>>, %arg5: memref<32x32xbf16, #tpu.memory_space<vmem>>, %arg6: memref<32x32xbf16, #tpu.memory_space<vmem>>, %arg7: memref<32x32xbf16, #tpu.memory_space<vmem>>, %arg8: memref<32x32xbf16, #tpu.memory_space<vmem>>, %arg9: memref<1x32xf32, #tpu.memory_space<vmem>>, %arg10: memref<1x32xf32, #tpu.memory_space<vmem>>, %arg11: memref<32x64xbf16, #tpu.memory_space<vmem>>, %arg12: memref<64x32xbf16, #tpu.memory_space<vmem>>, %arg13: memref<4x16x32xbf16, #tpu.memory_space<vmem>>) attributes {dimension_semantics = [#tpu.dimension_semantics<parallel>], iteration_bounds = array<i64: 4>, scalar_prefetch = 0 : i64, scratch_operands = 0 : i64, tpu.core_type = #tpu.core_type<tc>, window_params = [{transform_indices = @transform_0, window_bounds = array<i64: 4, 16, 32>}, {pipeline_mode = #tpu.pipeline_mode<synchronous>, transform_indices = @transform_1, window_bounds = array<i64: 16, 16>}, {pipeline_mode = #tpu.pipeline_mode<synchronous>, transform_indices = @transform_2, window_bounds = array<i64: 1, 32>}, {pipeline_mode = #tpu.pipeline_mode<synchronous>, transform_indices = @transform_3, window_bounds = array<i64: 1, 32>}, {pipeline_mode = #tpu.pipeline_mode<synchronous>, transform_indices = @transform_4, window_bounds = array<i64: 32, 32>}, {pipeline_mode = #tpu.pipeline_mode<synchronous>, transform_indices = @transform_5, window_bounds = array<i64: 32, 32>}, {pipeline_mode = #tpu.pipeline_mode<synchronous>, transform_indices = @transform_6, window_bounds = array<i64: 32, 32>}, {pipeline_mode = #tpu.pipeline_mode<synchronous>, transform_indices = @transform_7, window_bounds = array<i64: 32, 32>}, {pipeline_mode = #tpu.pipeline_mode<synchronous>, transform_indices = @transform_8, window_bounds = array<i64: 1, 32>}, {pipeline_mode = #tpu.pipeline_mode<synchronous>, transform_indices = @transform_9, window_bounds = array<i64: 1, 32>}, {pipeline_mode = #tpu.pipeline_mode<synchronous>, transform_indices = @transform_10, window_bounds = array<i64: 32, 64>}, {pipeline_mode = #tpu.pipeline_mode<synchronous>, transform_indices = @transform_11, window_bounds = array<i64: 64, 32>}, {transform_indices = @transform_12, window_bounds = array<i64: 4, 16, 32>}]} {
    %c0 = arith.constant 0 : index
    %c0_0 = arith.constant 0 : index
    %0 = vector.load %arg2[%c0, %c0_0] : memref<16x16xbf16, #tpu.memory_space<vmem>>, vector<16x16xbf16>
    %c0_1 = arith.constant 0 : index
    %c0_2 = arith.constant 0 : index
    %c0_3 = arith.constant 0 : index
    %1 = vector.load %arg1[%c0_1, %c0_2, %c0_3] : memref<4x16x32xbf16, #tpu.memory_space<vmem>>, vector<4x16x32xbf16>
    %2 = vector.shape_cast %1 : vector<4x16x32xbf16> to vector<64x32xbf16>
    %3 = arith.extf %2 : vector<64x32xbf16> to vector<64x32xf32>
    %c0_4 = arith.constant 0 : index
    %c0_5 = arith.constant 0 : index
    %4 = vector.load %arg3[%c0_4, %c0_5] : memref<1x32xf32, #tpu.memory_space<vmem>>, vector<1x32xf32>
    %c0_6 = arith.constant 0 : index
    %c0_7 = arith.constant 0 : index
    %5 = vector.load %arg4[%c0_6, %c0_7] : memref<1x32xf32, #tpu.memory_space<vmem>>, vector<1x32xf32>
    %cst = arith.constant dense<0.000000e+00> : vector<64xf32>
    %6 = vector.multi_reduction <add>, %3, %cst [1] : vector<64x32xf32> to vector<64xf32>
    %7 = vector.shape_cast %6 : vector<64xf32> to vector<64x1xf32>
    %cst_8 = arith.constant 3.200000e+01 : f32
    %8 = vector.broadcast %cst_8 : f32 to vector<64x1xf32>
    %9 = arith.divf %7, %8 : vector<64x1xf32>
    %10 = vector.broadcast %9 : vector<64x1xf32> to vector<64x32xf32>
    %11 = arith.subf %3, %10 : vector<64x32xf32>
    %12 = arith.mulf %11, %11 : vector<64x32xf32>
    %cst_9 = arith.constant dense<0.000000e+00> : vector<64xf32>
    %13 = vector.multi_reduction <add>, %12, %cst_9 [1] : vector<64x32xf32> to vector<64xf32>
    %14 = vector.shape_cast %13 : vector<64xf32> to vector<64x1xf32>
    %cst_10 = arith.constant 3.200000e+01 : f32
    %15 = vector.broadcast %cst_10 : f32 to vector<64x1xf32>
    %16 = arith.divf %14, %15 : vector<64x1xf32>
    %17 = vector.broadcast %9 : vector<64x1xf32> to vector<64x32xf32>
    %18 = arith.subf %3, %17 : vector<64x32xf32>
    %cst_11 = arith.constant 9.99999974E-6 : f32
    %19 = vector.broadcast %cst_11 : f32 to vector<64x1xf32>
    %20 = arith.addf %16, %19 : vector<64x1xf32>
    %21 = math.rsqrt %20 : vector<64x1xf32>
    %22 = vector.broadcast %21 : vector<64x1xf32> to vector<64x32xf32>
    %23 = arith.mulf %18, %22 : vector<64x32xf32>
    %24 = vector.broadcast %4 : vector<1x32xf32> to vector<64x32xf32>
    %25 = arith.mulf %23, %24 : vector<64x32xf32>
    %26 = vector.broadcast %5 : vector<1x32xf32> to vector<64x32xf32>
    %27 = arith.addf %25, %26 : vector<64x32xf32>
    %28 = arith.truncf %27 : vector<64x32xf32> to vector<64x32xbf16>
    %c0_12 = arith.constant 0 : index
    %c0_13 = arith.constant 0 : index
    %29 = vector.load %arg5[%c0_12, %c0_13] : memref<32x32xbf16, #tpu.memory_space<vmem>>, vector<32x32xbf16>
    %cst_14 = arith.constant dense<0.000000e+00> : vector<64x32xf32>
    %30 = tpu.matmul %28, %29, %cst_14 {dimension_numbers = #tpu.dot_dimension_numbers<[1], [0], [0], [1], [0, 0, 1, 1], [], []>} : vector<64x32xbf16>, vector<32x32xbf16>, vector<64x32xf32> -> vector<64x32xf32>
    %c0_15 = arith.constant 0 : index
    %c0_16 = arith.constant 0 : index
    %31 = vector.load %arg6[%c0_15, %c0_16] : memref<32x32xbf16, #tpu.memory_space<vmem>>, vector<32x32xbf16>
    %cst_17 = arith.constant dense<0.000000e+00> : vector<64x32xf32>
    %32 = tpu.matmul %28, %31, %cst_17 {dimension_numbers = #tpu.dot_dimension_numbers<[1], [0], [0], [1], [0, 0, 1, 1], [], []>} : vector<64x32xbf16>, vector<32x32xbf16>, vector<64x32xf32> -> vector<64x32xf32>
    %c0_18 = arith.constant 0 : index
    %c0_19 = arith.constant 0 : index
    %33 = vector.load %arg7[%c0_18, %c0_19] : memref<32x32xbf16, #tpu.memory_space<vmem>>, vector<32x32xbf16>
    %cst_20 = arith.constant dense<0.000000e+00> : vector<64x32xf32>
    %34 = tpu.matmul %2, %33, %cst_20 {dimension_numbers = #tpu.dot_dimension_numbers<[1], [0], [0], [1], [0, 0, 1, 1], [], []>} : vector<64x32xbf16>, vector<32x32xbf16>, vector<64x32xf32> -> vector<64x32xf32>
    %35 = arith.truncf %30 : vector<64x32xf32> to vector<64x32xbf16>
    %36 = vector.shape_cast %35 : vector<64x32xbf16> to vector<4x16x32xbf16>
    %37 = arith.truncf %32 : vector<64x32xf32> to vector<64x32xbf16>
    %38 = vector.shape_cast %37 : vector<64x32xbf16> to vector<4x16x32xbf16>
    %39 = arith.truncf %34 : vector<64x32xf32> to vector<64x32xbf16>
    %40 = vector.shape_cast %39 : vector<64x32xbf16> to vector<4x16x32xbf16>
    %41 = vector.extract_strided_slice %36 {offsets = [0, 0, 0], sizes = [4, 16, 8], strides = [1, 1, 1]} : vector<4x16x32xbf16> to vector<4x16x8xbf16>
    %42 = vector.extract_strided_slice %38 {offsets = [0, 0, 0], sizes = [4, 16, 8], strides = [1, 1, 1]} : vector<4x16x32xbf16> to vector<4x16x8xbf16>
    %43 = vector.extract_strided_slice %40 {offsets = [0, 0, 0], sizes = [4, 16, 8], strides = [1, 1, 1]} : vector<4x16x32xbf16> to vector<4x16x8xbf16>
    "tpu.trace_start"() <{level = 10 : i32, message = "nqd,nkd->nqk"}> : () -> ()
    %cst_21 = arith.constant dense<0.000000e+00> : vector<4x16x16xf32>
    %44 = tpu.matmul %41, %42, %cst_21 {dimension_numbers = #tpu.dot_dimension_numbers<[2], [2], [1], [1], [0, 0, 0, 1, 1, 1], [0], [0]>} : vector<4x16x8xbf16>, vector<4x16x8xbf16>, vector<4x16x16xf32> -> vector<4x16x16xf32>
    "tpu.trace_stop"() : () -> ()
    %45 = vector.shape_cast %0 : vector<16x16xbf16> to vector<1x16x16xbf16>
    %46 = arith.extf %45 : vector<1x16x16xbf16> to vector<1x16x16xf32>
    %47 = vector.broadcast %46 : vector<1x16x16xf32> to vector<4x16x16xf32>
    %48 = arith.addf %44, %47 : vector<4x16x16xf32>
    %cst_22 = arith.constant dense<0xFF800000> : vector<4x16xf32>
    %49 = vector.multi_reduction <maximumf>, %48, %cst_22 [2] : vector<4x16x16xf32> to vector<4x16xf32>
    %50 = vector.shape_cast %49 : vector<4x16xf32> to vector<4x16x1xf32>
    %51 = vector.broadcast %50 : vector<4x16x1xf32> to vector<4x16x16xf32>
    %52 = arith.subf %48, %51 : vector<4x16x16xf32>
    %53 = math.exp %52 : vector<4x16x16xf32>
    %cst_23 = arith.constant dense<0.000000e+00> : vector<4x16xf32>
    %54 = vector.multi_reduction <add>, %53, %cst_23 [2] : vector<4x16x16xf32> to vector<4x16xf32>
    %55 = vector.shape_cast %54 : vector<4x16xf32> to vector<4x16x1xf32>
    %56 = arith.truncf %53 : vector<4x16x16xf32> to vector<4x16x16xbf16>
    "tpu.trace_start"() <{level = 10 : i32, message = "nqk,nkd->nqd"}> : () -> ()
    %cst_24 = arith.constant dense<0.000000e+00> : vector<4x16x8xf32>
    %57 = tpu.matmul %56, %43, %cst_24 {dimension_numbers = #tpu.dot_dimension_numbers<[2], [1], [1], [2], [0, 0, 0, 1, 1, 2], [0], [0]>} : vector<4x16x16xbf16>, vector<4x16x8xbf16>, vector<4x16x8xf32> -> vector<4x16x8xf32>
    "tpu.trace_stop"() : () -> ()
    %58 = tpu.reciprocal %55 {approx = true} : vector<4x16x1xf32> -> vector<4x16x1xf32>
    %59 = vector.broadcast %58 : vector<4x16x1xf32> to vector<4x16x8xf32>
    %60 = arith.mulf %57, %59 : vector<4x16x8xf32>
    %61 = vector.extract_strided_slice %36 {offsets = [0, 0, 8], sizes = [4, 16, 8], strides = [1, 1, 1]} : vector<4x16x32xbf16> to vector<4x16x8xbf16>
    %62 = vector.extract_strided_slice %38 {offsets = [0, 0, 8], sizes = [4, 16, 8], strides = [1, 1, 1]} : vector<4x16x32xbf16> to vector<4x16x8xbf16>
    %63 = vector.extract_strided_slice %40 {offsets = [0, 0, 8], sizes = [4, 16, 8], strides = [1, 1, 1]} : vector<4x16x32xbf16> to vector<4x16x8xbf16>
    "tpu.trace_start"() <{level = 10 : i32, message = "nqd,nkd->nqk"}> : () -> ()
    %cst_25 = arith.constant dense<0.000000e+00> : vector<4x16x16xf32>
    %64 = tpu.matmul %61, %62, %cst_25 {dimension_numbers = #tpu.dot_dimension_numbers<[2], [2], [1], [1], [0, 0, 0, 1, 1, 1], [0], [0]>} : vector<4x16x8xbf16>, vector<4x16x8xbf16>, vector<4x16x16xf32> -> vector<4x16x16xf32>
    "tpu.trace_stop"() : () -> ()
    %65 = vector.shape_cast %0 : vector<16x16xbf16> to vector<1x16x16xbf16>
    %66 = arith.extf %65 : vector<1x16x16xbf16> to vector<1x16x16xf32>
    %67 = vector.broadcast %66 : vector<1x16x16xf32> to vector<4x16x16xf32>
    %68 = arith.addf %64, %67 : vector<4x16x16xf32>
    %cst_26 = arith.constant dense<0xFF800000> : vector<4x16xf32>
    %69 = vector.multi_reduction <maximumf>, %68, %cst_26 [2] : vector<4x16x16xf32> to vector<4x16xf32>
    %70 = vector.shape_cast %69 : vector<4x16xf32> to vector<4x16x1xf32>
    %71 = vector.broadcast %70 : vector<4x16x1xf32> to vector<4x16x16xf32>
    %72 = arith.subf %68, %71 : vector<4x16x16xf32>
    %73 = math.exp %72 : vector<4x16x16xf32>
    %cst_27 = arith.constant dense<0.000000e+00> : vector<4x16xf32>
    %74 = vector.multi_reduction <add>, %73, %cst_27 [2] : vector<4x16x16xf32> to vector<4x16xf32>
    %75 = vector.shape_cast %74 : vector<4x16xf32> to vector<4x16x1xf32>
    %76 = arith.truncf %73 : vector<4x16x16xf32> to vector<4x16x16xbf16>
    "tpu.trace_start"() <{level = 10 : i32, message = "nqk,nkd->nqd"}> : () -> ()
    %cst_28 = arith.constant dense<0.000000e+00> : vector<4x16x8xf32>
    %77 = tpu.matmul %76, %63, %cst_28 {dimension_numbers = #tpu.dot_dimension_numbers<[2], [1], [1], [2], [0, 0, 0, 1, 1, 2], [0], [0]>} : vector<4x16x16xbf16>, vector<4x16x8xbf16>, vector<4x16x8xf32> -> vector<4x16x8xf32>
    "tpu.trace_stop"() : () -> ()
    %78 = tpu.reciprocal %75 {approx = true} : vector<4x16x1xf32> -> vector<4x16x1xf32>
    %79 = vector.broadcast %78 : vector<4x16x1xf32> to vector<4x16x8xf32>
    %80 = arith.mulf %77, %79 : vector<4x16x8xf32>
    %81 = vector.extract_strided_slice %36 {offsets = [0, 0, 16], sizes = [4, 16, 8], strides = [1, 1, 1]} : vector<4x16x32xbf16> to vector<4x16x8xbf16>
    %82 = vector.extract_strided_slice %38 {offsets = [0, 0, 16], sizes = [4, 16, 8], strides = [1, 1, 1]} : vector<4x16x32xbf16> to vector<4x16x8xbf16>
    %83 = vector.extract_strided_slice %40 {offsets = [0, 0, 16], sizes = [4, 16, 8], strides = [1, 1, 1]} : vector<4x16x32xbf16> to vector<4x16x8xbf16>
    "tpu.trace_start"() <{level = 10 : i32, message = "nqd,nkd->nqk"}> : () -> ()
    %cst_29 = arith.constant dense<0.000000e+00> : vector<4x16x16xf32>
    %84 = tpu.matmul %81, %82, %cst_29 {dimension_numbers = #tpu.dot_dimension_numbers<[2], [2], [1], [1], [0, 0, 0, 1, 1, 1], [0], [0]>} : vector<4x16x8xbf16>, vector<4x16x8xbf16>, vector<4x16x16xf32> -> vector<4x16x16xf32>
    "tpu.trace_stop"() : () -> ()
    %85 = vector.shape_cast %0 : vector<16x16xbf16> to vector<1x16x16xbf16>
    %86 = arith.extf %85 : vector<1x16x16xbf16> to vector<1x16x16xf32>
    %87 = vector.broadcast %86 : vector<1x16x16xf32> to vector<4x16x16xf32>
    %88 = arith.addf %84, %87 : vector<4x16x16xf32>
    %cst_30 = arith.constant dense<0xFF800000> : vector<4x16xf32>
    %89 = vector.multi_reduction <maximumf>, %88, %cst_30 [2] : vector<4x16x16xf32> to vector<4x16xf32>
    %90 = vector.shape_cast %89 : vector<4x16xf32> to vector<4x16x1xf32>
    %91 = vector.broadcast %90 : vector<4x16x1xf32> to vector<4x16x16xf32>
    %92 = arith.subf %88, %91 : vector<4x16x16xf32>
    %93 = math.exp %92 : vector<4x16x16xf32>
    %cst_31 = arith.constant dense<0.000000e+00> : vector<4x16xf32>
    %94 = vector.multi_reduction <add>, %93, %cst_31 [2] : vector<4x16x16xf32> to vector<4x16xf32>
    %95 = vector.shape_cast %94 : vector<4x16xf32> to vector<4x16x1xf32>
    %96 = arith.truncf %93 : vector<4x16x16xf32> to vector<4x16x16xbf16>
    "tpu.trace_start"() <{level = 10 : i32, message = "nqk,nkd->nqd"}> : () -> ()
    %cst_32 = arith.constant dense<0.000000e+00> : vector<4x16x8xf32>
    %97 = tpu.matmul %96, %83, %cst_32 {dimension_numbers = #tpu.dot_dimension_numbers<[2], [1], [1], [2], [0, 0, 0, 1, 1, 2], [0], [0]>} : vector<4x16x16xbf16>, vector<4x16x8xbf16>, vector<4x16x8xf32> -> vector<4x16x8xf32>
    "tpu.trace_stop"() : () -> ()
    %98 = tpu.reciprocal %95 {approx = true} : vector<4x16x1xf32> -> vector<4x16x1xf32>
    %99 = vector.broadcast %98 : vector<4x16x1xf32> to vector<4x16x8xf32>
    %100 = arith.mulf %97, %99 : vector<4x16x8xf32>
    %101 = vector.extract_strided_slice %36 {offsets = [0, 0, 24], sizes = [4, 16, 8], strides = [1, 1, 1]} : vector<4x16x32xbf16> to vector<4x16x8xbf16>
    %102 = vector.extract_strided_slice %38 {offsets = [0, 0, 24], sizes = [4, 16, 8], strides = [1, 1, 1]} : vector<4x16x32xbf16> to vector<4x16x8xbf16>
    %103 = vector.extract_strided_slice %40 {offsets = [0, 0, 24], sizes = [4, 16, 8], strides = [1, 1, 1]} : vector<4x16x32xbf16> to vector<4x16x8xbf16>
    "tpu.trace_start"() <{level = 10 : i32, message = "nqd,nkd->nqk"}> : () -> ()
    %cst_33 = arith.constant dense<0.000000e+00> : vector<4x16x16xf32>
    %104 = tpu.matmul %101, %102, %cst_33 {dimension_numbers = #tpu.dot_dimension_numbers<[2], [2], [1], [1], [0, 0, 0, 1, 1, 1], [0], [0]>} : vector<4x16x8xbf16>, vector<4x16x8xbf16>, vector<4x16x16xf32> -> vector<4x16x16xf32>
    "tpu.trace_stop"() : () -> ()
    %105 = vector.shape_cast %0 : vector<16x16xbf16> to vector<1x16x16xbf16>
    %106 = arith.extf %105 : vector<1x16x16xbf16> to vector<1x16x16xf32>
    %107 = vector.broadcast %106 : vector<1x16x16xf32> to vector<4x16x16xf32>
    %108 = arith.addf %104, %107 : vector<4x16x16xf32>
    %cst_34 = arith.constant dense<0xFF800000> : vector<4x16xf32>
    %109 = vector.multi_reduction <maximumf>, %108, %cst_34 [2] : vector<4x16x16xf32> to vector<4x16xf32>
    %110 = vector.shape_cast %109 : vector<4x16xf32> to vector<4x16x1xf32>
    %111 = vector.broadcast %110 : vector<4x16x1xf32> to vector<4x16x16xf32>
    %112 = arith.subf %108, %111 : vector<4x16x16xf32>
    %113 = math.exp %112 : vector<4x16x16xf32>
    %cst_35 = arith.constant dense<0.000000e+00> : vector<4x16xf32>
    %114 = vector.multi_reduction <add>, %113, %cst_35 [2] : vector<4x16x16xf32> to vector<4x16xf32>
    %115 = vector.shape_cast %114 : vector<4x16xf32> to vector<4x16x1xf32>
    %116 = arith.truncf %113 : vector<4x16x16xf32> to vector<4x16x16xbf16>
    "tpu.trace_start"() <{level = 10 : i32, message = "nqk,nkd->nqd"}> : () -> ()
    %cst_36 = arith.constant dense<0.000000e+00> : vector<4x16x8xf32>
    %117 = tpu.matmul %116, %103, %cst_36 {dimension_numbers = #tpu.dot_dimension_numbers<[2], [1], [1], [2], [0, 0, 0, 1, 1, 2], [0], [0]>} : vector<4x16x16xbf16>, vector<4x16x8xbf16>, vector<4x16x8xf32> -> vector<4x16x8xf32>
    "tpu.trace_stop"() : () -> ()
    %118 = tpu.reciprocal %115 {approx = true} : vector<4x16x1xf32> -> vector<4x16x1xf32>
    %119 = vector.broadcast %118 : vector<4x16x1xf32> to vector<4x16x8xf32>
    %120 = arith.mulf %117, %119 : vector<4x16x8xf32>
    %121 = tpu.concatenate %60, %80, %100, %120 in 2 : vector<4x16x8xf32>, vector<4x16x8xf32>, vector<4x16x8xf32>, vector<4x16x8xf32> -> vector<4x16x32xf32>
    %122 = vector.shape_cast %121 : vector<4x16x32xf32> to vector<64x32xf32>
    %123 = arith.truncf %122 : vector<64x32xf32> to vector<64x32xbf16>
    %c0_37 = arith.constant 0 : index
    %c0_38 = arith.constant 0 : index
    %124 = vector.load %arg8[%c0_37, %c0_38] : memref<32x32xbf16, #tpu.memory_space<vmem>>, vector<32x32xbf16>
    %cst_39 = arith.constant dense<0.000000e+00> : vector<64x32xf32>
    %125 = tpu.matmul %123, %124, %cst_39 {dimension_numbers = #tpu.dot_dimension_numbers<[1], [0], [0], [1], [0, 0, 1, 1], [], []>} : vector<64x32xbf16>, vector<32x32xbf16>, vector<64x32xf32> -> vector<64x32xf32>
    %126 = arith.addf %125, %3 : vector<64x32xf32>
    %c0_40 = arith.constant 0 : index
    %c0_41 = arith.constant 0 : index
    %127 = vector.load %arg9[%c0_40, %c0_41] : memref<1x32xf32, #tpu.memory_space<vmem>>, vector<1x32xf32>
    %c0_42 = arith.constant 0 : index
    %c0_43 = arith.constant 0 : index
    %128 = vector.load %arg10[%c0_42, %c0_43] : memref<1x32xf32, #tpu.memory_space<vmem>>, vector<1x32xf32>
    %cst_44 = arith.constant dense<0.000000e+00> : vector<64xf32>
    %129 = vector.multi_reduction <add>, %126, %cst_44 [1] : vector<64x32xf32> to vector<64xf32>
    %130 = vector.shape_cast %129 : vector<64xf32> to vector<64x1xf32>
    %cst_45 = arith.constant 3.200000e+01 : f32
    %131 = vector.broadcast %cst_45 : f32 to vector<64x1xf32>
    %132 = arith.divf %130, %131 : vector<64x1xf32>
    %133 = vector.broadcast %132 : vector<64x1xf32> to vector<64x32xf32>
    %134 = arith.subf %126, %133 : vector<64x32xf32>
    %135 = arith.mulf %134, %134 : vector<64x32xf32>
    %cst_46 = arith.constant dense<0.000000e+00> : vector<64xf32>
    %136 = vector.multi_reduction <add>, %135, %cst_46 [1] : vector<64x32xf32> to vector<64xf32>
    %137 = vector.shape_cast %136 : vector<64xf32> to vector<64x1xf32>
    %cst_47 = arith.constant 3.200000e+01 : f32
    %138 = vector.broadcast %cst_47 : f32 to vector<64x1xf32>
    %139 = arith.divf %137, %138 : vector<64x1xf32>
    %140 = vector.broadcast %132 : vector<64x1xf32> to vector<64x32xf32>
    %141 = arith.subf %126, %140 : vector<64x32xf32>
    %cst_48 = arith.constant 9.99999974E-6 : f32
    %142 = vector.broadcast %cst_48 : f32 to vector<64x1xf32>
    %143 = arith.addf %139, %142 : vector<64x1xf32>
    %144 = math.rsqrt %143 : vector<64x1xf32>
    %145 = vector.broadcast %144 : vector<64x1xf32> to vector<64x32xf32>
    %146 = arith.mulf %141, %145 : vector<64x32xf32>
    %147 = vector.broadcast %127 : vector<1x32xf32> to vector<64x32xf32>
    %148 = arith.mulf %146, %147 : vector<64x32xf32>
    %149 = vector.broadcast %128 : vector<1x32xf32> to vector<64x32xf32>
    %150 = arith.addf %148, %149 : vector<64x32xf32>
    %151 = arith.truncf %150 : vector<64x32xf32> to vector<64x32xbf16>
    %c0_49 = arith.constant 0 : index
    %c0_50 = arith.constant 0 : index
    %152 = vector.load %arg11[%c0_49, %c0_50] : memref<32x64xbf16, #tpu.memory_space<vmem>>, vector<32x64xbf16>
    %cst_51 = arith.constant dense<0.000000e+00> : vector<64x64xf32>
    %153 = tpu.matmul %151, %152, %cst_51 {dimension_numbers = #tpu.dot_dimension_numbers<[1], [0], [0], [1], [0, 0, 1, 1], [], []>} : vector<64x32xbf16>, vector<32x64xbf16>, vector<64x64xf32> -> vector<64x64xf32>
    %cst_52 = arith.constant 0.000000e+00 : f32
    %154 = vector.broadcast %cst_52 : f32 to vector<64x64xf32>
    %155 = arith.maximumf %153, %154 : vector<64x64xf32>
    %156 = arith.truncf %155 : vector<64x64xf32> to vector<64x64xbf16>
    %c0_53 = arith.constant 0 : index
    %c0_54 = arith.constant 0 : index
    %157 = vector.load %arg12[%c0_53, %c0_54] : memref<64x32xbf16, #tpu.memory_space<vmem>>, vector<64x32xbf16>
    %cst_55 = arith.constant dense<0.000000e+00> : vector<64x32xf32>
    %158 = tpu.matmul %156, %157, %cst_55 {dimension_numbers = #tpu.dot_dimension_numbers<[1], [0], [0], [1], [0, 0, 1, 1], [], []>} : vector<64x64xbf16>, vector<64x32xbf16>, vector<64x32xf32> -> vector<64x32xf32>
    %159 = arith.addf %158, %126 : vector<64x32xf32>
    %160 = vector.shape_cast %159 : vector<64x32xf32> to vector<4x16x32xf32>
    %161 = arith.truncf %160 : vector<4x16x32xf32> to vector<4x16x32xbf16>
    %c0_56 = arith.constant 0 : index
    %c0_57 = arith.constant 0 : index
    %c0_58 = arith.constant 0 : index
    %162 = vector.load %arg13[%c0_56, %c0_57, %c0_58] : memref<4x16x32xbf16, #tpu.memory_space<vmem>>, vector<4x16x32xbf16>
    tpu.vector_store %arg13[%c0_56, %c0_57, %c0_58], %161 {strides = array<i32>} : memref<4x16x32xbf16, #tpu.memory_space<vmem>>, vector<4x16x32xbf16>,
    return
  }
  func.func @transform_0(%arg0: i32) -> (i32, i32, i32) {
    %c0_i32 = arith.constant 0 : i32
    %c0_i32_0 = arith.constant 0 : i32
    %c0_i32_1 = arith.constant 0 : i32
    return %arg0, %c0_i32, %c0_i32_0 : i32, i32, i32
  }
  func.func @transform_1(%arg0: i32) -> (i32, i32) {
    %c0_i32 = arith.constant 0 : i32
    %c0_i32_0 = arith.constant 0 : i32
    %c0_i32_1 = arith.constant 0 : i32
    return %c0_i32, %c0_i32_0 : i32, i32
  }
  func.func @transform_2(%arg0: i32) -> (i32, i32) {
    %c0_i32 = arith.constant 0 : i32
    %c0_i32_0 = arith.constant 0 : i32
    %c0_i32_1 = arith.constant 0 : i32
    return %c0_i32, %c0_i32_0 : i32, i32
  }
  func.func @transform_3(%arg0: i32) -> (i32, i32) {
    %c0_i32 = arith.constant 0 : i32
    %c0_i32_0 = arith.constant 0 : i32
    %c0_i32_1 = arith.constant 0 : i32
    return %c0_i32, %c0_i32_0 : i32, i32
  }
  func.func @transform_4(%arg0: i32) -> (i32, i32) {
    %c0_i32 = arith.constant 0 : i32
    %c0_i32_0 = arith.constant 0 : i32
    %c0_i32_1 = arith.constant 0 : i32
    return %c0_i32, %c0_i32_0 : i32, i32
  }
  func.func @transform_5(%arg0: i32) -> (i32, i32) {
    %c0_i32 = arith.constant 0 : i32
    %c0_i32_0 = arith.constant 0 : i32
    %c0_i32_1 = arith.constant 0 : i32
    return %c0_i32, %c0_i32_0 : i32, i32
  }
  func.func @transform_6(%arg0: i32) -> (i32, i32) {
    %c0_i32 = arith.constant 0 : i32
    %c0_i32_0 = arith.constant 0 : i32
    %c0_i32_1 = arith.constant 0 : i32
    return %c0_i32, %c0_i32_0 : i32, i32
  }
  func.func @transform_7(%arg0: i32) -> (i32, i32) {
    %c0_i32 = arith.constant 0 : i32
    %c0_i32_0 = arith.constant 0 : i32
    %c0_i32_1 = arith.constant 0 : i32
    return %c0_i32, %c0_i32_0 : i32, i32
  }
  func.func @transform_8(%arg0: i32) -> (i32, i32) {
    %c0_i32 = arith.constant 0 : i32
    %c0_i32_0 = arith.constant 0 : i32
    %c0_i32_1 = arith.constant 0 : i32
    return %c0_i32, %c0_i32_0 : i32, i32
  }
  func.func @transform_9(%arg0: i32) -> (i32, i32) {
    %c0_i32 = arith.constant 0 : i32
    %c0_i32_0 = arith.constant 0 : i32
    %c0_i32_1 = arith.constant 0 : i32
    return %c0_i32, %c0_i32_0 : i32, i32
  }
  func.func @transform_10(%arg0: i32) -> (i32, i32) {
    %c0_i32 = arith.constant 0 : i32
    %c0_i32_0 = arith.constant 0 : i32
    %c0_i32_1 = arith.constant 0 : i32
    return %c0_i32, %c0_i32_0 : i32, i32
  }
  func.func @transform_11(%arg0: i32) -> (i32, i32) {
    %c0_i32 = arith.constant 0 : i32
    %c0_i32_0 = arith.constant 0 : i32
    %c0_i32_1 = arith.constant 0 : i32
    return %c0_i32, %c0_i32_0 : i32, i32
  }
  func.func @transform_12(%arg0: i32) -> (i32, i32, i32) {
    %c0_i32 = arith.constant 0 : i32
    %c0_i32_0 = arith.constant 0 : i32
    %c0_i32_1 = arith.constant 0 : i32
    return %arg0, %c0_i32, %c0_i32_0 : i32, i32, i32
  }
}

</mosaic_0001>

<bundles_post_ra>
// kernel: tpu_custom_call.1
= control target key start
LH: loop header
LB: loop body
LE: loop exit
PB: predicated region body
PF: predicated region fallthrough
CT: control target
= control target key end

     0   :  { %s4740_s0 = inlined_call_operand.hbm [shape: bf16[16,16,32], index: 0, kind: input, shape index: {}]   ;;  %s4741_s1 = inlined_call_operand.hbm [shape: bf16[16,16], index: 1, kind: input, shape index: {}]   ;;  %s4742_s2 = inlined_call_operand.vmem [shape: f32[1,32], index: 2, kind: input, shape index: {}]   ;;  %s4743_s3 = inlined_call_operand.vmem [shape: f32[1,32], index: 3, kind: input, shape index: {}]   ;;  %s4744_s4 = inlined_call_operand.vmem [shape: bf16[32,32], index: 4, kind: input, shape index: {}]   ;;  %s4745_s5 = inlined_call_operand.vmem [shape: bf16[32,32], index: 5, kind: input, shape index: {}]   ;;  %s4746_s6 = inlined_call_operand.vmem [shape: bf16[32,32], index: 6, kind: input, shape index: {}]   ;;  %s4747_s7 = inlined_call_operand.hbm [shape: bf16[32,32], index: 7, kind: input, shape index: {}]   ;;  %s4748_s8 = inlined_call_operand.vmem [shape: f32[1,32], index: 8, kind: input, shape index: {}]   ;;  %s4749_s9 = inlined_call_operand.vmem [shape: f32[1,32], index: 9, kind: input, shape index: {}]   ;;  %s4750_s10 = inlined_call_operand.hbm [shape: bf16[32,64], index: 10, kind: input, shape index: {}]   ;;  %s4751_s11 = inlined_call_operand.vmem [shape: bf16[64,32], index: 11, kind: input, shape index: {}]   ;;  %s4752_s12 = inlined_call_operand.hbm [shape: bf16[16,16,32], index: 12, kind: output, shape index: {}]  }
   0x1   :  { %4765 = sst [smem:[#allocation25_spill]] %s4741_s1 }
   0x2   :  { %4766 = sst [smem:[#allocation26_spill]] %s4747_s7 }
   0x3   :  { %4767 = sst [smem:[#allocation27_spill]] %s4750_s10 }
   0x4   :  { %17 = vsyncpa [#allocation3], 0 }
   0x5   :  { %19 = vsyncpa [#allocation3 + $0x1], 0 }
   0x6   :  { %20 = vsyncpa [#allocation6], 0 }
   0x7   :  { %21 = vsyncpa [#allocation9], 0 }
   0x8   :  { %22 = vsyncpa [#allocation4], 0 }
   0x9   :  { %24 = vsyncpa [#allocation4 + $0x1], 0  ;;  %s3565_s21 = smov 0   ;;  %s3567_s22 = smov 0  }
   0xa   :  { %s3569_s23 = smov 0   ;;  %s3571_s24 = smov 0  }
   0xb LB: > { %4768 = sst [smem:[#allocation15_spill]] %s3480_s23  ;;  %s3586_s25 = sadd.s32 4294967295, %s3484_s24   ;;  %s3484_s24 = sphi %s3571_s24, %s4803_s24   ;;  %s3480_s23 = sphi %s3569_s23, %s4800_s23   ;;  %s3476_s22 = sphi %s3567_s22, %s4802_s22   ;;  %s3472_s21 = sphi %s3565_s21, %s4801_s21  }
   0xc   : > { %s2794_s26 = sadd.s32 4294967294, %s3484_s24   ;;  %p50_p0 = scmp.ne.s32.totalorder %s3476_s22, %s3472_s21 }
   0xd   : > { %p51_p1 = scmp.eq.s32.totalorder %s3586_s25, 0  ;;  %p305_p2 = scmp.eq.s32.totalorder %s3586_s25, 3 }
   0xe   : > { %p311_p3 = scmp.eq.s32.totalorder %s2794_s26, 3  ;;  %p2795_p5 = scmp.ge.s32.totalorder %s3484_s24, 1 }
   0xf   : > { %p3595_p4 = por %p51_p1, %p50_p0  ;;  %p318_p7 = scmp.lt.s32.totalorder %s3484_s24, 5 }
  0x10   : > { %p3600_p6 = por %p311_p3, %p50_p0  ;;  %s4772_s1 = sld [smem:[#allocation25_spill]] }
  0x11   : > { %p3608_p8 = pnand %p2795_p5, %p318_p7  ;;  %s3486_s15 = smov [#allocation5]  }
  0x12   : > { %s4770_s28 = scalar_select %p3600_p6, 1, 0 }
  0x13   : > { %p2992_p9 = pneg %p3608_p8  ;;  %s331_s16 = sshll.u32 %s3486_s15, 4  ;;  %s332_s16 = int_to_ptr.vmem [resolvable:$true] %s331_s16 }
  0x14   : > { %4771 = sst [smem:[#allocation16_spill]] %s4770_s28  ;;  %s4754_s26 = smov 64  }
  0x15   : > { %p3616_p10 = pnand %p2992_p9, %p51_p1  ;;  %s4775_s7 = sld [smem:[#allocation26_spill]] }
  0x16   : > { %s329_s13 = sshll.u32 %s4772_s1, 4  ;;  %s4755_s29 = smov 4   ;;  %s330_s13 = int_to_ptr.hbm [resolvable:$true] %s329_s13 }
  0x17   : > { %2995 = dma.hbm_to_vmem [thread:$0]  (!%p3616_p10), %s330_s13, 128, %s332_s16, [#allocation6], %s4754_s26, %s4754_s26, %s4755_s29  }
  0x18   : > { %s3489_s30 = smov [#allocation7]   ;;  %s4776_s10 = sld [smem:[#allocation27_spill]] }
  0x19   : > { %s360_s15 = sshll.u32 %s3489_s30, 4  ;;  %s3490_s13 = smov [#allocation8]   ;;  %s361_s15 = int_to_ptr.vmem [resolvable:$true] %s360_s15 }
  0x1a   : > { %s380_s16 = sshll.u32 %s3490_s13, 4  ;;  %s37_s18 = sadd.s32 1, %s3480_s23  ;;  %s381_s16 = int_to_ptr.vmem [resolvable:$true] %s380_s16 }
  0x1b   : > { %s358_s20 = sshll.u32 %s4775_s7, 4  ;;  %s3637_s7 = sadd.s32 1, %s3484_s24   ;;  %s359_s20 = int_to_ptr.hbm [resolvable:$true] %s358_s20 }
  0x1c   : > { %2998 = dma.hbm_to_vmem [thread:$0]  (!%p3616_p10), %s359_s20, 256, %s361_s15, [#allocation6], %s4754_s26, %s4754_s26, %s4755_s29  }
  0x1d   : > { %s34_s30 = ssub.s32 %s3484_s24, %s3637_s7  ;;  %p44_p12 = scmp.ne.s32.totalorder %s3480_s23, %s3476_s22 }
  0x1e   : > { %s378_s1 = sshll.u32 %s4776_s10, 4  ;;  %p35_p11 = scmp.eq.s32.totalorder %s34_s30, 0  ;;  %s379_s1 = int_to_ptr.hbm [resolvable:$true] %s378_s1 }
  0x1f   : > { %3001 = dma.hbm_to_vmem [thread:$0]  (!%p3616_p10), %s379_s1, 256, %s381_s16, [#allocation9], %s4754_s26, %s4754_s26, %s4755_s29  }
  0x20   : > { %p45_p13 = scmp.eq.s32.totalorder %s3484_s24, 0  ;;  %p3655_p0 = por %p305_p2, %p44_p12 }
  0x21   : > { %s3651_s19 = scalar_select %p35_p11, %s3480_s23, %s37_s18  }
  0x22   : > { %p3013_p3 = scmp.lt.s32.totalorder %s3484_s24, 4  ;;  %s397_s15 = sand.u32 1, %s3480_s23  }
  0x23   : > { %4777 = sst [smem:[#allocation17_spill]] %s3651_s19  ;;  %s2945_s17 = sshll.u32 %s3484_s24, 5 }
  0x24   : > { %p46_p5 = por %p45_p13, %p44_p12  ;;  %s2800_s13 = sshll.u32 %s397_s15, 5 }
  0x25   : > { %s407_s1 = scalar_lea.hbm %s4740_s0, %s2945_s17  ;;  %s401_s30 = scalar_lea.vmem [#allocation2], %s2800_s13 }
  0x26   : > { %s408_s16 = sshll.u32 %s407_s1, 4  ;;  %s410_s26 = sshll.u32 %s401_s30, 4  ;;  %s409_s16 = int_to_ptr.hbm [resolvable:$true] %s408_s16  ;;  %s411_s26 = int_to_ptr.vmem [resolvable:$true] %s410_s26 }
  0x27   : > { %p3665_p7 = pnand %p3013_p3, %p46_p5  ;;  %s398_s29 = scalar_lea.sflag [#allocation3], %s397_s15 }
  0x28   : > { %s3380_s19 = sshra.s32 %s409_s16, 4  ;;  %s3387_s17 = scalar_lea.hbm %s4740_s0, 128  ;;  %s3381_s19 = int_to_ptr.hbm [resolvable:$true] %s3380_s19 }
  0x29   : > { %s3382_s23 = scalar_lea.hbm %s3381_s19, 32  ;;  %p3384_p9 = pneg %p3665_p7 }
  0x2a   : > { %p3383_p2 = scmp.ne.s32.totalorder %s3381_s19, %s3382_s23  ;;  %p3388_p12 = scmp.lt.s32.totalorder %s3381_s19, %s4740_s0 }
  0x2b   : > { %p3389_p13 = scmp.lt.s32.totalorder %s3387_s17, %s3382_s23 }
  0x2c   : > { %p3385_p10 = pnand %p3384_p9, %p3383_p2 }
  0x2d   : > { %p3390_p3 = por %p3389_p13, %p3388_p12 }
  0x2e   : > { %p3386_p11 = pneg %p3385_p10 }
  0x30   : > { %p3391_p5 = pnand %p3390_p3, %p3386_p11 }
  0x32   : > { %3394 = shalt.err (!%p3391_p5)
}
  0x33   : > { %s4780_s15 = smov 4   ;;  %s4781_s30 = smov 64  }
  0x34   : > { %3005 = dma.hbm_to_vmem [thread:$0]  (!%p3665_p7), %s409_s16, 512, %s411_s26, %s398_s29, %s4781_s30, %s4781_s30, %s4780_s15  }
  0x35   : > { %422 = sbr.rel (%p3608_p8) target bundleno = 2899 (0xb53), region = 68 }
  0x3a   : > { %s3685_s10 = sand.u32 1, %s3476_s22  }
  0x3b   : > { %s2805_s23 = sshll.u32 %s3685_s10, 5  ;;  %s425_s19 = scalar_lea.sflag [#allocation3], %s3685_s10 }
  0x3c   : > { %s3691_s28 = scalar_lea.vmem [#allocation2], %s2805_s23 }
  0x3d   : > { %3455 = dma.done.wait (%p3595_p4), %s425_s19, 512  }
  0x3e   : > { %3457 = vsyncadd (%p3595_p4), %s425_s19, 4294966784 }
  0x3f   : > { %3459 = dma.done.wait (%p51_p1), [#allocation6], 384  }
  0x40   : > { %3461 = vsyncadd (%p51_p1), [#allocation6], 4294966912 }
  0x41   : > { %3463 = dma.done.wait (%p51_p1), [#allocation9], 256  }
  0x42   : > { %3465 = vsyncadd (%p51_p1), [#allocation9], 4294967040  ;;  %v492_v0 = vld [vmem:[%s3691_s28 + $0x8] sm:$0xff]   ;;  %vm508_vm0 = vcmask 261120   ;;  %v490_v1 = vld [vmem:[%s3691_s28] sm:$0xff]   ;;  %v3491_v19 = vmov 32.0  }
  0x43   : > { %v3707_v2 = vunpack.c.l.bf16 %v492_v0  ;;  %v3709_v3 = vunpack.c.l.bf16 %v490_v1  ;;  %v3715_v6 = vunpack.c.h.bf16 %v492_v0  ;;  %v3717_v7 = vunpack.c.h.bf16 %v490_v1  ;;  %v495_v10 = vld [vmem:[%s3691_s28 + $0x14] sm:$0xff]   ;;  %v494_v11 = vld [vmem:[%s3691_s28 + $0x10] sm:$0xf]  ;;  %v497_v16 = vld [vmem:[%s3691_s28 + $0x1c] sm:$0xf]  ;;  %s3492_s16 = smov 120  }
  0x44   : > { %v3725_v12 = vunpack.c.l.bf16 %v495_v10  ;;  %v3727_v13 = vunpack.c.l.bf16 %v494_v11  ;;  %v3734_v17 = vunpack.c.l.bf16 %v497_v16  ;;  %3128 = vrcp.f32 %v3491_v19  ;;  %v2951_v63 = vld [vmem:[%s4744_s4 + $0x8] sm:$0xff]  ;;  %s3494_s18 = smov 104   ;;  %s3495_s17 = smov 16  }
  0x45   : > { %4782 = vst [vmem:[#allocation18_spill] sm:$0xff] %v3707_v2  ;;  %v515_v4 = vsel %vm508_vm0, %v3707_v2, 0.0  ;;  %v509_v5 = vsel %vm508_vm0, %v3709_v3, 0.0  ;;  %v518_v8 = vsel %vm508_vm0, %v3715_v6, 0.0  ;;  %v512_v9 = vsel %vm508_vm0, %v3717_v7, 0.0  ;;  %752 = vmatpush.bf16.msra.mxu0 %v2951_v63  ;;  %2970 = vmatpush.bf16.msra.mxu3 %v2951_v63  ;;  %s3496_s13 = smov 8  }
  0x46   : > { %516 = vadd.xlane.f32.xlu1 %v515_v4  ;;  %510 = vadd.xlane.f32.xlu0 %v509_v5  ;;  %4783 = vst [vmem:[#allocation19_spill] sm:$0xff] %v3715_v6  ;;  %v524_v14 = vsel %vm508_vm0, %v3725_v12, 0.0  ;;  %v521_v15 = vsel %vm508_vm0, %v3727_v13, 0.0  ;;  %v530_v18 = vsel %vm508_vm0, %v3734_v17, 0.0  ;;  %v3764_v47 = vunpack.c.h.bf16 %v495_v10  ;;  %s3497_s1 = smov 24   ;;  %s2676_s26 = scalar_lea.sflag [#allocation4], %s3685_s10 }
  0x47   : > { %4784 = vst [vmem:[#allocation20_spill] sm:$0xff] %v3725_v12 }
  0x48   : > { %4785 = vst [vmem:[#allocation21_spill] sm:$0xff] %v3727_v13  ;;  %v527_v52 = vsel %vm508_vm0, %v3764_v47, 0.0 }
  0x49   : > { %4786 = vst [vmem:[#allocation22_spill] sm:$0xff] %v3734_v17 }
  0x4a   : > { %v3129_v20 = vpop.eup %3128  ;;  %4788 = vst [vmem:[#allocation24_spill] sm:$0xff] %v3764_v47 }
  0x4b   : > { %v534_v21 = vmul.f32 32.0, %v3129_v20  ;;  %vm538_vm1 = vweird.f32 %v3129_v20 }
  0x4d   : > { %v535_v22 = vsub.f32 1.0, %v534_v21 }
  0x4e   : > { %519 = vadd.xlane.f32.xlu1 %v518_v8  ;;  %513 = vadd.xlane.f32.xlu0 %v512_v9  ;;  %v2950_v9 = vld [vmem:[%s4744_s4] sm:$0xff] }
  0x4f   : > { %v536_v23 = vmul.f32 %v3129_v20, %v535_v22  ;;  %753 = vmatpush.bf16.msra.mxu0 %v2950_v9  ;;  %2971 = vmatpush.bf16.msra.mxu3 %v2950_v9  ;;  %v2953_v22 = vld [vmem:[%s4745_s5 + $0x8] sm:$0xff] }
  0x50   : > { %2972 = vmatpush.bf16.msra.mxu1 %v2953_v22 }
  0x51   : > { %v537_v24 = vadd.f32 %v3129_v20, %v536_v23 }
  0x53   : > { %v3738_v25 = vsel %vm538_vm1, %v3129_v20, %v537_v24  ;;  %797 = vmatpush.bf16.msrb.mxu0 %v2953_v22 }
  0x54   : > { %4787 = vst [vmem:[#allocation23_spill] sm:$0xff] %v3738_v25 }
  0x56   : > { %525 = vadd.xlane.f32.xlu1 %v524_v14  ;;  %522 = vadd.xlane.f32.xlu0 %v521_v15 }
  0x5e   : > { %531 = vadd.xlane.f32.xlu0 %v530_v18 }
  0xb9   : > { %v517_v26 = vpop.xlane.xlu1 %516  ;;  %v511_v27 = vpop.xlane.xlu0 %510 }
  0xba   : > { %v542_v28 = vmul.f32 %v3738_v25, %v517_v26  ;;  %v540_v29 = vmul.f32 %v3738_v25, %v511_v27 }
  0xbc   : > { %v3743_v30 = vsub.f32 %v3707_v2, %v542_v28  ;;  %v3746_v31 = vsub.f32 %v3709_v3, %v540_v29 }
  0xbe   : > { %v558_v32 = vmul.f32 %v3743_v30, %v3743_v30  ;;  %v556_v33 = vmul.f32 %v3746_v31, %v3746_v31 }
  0xc0   : > { %v570_v34 = vsel %vm508_vm0, %v558_v32, 0.0  ;;  %v564_v35 = vsel %vm508_vm0, %v556_v33, 0.0  ;;  %v2952_v32 = vld [vmem:[%s4745_s5] sm:$0xff] }
  0xc1   : > { %571 = vadd.xlane.f32.xlu1 %v570_v34  ;;  %v520_v36 = vpop.xlane.xlu1 %519  ;;  %565 = vadd.xlane.f32.xlu2 %v564_v35  ;;  %v514_v37 = vpop.xlane.xlu0 %513 }
  0xc2   : > { %v541_v38 = vmul.f32 %v3738_v25, %v514_v37  ;;  %v543_v44 = vmul.f32 %v3738_v25, %v520_v36  ;;  %798 = vmatpush.bf16.msrb.mxu0 %v2952_v32  ;;  %2973 = vmatpush.bf16.msra.mxu1 %v2952_v32  ;;  %v2954_v32 = vld [vmem:[%s4746_s6] sm:$0xff] }
  0xc4   : > { %v3756_v39 = vsub.f32 %v3717_v7, %v541_v38  ;;  %v3773_v50 = vsub.f32 %v3715_v6, %v543_v44 }
  0xc6   : > { %v557_v40 = vmul.f32 %v3756_v39, %v3756_v39  ;;  %v559_v58 = vmul.f32 %v3773_v50, %v3773_v50 }
  0xc8   : > { %v567_v41 = vsel %vm508_vm0, %v557_v40, 0.0  ;;  %v573_v60 = vsel %vm508_vm0, %v559_v58, 0.0 }
  0xc9   : > { %v526_v42 = vpop.xlane.xlu1 %525  ;;  %568 = vadd.xlane.f32.xlu2 %v567_v41  ;;  %v523_v43 = vpop.xlane.xlu0 %522 }
  0xca   : > { %v545_v45 = vmul.f32 %v3738_v25, %v526_v42  ;;  %v544_v46 = vmul.f32 %v3738_v25, %v523_v43 }
  0xcc   : > { %v3767_v48 = vsub.f32 %v3725_v12, %v545_v45  ;;  %v3770_v49 = vsub.f32 %v3727_v13, %v544_v46 }
  0xce   : > { %v561_v51 = vmul.f32 %v3767_v48, %v3767_v48  ;;  %v560_v53 = vmul.f32 %v3770_v49, %v3770_v49 }
  0xd0   : > { %v579_v54 = vsel %vm508_vm0, %v561_v51, 0.0  ;;  %v576_v55 = vsel %vm508_vm0, %v560_v53, 0.0 }
  0xd1   : > { %580 = vadd.xlane.f32.xlu1 %v579_v54  ;;  %528 = vadd.xlane.f32.xlu2 %v527_v52  ;;  %v532_v56 = vpop.xlane.xlu0 %531 }
  0xd2   : > { %577 = vadd.xlane.f32.xlu0 %v576_v55  ;;  %v547_v57 = vmul.f32 %v3738_v25, %v532_v56 }
  0xd4   : > { %v3787_v59 = vsub.f32 %v3734_v17, %v547_v57  ;;  %v3836_v57 = vld [vmem:[%s4742_s2] ss:$0 sm:$0xff] }
  0xd6   : > { %v563_v61 = vmul.f32 %v3787_v59, %v3787_v59 }
  0xd8   : > { %v585_v62 = vsel %vm508_vm0, %v563_v61, 0.0 }
  0xd9   : > { %574 = vadd.xlane.f32.xlu2 %v573_v60 }
  0xda   : > { %586 = vadd.xlane.f32.xlu0 %v585_v62 }
 0x134   : > { %v572_v0 = vpop.xlane.xlu1 %571  ;;  %v566_v1 = vpop.xlane.xlu2 %565 }
 0x135   : > { %v588_v4 = vmul.f32 %v566_v1, %v3738_v25  ;;  %v590_v5 = vmul.f32 %v572_v0, %v3738_v25 }
 0x137   : > { %v596_v8 = vadd.f32 1e-05, %v588_v4  ;;  %v3801_v10 = vadd.f32 1e-05, %v590_v5 }
 0x139   : > { %3130 = vrsqrt.f32 %v596_v8  ;;  %vm610_vm3 = vweird.f32 %v596_v8  ;;  %vm630_vm8 = vweird.f32 %v3801_v10 }
 0x13a   : > { %3132 = vrsqrt.f32 %v3801_v10 }
 0x13c   : > { %v569_v11 = vpop.xlane.xlu2 %568 }
 0x13d   : > { %v589_v14 = vmul.f32 %v569_v11, %v3738_v25 }
 0x13f   : > { %v597_v15 = vadd.f32 1e-05, %v589_v14  ;;  %v3131_v16 = vpop.eup %3130 }
 0x140   : > { %v605_v18 = vmul.f32 %v3131_v16, %v596_v8  ;;  %v3808_v23 = vpop.eup %3132  ;;  %vm611_vm2 = vweird.f32 %v3131_v16 }
 0x141   : > { %3134 = vrsqrt.f32 %v597_v15  ;;  %v625_v36 = vmul.f32 %v3808_v23, %v3801_v10  ;;  %vm612_vm4 = vmor %vm610_vm3, %vm611_vm2  ;;  %vm620_vm6 = vweird.f32 %v597_v15  ;;  %vm631_vm9 = vweird.f32 %v3808_v23 }
 0x142   : > { %v606_v19 = vmul.f32 %v3131_v16, %v605_v18  ;;  %vm3853_vm10 = vmor %vm630_vm8, %vm631_vm9 }
 0x143   : > { %v626_v45 = vmul.f32 %v3808_v23, %v625_v36 }
 0x144   : > { %v581_v20 = vpop.xlane.xlu1 %580  ;;  %v529_v21 = vpop.xlane.xlu2 %528  ;;  %v607_v24 = vmul.f32 0.5, %v606_v19 }
 0x145   : > { %v593_v26 = vmul.f32 %v581_v20, %v3738_v25  ;;  %v546_v27 = vmul.f32 %v3738_v25, %v529_v21  ;;  %v578_v28 = vpop.xlane.xlu0 %577  ;;  %v627_v58 = vmul.f32 0.5, %v626_v45 }
 0x146   : > { %v592_v29 = vmul.f32 %v578_v28, %v3738_v25  ;;  %v608_v34 = vsub.f32 1.5, %v607_v24 }
 0x147   : > { %v3135_v33 = vpop.eup %3134  ;;  %v3817_v35 = vsub.f32 %v3764_v47, %v546_v27  ;;  %v3821_v38 = vadd.f32 1e-05, %v593_v26  ;;  %v628_v4 = vsub.f32 1.5, %v627_v58  ;;  %v2955_v26 = vld [vmem:[%s4746_s6 + $0x8] sm:$0xff] }
 0x148   : > { %v615_v37 = vmul.f32 %v3135_v33, %v597_v15  ;;  %v609_v40 = vmul.f32 %v3131_v16, %v608_v34  ;;  %v3823_v41 = vadd.f32 1e-05, %v592_v29  ;;  %vm621_vm5 = vweird.f32 %v3135_v33  ;;  %2974 = vmatpush.bf16.msra.mxu2 %v2955_v26 }
 0x149   : > { %v562_v42 = vmul.f32 %v3817_v35, %v3817_v35  ;;  %3136 = vrsqrt.f32 %v3821_v38  ;;  %vm622_vm7 = vmor %vm620_vm6, %vm621_vm5  ;;  %v629_v15 = vmul.f32 %v3808_v23, %v628_v4  ;;  %vm660_vm14 = vweird.f32 %v3821_v38 }
 0x14a   : > { %v616_v43 = vmul.f32 %v3135_v33, %v615_v37  ;;  %v613_v46 = vsel %vm612_vm4, %v3131_v16, %v609_v40  ;;  %3138 = vrsqrt.f32 %v3823_v41  ;;  %vm650_vm1 = vweird.f32 %v3823_v41 }
 0x14b   : > { %v582_v44 = vsel %vm508_vm0, %v562_v42, 0.0  ;;  %v684_v56 = vmul.f32 %v613_v46, %v3746_v31  ;;  %v3843_v31 = vld [vmem:[%s4743_s3] ss:$0 sm:$0xff]  ;;  %v633_v22 = vsel %vm3853_vm10, %v3808_v23, %v629_v15 }
 0x14c   : > { %v617_v51 = vmul.f32 0.5, %v616_v43  ;;  %583 = vadd.xlane.f32.xlu2 %v582_v44  ;;  %v575_v52 = vpop.xlane.xlu2 %574  ;;  %2975 = vmatpush.bf16.msra.mxu2 %v2954_v32 }
 0x14d   : > { %v591_v53 = vmul.f32 %v575_v52, %v3738_v25  ;;  %v695_v1 = vmul.f32 %v3836_v57, %v684_v56 }
 0x14e   : > { %v618_v54 = vsub.f32 1.5, %v617_v51 }
 0x14f   : > { %v599_v55 = vadd.f32 1e-05, %v591_v53  ;;  %v3137_v61 = vpop.eup %3136 }
 0x150   : > { %v619_v60 = vmul.f32 %v3135_v33, %v618_v54  ;;  %v3139_v63 = vpop.eup %3138  ;;  %v655_v8 = vmul.f32 %v3137_v61, %v3821_v38  ;;  %vm661_vm15 = vweird.f32 %v3137_v61 }
 0x151   : > { %3140 = vrsqrt.f32 %v599_v55  ;;  %v645_v9 = vmul.f32 %v3139_v63, %v3823_v41  ;;  %vm640_vm11 = vweird.f32 %v599_v55  ;;  %vm651_vm2 = vweird.f32 %v3139_v63  ;;  %vm662_vm3 = vmor %vm660_vm14, %vm661_vm15 }
 0x152   : > { %v623_v62 = vsel %vm622_vm7, %v3135_v33, %v619_v60  ;;  %v656_v10 = vmul.f32 %v3137_v61, %v655_v8  ;;  %v686_v33 = vmul.f32 %v633_v22, %v3743_v30  ;;  %vm652_vm4 = vmor %vm650_vm1, %vm651_vm2  ;;  %v2947_v60 = vld [vmem:[%s3691_s28 + $0x8] sm:$0xff] }
 0x153   : > { %v685_v0 = vmul.f32 %v623_v62, %v3756_v39  ;;  %v706_v39 = vadd.f32 %v3843_v31, %v695_v1  ;;  %v646_v20 = vmul.f32 %v3139_v63, %v645_v9  ;;  %2859 = vmatmul.msk.bf16.vlgmr.msra.gmra.mxu2 %vm508_vm0, %v2947_v60  ;;  %v2948_v62 = vld [vmem:[%s3691_s28 + $0x10] sm:$0xff] }
 0x154   : > { %v657_v27 = vmul.f32 0.5, %v656_v10  ;;  %v697_v42 = vmul.f32 %v3836_v57, %v686_v33 }
 0x155   : > { %v696_v5 = vmul.f32 %v3836_v57, %v685_v0  ;;  %v647_v28 = vmul.f32 0.5, %v646_v20 }
 0x156   : > { %v658_v34 = vsub.f32 1.5, %v657_v27  ;;  %v708_v45 = vadd.f32 %v3843_v31, %v697_v42 }
 0x157   : > { %v3141_v11 = vpop.eup %3140  ;;  %v707_v14 = vadd.f32 %v3843_v31, %v696_v5  ;;  %v648_v36 = vsub.f32 1.5, %v647_v28 }
 0x158   : > { %v635_v16 = vmul.f32 %v3141_v11, %v599_v55  ;;  %vm641_vm12 = vweird.f32 %v3141_v11  ;;  %v659_v30 = vmul.f32 %v3137_v61, %v658_v34 }
 0x159   : > { %v714_v19 = vpack.c.bf16 %v707_v14, %v706_v39  ;;  %vm642_vm13 = vmor %vm640_vm11, %vm641_vm12  ;;  %v649_v44 = vmul.f32 %v3139_v63, %v648_v36  ;;  %vm933_vm11 = vcmask 64512   ;;  %vm1044_vm12 = vcmask 130048  }
 0x15a   : > { %v636_v21 = vmul.f32 %v3141_v11, %v635_v16  ;;  %v663_v51 = vsel %vm662_vm3, %v3137_v61, %v659_v30 }
 0x15b   : > { %2818 = vmatmul.msk.bf16.vlgmr.msra.gmra.mxu0 %vm508_vm0, %v714_v19  ;;  %v653_v52 = vsel %vm652_vm4, %v3139_v63, %v649_v44 }
 0x15c   : > { %v637_v24 = vmul.f32 0.5, %v636_v21  ;;  %874 = vmatpush.bf16.msra.mxu0 %v2955_v26  ;;  %v688_v41 = vmul.f32 %v653_v52, %v3770_v49 }
 0x15e   : > { %v638_v29 = vsub.f32 1.5, %v637_v24  ;;  %v699_v53 = vmul.f32 %v3836_v57, %v688_v41 }
 0x160   : > { %v639_v23 = vmul.f32 %v3141_v11, %v638_v29  ;;  %875 = vmatpush.bf16.msra.mxu0 %v2954_v32  ;;  %v710_v55 = vadd.f32 %v3843_v31, %v699_v53 }
 0x162   : > { %v643_v37 = vsel %vm642_vm13, %v3141_v11, %v639_v23  ;;  %v2946_v11 = vld [vmem:[%s3691_s28] sm:$0xff]  ;;  %vm2241_vm13 = vcmask 195584  }
 0x163   : > { %v687_v40 = vmul.f32 %v643_v37, %v3773_v50  ;;  %v689_v50 = vmul.f32 %v663_v51, %v3767_v48  ;;  %v587_v48 = vpop.xlane.xlu0 %586  ;;  %2860 = vmatmul.msk.bf16.gmra.mxu2 %vm508_vm0, %v2948_v62 }
 0x164   : > { %v595_v49 = vmul.f32 %v587_v48, %v3738_v25 }
 0x165   : > { %v698_v43 = vmul.f32 %v3836_v57, %v687_v40  ;;  %v700_v54 = vmul.f32 %v3836_v57, %v689_v50 }
 0x166   : > { %v603_v61 = vadd.f32 1e-05, %v595_v49 }
 0x167   : > { %v709_v46 = vadd.f32 %v3843_v31, %v698_v43  ;;  %v711_v56 = vadd.f32 %v3843_v31, %v700_v54 }
 0x168   : > { %3142 = vrsqrt.f32 %v603_v61  ;;  %vm680_vm5 = vweird.f32 %v603_v61 }
 0x169   : > { %v715_v38 = vpack.c.bf16 %v709_v46, %v708_v45  ;;  %v716_v58 = vpack.c.bf16 %v711_v56, %v710_v55 }
 0x16b   : > { %2819 = vmatmul.msk.bf16.vlgmr.msra.gmra.mxu3 %vm508_vm0, %v715_v38  ;;  %2830 = vmatmul.msk.bf16.vlgmr.msrb.gmra.mxu0 %vm508_vm0, %v714_v19 }
 0x16c   : > { %2831 = vmatmul.msk.bf16.vlgmr.msra.gmra.mxu1 %vm508_vm0, %v715_v38 }
 0x16e   : > { %v3143_v63 = vpop.eup %3142 }
 0x16f   : > { %v675_v0 = vmul.f32 %v3143_v63, %v603_v61  ;;  %vm681_vm6 = vweird.f32 %v3143_v63 }
 0x170   : > { %vm682_vm7 = vmor %vm680_vm5, %vm681_vm6 }
 0x171   : > { %v676_v1 = vmul.f32 %v3143_v63, %v675_v0 }
 0x173   : > { %v677_v9 = vmul.f32 0.5, %v676_v1 }
 0x175   : > { %v678_v39 = vsub.f32 1.5, %v677_v9 }
 0x177   : > { %v679_v15 = vmul.f32 %v3143_v63, %v678_v39 }
 0x179   : > { %v683_v19 = vsel %vm682_vm7, %v3143_v63, %v679_v15 }
 0x17a   : > { %v691_v21 = vmul.f32 %v683_v19, %v3787_v59 }
 0x17b   : > { %2820 = vmatmul.msk.bf16.gmra.mxu3 %vm508_vm0, %v716_v58  ;;  %2858 = vmatmul.msk.bf16.vlgmr.msra.gmra.mxu0 %vm508_vm0, %v2946_v11 }
 0x17c   : > { %2832 = vmatmul.msk.bf16.gmra.mxu1 %vm508_vm0, %v716_v58  ;;  %v702_v27 = vmul.f32 %v3836_v57, %v691_v21 }
 0x17e   : > { %v713_v33 = vadd.f32 %v3843_v31, %v702_v27 }
 0x1bf   : > { %v584_v4 = vpop.xlane.xlu2 %583 }
 0x1c0   : > { %v594_v5 = vmul.f32 %v584_v4, %v3738_v25 }
 0x1c2   : > { %v602_v8 = vadd.f32 1e-05, %v594_v5 }
 0x1c4   : > { %3144 = vrsqrt.f32 %v602_v8  ;;  %vm670_vm9 = vweird.f32 %v602_v8 }
 0x1ca   : > { %v3145_v14 = vpop.eup %3144 }
 0x1cb   : > { %v665_v16 = vmul.f32 %v3145_v14, %v602_v8  ;;  %vm671_vm8 = vweird.f32 %v3145_v14 }
 0x1cc   : > { %vm672_vm10 = vmor %vm670_vm9, %vm671_vm8 }
 0x1cd   : > { %v666_v18 = vmul.f32 %v3145_v14, %v665_v16 }
 0x1cf   : > { %v667_v10 = vmul.f32 0.5, %v666_v18 }
 0x1d1   : > { %v668_v20 = vsub.f32 1.5, %v667_v10 }
 0x1d3   : > { %v669_v22 = vmul.f32 %v3145_v14, %v668_v20 }
 0x1d5   : > { %v673_v24 = vsel %vm672_vm10, %v3145_v14, %v669_v22 }
 0x1d6   : > { %v690_v26 = vmul.f32 %v673_v24, %v3817_v35  ;;  %v882_v20 = vpop.f32.mrf.mxu2 }
 0x1d7   : > { %v915_v21 = vpack.c.bf16 %v882_v20, %v882_v20 }
 0x1d8   : > { %v755_v28 = vpop.f32.mrf.mxu0  ;;  %v701_v29 = vmul.f32 %v3836_v57, %v690_v26 }
 0x1d9   : > { %v897_v59 = vpack.c.bf16 %v755_v28, %v755_v28  ;;  %v1160_v24 = vunpack.c.l.b16 %v915_v21 }
 0x1da   : > { %v712_v32 = vadd.f32 %v3843_v31, %v701_v29 }
 0x1db   : > { %v925_v37 = vunpack.c.l.b16 %v897_v59 }
 0x1dc   : > { %v717_v23 = vpack.c.bf16 %v713_v33, %v712_v32 }
 0x1de   : > { %2821 = vmatmul.msk.bf16.gmra.mxu3 %vm508_vm0, %v717_v23  ;;  %2833 = vmatmul.msk.bf16.gmra.mxu1 %vm508_vm0, %v717_v23  ;;  %v884_v22 = vpop.f32.mrf.mxu2 }
 0x1df   : > { %v916_v26 = vpack.c.bf16 %v884_v22, %v884_v22 }
 0x1e0   : > { %v757_v34 = vpop.f32.mrf.mxu0 }
 0x1e1   : > { %v898_v36 = vpack.c.bf16 %v757_v34, %v757_v34  ;;  %v1161_v27 = vunpack.c.l.b16 %v916_v26 }
 0x1e3   : > { %v926_v40 = vunpack.c.l.b16 %v898_v36  ;;  %v3934_v28 = vpack.c.b16 %v1161_v27, %v1160_v24 }
 0x1e5   : > { %v3902_v35 = vpack.c.b16 %v926_v40, %v925_v37  ;;  %1174 = vmatpush.bf16.msrb.mxu1 %v3934_v28 }
 0x1e6   : > { %v887_v29 = vpop.f32.mrf.mxu2 }
 0x1e7   : > { %1253 = vrot.lane.b32.xlu1 %v3902_v35, %s3492_s16  ;;  %v917_v32 = vpack.c.bf16 %v887_v29, %v887_v29 }
 0x1e8   : > { %v800_v57 = vpop.f32.mrf.mxu0 }
 0x1e9   : > { %v805_v42 = vpop.f32.mrf.mxu1  ;;  %v905_v43 = vpack.c.bf16 %v800_v57, %v800_v57  ;;  %v1188_v23 = vunpack.c.l.b16 %v917_v32 }
 0x1ea   : > { %v907_v31 = vpack.c.bf16 %v805_v42, %v805_v42 }
 0x1eb   : > { %v930_v38 = vunpack.c.l.b16 %v905_v43 }
 0x1ec   : > { %v961_v52 = vunpack.c.l.b16 %v907_v31 }
 0x1ee   : > { %v760_v50 = vpop.f32.mrf.mxu3  ;;  %v889_v33 = vpop.f32.mrf.mxu2 }
 0x1ef   : > { %v899_v4 = vpack.c.bf16 %v760_v50, %v760_v50  ;;  %v918_v59 = vpack.c.bf16 %v889_v33, %v889_v33 }
 0x1f0   : > { %v802_v30 = vpop.f32.mrf.mxu0 }
 0x1f1   : > { %v906_v44 = vpack.c.bf16 %v802_v30, %v802_v30  ;;  %v807_v45 = vpop.f32.mrf.mxu1  ;;  %v956_v11 = vunpack.c.l.b16 %v899_v4  ;;  %v1189_v34 = vunpack.c.l.b16 %v918_v59 }
 0x1f2   : > { %v908_v46 = vpack.c.bf16 %v807_v45, %v807_v45 }
 0x1f3   : > { %v931_v51 = vunpack.c.l.b16 %v906_v44  ;;  %v3937_v36 = vpack.c.b16 %v1189_v34, %v1188_v23 }
 0x1f4   : > { %v962_v41 = vunpack.c.l.b16 %v908_v46 }
 0x1f5   : > { %v3906_v53 = vpack.c.b16 %v931_v51, %v930_v38  ;;  %1202 = vmatpush.bf16.msrb.mxu2 %v3937_v36 }
 0x1f6   : > { %v3908_v54 = vpack.c.b16 %v962_v41, %v961_v52  ;;  %v762_v60 = vpop.f32.mrf.mxu3 }
 0x1f7   : > { %v938_v55 = vsel %vm933_vm11, %v3906_v53, 0  ;;  %v900_v0 = vpack.c.bf16 %v762_v60, %v762_v60 }
 0x1f8   : > { %1279 = vrot.lane.b32.xlu0 %v3908_v54, %s3492_s16  ;;  %947 = vmatpush.bf16.xpose.msrb.mxu3 %v938_v55  ;;  %v968_v56 = vsel %vm933_vm11, %v3908_v54, 0  ;;  %v877_v37 = vpop.f32.mrf.mxu0 }
 0x1f9   : > { %v810_v58 = vpop.f32.mrf.mxu1  ;;  %v957_v9 = vunpack.c.l.b16 %v900_v0  ;;  %v913_v40 = vpack.c.bf16 %v877_v37, %v877_v37 }
 0x1fa   : > { %v909_v48 = vpack.c.bf16 %v810_v58, %v810_v58 }
 0x1fb   : > { %v3926_v39 = vpack.c.b16 %v957_v9, %v956_v11  ;;  %v1132_v42 = vunpack.c.l.b16 %v913_v40  ;;  %v2949_v9 = vld [vmem:[%s3691_s28 + $0x18] sm:$0xff]  ;;  %v2967_v11 = vld [vmem:[#allocation5] sm:$0xff]   ;;  %s3493_s28 = smov 112  }
 0x1fc   : > { %v991_v62 = vunpack.c.l.b16 %v909_v48  ;;  %2861 = vmatmul.msk.bf16.gmra.mxu2 %vm508_vm0, %v2949_v9 }
 0x1fe   : > { %v765_v5 = vpop.f32.mrf.mxu3 }
 0x1ff   : > { %2862 = vmatmul.msk.bf16.vlgmr.msrb.gmra.mxu3 %vm933_vm11, %v3902_v35  ;;  %v901_v16 = vpack.c.bf16 %v765_v5, %v765_v5 }
 0x200   : > { %977 = vmatpush.bf16.xpose.msra.mxu3 %v968_v56  ;;  %1255 = vrot.lane.b32.xlu0 %v3906_v53, %s3492_s16  ;;  %v879_v57 = vpop.f32.mrf.mxu0 }
 0x201   : > { %v812_v49 = vpop.f32.mrf.mxu1  ;;  %v986_v19 = vunpack.c.l.b16 %v901_v16  ;;  %v914_v43 = vpack.c.bf16 %v879_v57, %v879_v57 }
 0x202   : > { %v910_v61 = vpack.c.bf16 %v812_v49, %v812_v49 }
 0x203   : > { %v1133_v31 = vunpack.c.l.b16 %v914_v43 }
 0x204   : > { %v992_v63 = vunpack.c.l.b16 %v910_v61 }
 0x205   : > { %v3940_v30 = vpack.c.b16 %v1133_v31, %v1132_v42 }
 0x206   : > { %v3920_v1 = vpack.c.b16 %v992_v63, %v991_v62  ;;  %v767_v14 = vpop.f32.mrf.mxu3 }
 0x207   : > { %v902_v15 = vpack.c.bf16 %v767_v14, %v767_v14  ;;  %1146 = vmatpush.bf16.msrb.mxu0 %v3940_v30  ;;  %v3956_v14 = vunpack.c.l.bf16 %v2967_v11 }
 0x208   : > { %1303 = vrot.lane.b32.xlu2 %v3920_v1, %s3492_s16  ;;  %v998_v8 = vsel %vm933_vm11, %v3920_v1, 0 }
 0x209   : > { %1007 = vmatpush.bf16.xpose.msrb.mxu3 %v998_v8  ;;  %v987_v18 = vunpack.c.l.b16 %v902_v15 }
 0x20b   : > { %v3930_v10 = vpack.c.b16 %v987_v18, %v986_v19  ;;  %v3960_v19 = vunpack.c.h.bf16 %v2967_v11 }
 0x20f   : > { %2863 = vmatmul.msk.bf16.vlgmr.msra.gmra.mxu3 %vm933_vm11, %v3926_v39 }
 0x21f   : > { %2864 = vmatmul.msk.bf16.vlgmr.msrb.gmra.mxu3 %vm933_vm11, %v3930_v10 }
 0x259   : > { %v1254_v42 = vpop.permute.xlu1 %1253 }
 0x25b   : > { %v815_v44 = vpop.f32.mrf.mxu1 }
 0x25c   : > { %v911_v46 = vpack.c.bf16 %v815_v44, %v815_v44 }
 0x25e   : > { %v1021_v41 = vunpack.c.l.b16 %v911_v46 }
 0x261   : > { %v770_v45 = vpop.f32.mrf.mxu3 }
 0x262   : > { %v1304_v38 = vpop.permute.xlu2 %1303  ;;  %v903_v60 = vpack.c.bf16 %v770_v45, %v770_v45 }
 0x263   : > { %v1309_v51 = vsel %vm933_vm11, %v1304_v38, 0  ;;  %v817_v52 = vpop.f32.mrf.mxu1 }
 0x264   : > { %v912_v50 = vpack.c.bf16 %v817_v52, %v817_v52  ;;  %1318 = vmatpush.bf16.xpose.msra.mxu2 %v1309_v51  ;;  %v1016_v0 = vunpack.c.l.b16 %v903_v60 }
 0x266   : > { %v1022_v55 = vunpack.c.l.b16 %v912_v50 }
 0x268   : > { %v3944_v56 = vpack.c.b16 %v1022_v55, %v1021_v41 }
 0x269   : > { %v772_v58 = vpop.f32.mrf.mxu3 }
 0x26a   : > { %v904_v48 = vpack.c.bf16 %v772_v58, %v772_v58  ;;  %v1280_v49 = vpop.permute.xlu0 %1279  ;;  %v1028_v61 = vsel %vm933_vm11, %v3944_v56, 0 }
 0x26b   : > { %v1285_v62 = vsel %vm933_vm11, %v1280_v49, 0  ;;  %1037 = vmatpush.bf16.xpose.msra.mxu3 %v1028_v61 }
 0x26c   : > { %v1017_v63 = vunpack.c.l.b16 %v904_v48  ;;  %1294 = vmatpush.bf16.xpose.msra.mxu1 %v1285_v62 }
 0x26e   : > { %v3949_v4 = vpack.c.b16 %v1017_v63, %v1016_v0 }
 0x272   : > { %v1256_v5 = vpop.permute.xlu0 %1255  ;;  %2865 = vmatmul.msk.bf16.vlgmr.msra.gmra.mxu3 %vm933_vm11, %v3949_v4 }
 0x273   : > { %v1261_v8 = vsel %vm933_vm11, %v1256_v5, 0 }
 0x274   : > { %1270 = vmatpush.bf16.xpose.msra.mxu0 %v1261_v8 }
 0x27f   : > { %v892_v58 = vpop.f32.mrf.mxu2 }
 0x280   : > { %v919_v48 = vpack.c.bf16 %v892_v58, %v892_v58 }
 0x282   : > { %v949_v15 = vpop.f32.mrf.mxu3  ;;  %v1216_v63 = vunpack.c.l.b16 %v919_v48 }
 0x283   : > { %v950_v16 = vadd.f32 %v3956_v14, %v949_v15 }
 0x285   : > { %v1045_v18 = vsel %vm1044_vm12, %v950_v16, -inf }
 0x286   : > { %1046 = vmax.xlane.f32.xlu1 %v1045_v18 }
 0x287   : > { %v894_v61 = vpop.f32.mrf.mxu2 }
 0x288   : > { %v920_v0 = vpack.c.bf16 %v894_v61, %v894_v61 }
 0x28a   : > { %v951_v20 = vpop.f32.mrf.mxu3  ;;  %v1217_v9 = vunpack.c.l.b16 %v920_v0 }
 0x28b   : > { %v952_v21 = vadd.f32 %v3960_v19, %v951_v20 }
 0x28d   : > { %v1048_v22 = vsel %vm1044_vm12, %v952_v21, -inf }
 0x28e   : > { %1049 = vmax.xlane.f32.xlu2 %v1048_v22 }
 0x292   : > { %v979_v24 = vpop.f32.mrf.mxu3 }
 0x293   : > { %v3980_v40 = vadd.f32 %v3956_v14, %v979_v24 }
 0x295   : > { %v1051_v57 = vsel %vm1044_vm12, %v3980_v40, -inf }
 0x29a   : > { %v981_v26 = vpop.f32.mrf.mxu3 }
 0x29b   : > { %v3965_v27 = vadd.f32 %v3960_v19, %v981_v26 }
 0x29d   : > { %v1054_v29 = vsel %vm1044_vm12, %v3965_v27, -inf }
 0x29e   : > { %1055 = vmax.xlane.f32.xlu0 %v1054_v29 }
 0x2a2   : > { %v1009_v32 = vpop.f32.mrf.mxu3 }
 0x2a3   : > { %v1010_v33 = vadd.f32 %v3956_v14, %v1009_v32 }
 0x2a5   : > { %v1057_v23 = vsel %vm1044_vm12, %v1010_v33, -inf }
 0x2a6   : > { %1301 = vrot.lane.b32.xlu2 %v3930_v10, %s3492_s16  ;;  %1058 = vmax.xlane.f32.xlu0 %v1057_v23 }
 0x2aa   : > { %v1011_v59 = vpop.f32.mrf.mxu3 }
 0x2ab   : > { %v1012_v34 = vadd.f32 %v3960_v19, %v1011_v59 }
 0x2ad   : > { %v1060_v37 = vsel %vm1044_vm12, %v1012_v34, -inf }
 0x2ae   : > { %1061 = vmax.xlane.f32.xlu1 %v1060_v37 }
 0x2ba   : > { %1327 = vrot.lane.b32.xlu0 %v3944_v56, %s3492_s16 }
 0x2c2   : > { %1434 = vrot.lane.b32.xlu0 %v3940_v30, %s3492_s16 }
 0x2cf   : > { %1052 = vmax.xlane.f32.xlu2 %v1051_v57 }
 0x2f5   : > { %v1039_v43 = vpop.f32.mrf.mxu3 }
 0x2f6   : > { %v3985_v31 = vadd.f32 %v3956_v14, %v1039_v43 }
 0x2f8   : > { %v1063_v44 = vsel %vm1044_vm12, %v3985_v31, -inf }
 0x2f9   : > { %1064 = vmax.xlane.f32.xlu1 %v1063_v44  ;;  %v1047_v45 = vpop.xlane.xlu1 %1046 }
 0x2fa   : > { %v1069_v46 = vsub.f32 %v950_v16, %v1047_v45  ;;  %v4002_v16 = vpack.c.b16 %v1217_v9, %v1216_v63 }
 0x2fc   : > { %v1077_v51 = vmul.f32 1.442695, %v1069_v46  ;;  %1230 = vmatpush.bf16.msrb.mxu3 %v4002_v16 }
 0x2fd   : > { %v1041_v38 = vpop.f32.mrf.mxu3 }
 0x2fe   : > { %v3990_v52 = vadd.f32 %v3960_v19, %v1041_v38  ;;  %3146 = vpow2.f32 %v1077_v51 }
 0x300   : > { %v1066_v50 = vsel %vm1044_vm12, %v3990_v52, -inf }
 0x301   : > { %v1050_v41 = vpop.xlane.xlu2 %1049  ;;  %1067 = vmax.xlane.f32.xlu2 %v1066_v50 }
 0x302   : > { %v1070_v55 = vsub.f32 %v952_v21, %v1050_v41 }
 0x304   : > { %v1079_v60 = vmul.f32 1.442695, %v1070_v55  ;;  %v3994_v49 = vpop.eup %3146 }
 0x305   : > { %v1117_v62 = vpack.c.bf16 %v3994_v49, %v3994_v49 }
 0x306   : > { %3148 = vpow2.f32 %v1079_v60 }
 0x307   : > { %v1127_v11 = vunpack.c.l.b16 %v1117_v62 }
 0x309   : > { %v1302_v45 = vpop.permute.xlu2 %1301 }
 0x30c   : > { %v3998_v5 = vpop.eup %3148 }
 0x30d   : > { %v1118_v8 = vpack.c.bf16 %v3998_v5, %v3998_v5 }
 0x30f   : > { %v1128_v15 = vunpack.c.l.b16 %v1118_v8 }
 0x311   : > { %v1129_v18 = vpack.c.b16 %v1128_v15, %v1127_v11  ;;  %v1056_v20 = vpop.xlane.xlu0 %1055 }
 0x312   : > { %1277 = vrot.lane.b32.xlu1 %v3926_v39, %s3492_s16  ;;  %v1072_v46 = vsub.f32 %v3965_v27, %v1056_v20 }
 0x313   : > { %2866 = vmatmul.msk.bf16.vlgmr.msrb.gmra.mxu0 %vm1044_vm12, %v1129_v18 }
 0x314   : > { %v1083_v38 = vmul.f32 1.442695, %v1072_v46 }
 0x319   : > { %v1059_v21 = vpop.xlane.xlu0 %1058  ;;  %1325 = vrot.lane.b32.xlu2 %v3949_v4, %s3492_s16 }
 0x31a   : > { %v1073_v22 = vsub.f32 %v1010_v33, %v1059_v21  ;;  %1484 = vrot.lane.b32.xlu1 %v3937_v36, %s3492_s16 }
 0x31c   : > { %v1085_v24 = vmul.f32 1.442695, %v1073_v22 }
 0x31e   : > { %3150 = vpow2.f32 %v1085_v24 }
 0x321   : > { %1547 = vrot.lane.b32.xlu2 %v3906_v53, %s3493_s28  ;;  %v1062_v26 = vpop.xlane.xlu1 %1061 }
 0x322   : > { %v1074_v29 = vsub.f32 %v1012_v34, %v1062_v26  ;;  %1459 = vrot.lane.b32.xlu1 %v3934_v28, %s3492_s16 }
 0x323   : > { %2870 = vmatmul.msk.bf16.vlgmr.msra.gmra.mxu0 %vm933_vm11, %v1254_v42 }
 0x324   : > { %v1087_v32 = vmul.f32 1.442695, %v1074_v29  ;;  %v4017_v23 = vpop.eup %3150 }
 0x325   : > { %v1121_v33 = vpack.c.bf16 %v4017_v23, %v4017_v23 }
 0x326   : > { %3152 = vpow2.f32 %v1087_v32 }
 0x327   : > { %v1183_v42 = vunpack.c.l.b16 %v1121_v33  ;;  %3154 = vpow2.f32 %v1083_v38 }
 0x32a   : > { %1545 = vrot.lane.b32.xlu1 %v3902_v35, %s3493_s28 }
 0x32c   : > { %v4023_v59 = vpop.eup %3152  ;;  %v1328_v37 = vpop.permute.xlu0 %1327 }
 0x32d   : > { %v1122_v34 = vpack.c.bf16 %v4023_v59, %v4023_v59  ;;  %v1333_v57 = vsel %vm933_vm11, %v1328_v37, 0  ;;  %v4034_v55 = vpop.eup %3154 }
 0x32e   : > { %1342 = vmatpush.bf16.xpose.msra.mxu3 %v1333_v57  ;;  %v1120_v58 = vpack.c.bf16 %v4034_v55, %v4034_v55 }
 0x32f   : > { %v1184_v43 = vunpack.c.l.b16 %v1122_v34 }
 0x330   : > { %v1156_v27 = vunpack.c.l.b16 %v1120_v58 }
 0x331   : > { %v1185_v44 = vpack.c.b16 %v1184_v43, %v1183_v42 }
 0x332   : > { %1595 = vrot.lane.b32.xlu1 %v3920_v1, %s3493_s28 }
 0x333   : > { %2868 = vmatmul.msk.bf16.vlgmr.msrb.gmra.mxu2 %vm1044_vm12, %v1185_v44 }
 0x342   : > { %v1053_v51 = vpop.xlane.xlu2 %1052 }
 0x343   : > { %v1071_v50 = vsub.f32 %v3980_v40, %v1053_v51  ;;  %2872 = vmatmul.msk.bf16.vlgmr.msra.gmra.mxu2 %vm933_vm11, %v1302_v45  ;;  %v1435_v40 = vpop.permute.xlu0 %1434 }
 0x344   : > { %1447 = vmatpush.bf16.msrb.mxu0 %v1435_v40 }
 0x345   : > { %v1081_v41 = vmul.f32 1.442695, %v1071_v50 }
 0x347   : > { %3156 = vpow2.f32 %v1081_v41 }
 0x34d   : > { %v4038_v60 = vpop.eup %3156 }
 0x34e   : > { %v1119_v48 = vpack.c.bf16 %v4038_v60, %v4038_v60 }
 0x350   : > { %v1155_v61 = vunpack.c.l.b16 %v1119_v48 }
 0x352   : > { %v1157_v62 = vpack.c.b16 %v1156_v27, %v1155_v61 }
 0x354   : > { %2867 = vmatmul.msk.bf16.vlgmr.msrb.gmra.mxu1 %vm1044_vm12, %v1157_v62 }
 0x36c   : > { %v1065_v63 = vpop.xlane.xlu1 %1064 }
 0x36d   : > { %v1075_v0 = vsub.f32 %v3985_v31, %v1065_v63 }
 0x36f   : > { %v1089_v8 = vmul.f32 1.442695, %v1075_v0 }
 0x371   : > { %3158 = vpow2.f32 %v1089_v8 }
 0x374   : > { %v1068_v9 = vpop.xlane.xlu2 %1067 }
 0x375   : > { %v1076_v11 = vsub.f32 %v3990_v52, %v1068_v9 }
 0x377   : > { %v1091_v15 = vmul.f32 1.442695, %v1076_v11  ;;  %v4045_v18 = vpop.eup %3158 }
 0x378   : > { %v1123_v21 = vpack.c.bf16 %v4045_v18, %v4045_v18 }
 0x379   : > { %3160 = vpow2.f32 %v1091_v15 }
 0x37a   : > { %v1211_v26 = vunpack.c.l.b16 %v1123_v21 }
 0x37c   : > { %v1326_v20 = vpop.permute.xlu2 %1325 }
 0x37f   : > { %v4049_v22 = vpop.eup %3160 }
 0x380   : > { %v1124_v24 = vpack.c.bf16 %v4049_v22, %v4049_v22 }
 0x382   : > { %v1212_v31 = vunpack.c.l.b16 %v1124_v24 }
 0x384   : > { %v1213_v29 = vpack.c.b16 %v1212_v31, %v1211_v26  ;;  %v1548_v32 = vpop.permute.xlu2 %1547  ;;  %v1278_v33 = vpop.permute.xlu1 %1277 }
 0x385   : > { %v1553_v52 = vsel %vm933_vm11, %v1548_v32, 0  ;;  %2871 = vmatmul.msk.bf16.vlgmr.msra.gmra.mxu1 %vm933_vm11, %v1278_v33 }
 0x386   : > { %2869 = vmatmul.msk.bf16.vlgmr.msrb.gmra.mxu3 %vm1044_vm12, %v1213_v29  ;;  %1562 = vmatpush.bf16.xpose.msra.mxu0 %v1553_v52 }
 0x38c   : > { %v1485_v37 = vpop.permute.xlu1 %1484 }
 0x38d   : > { %1497 = vmatpush.bf16.msrb.mxu2 %v1485_v37 }
 0x390   : > { %v4056_v34 = vpop.f32.mrf.mxu0 }
 0x394   : > { %v1460_v57 = vpop.permute.xlu1 %1459 }
 0x395   : > { %1472 = vmatpush.bf16.msrb.mxu1 %v1460_v57 }
 0x396   : > { %2873 = vmatmul.msk.bf16.vlgmr.msra.gmra.mxu3 %vm933_vm11, %v1326_v20 }
 0x398   : > { %v4059_v42 = vpop.f32.mrf.mxu0 }
 0x39c   : > { %v4061_v43 = vpop.permute.xlu1 %1545 }
 0x3a0   : > { %v1272_v44 = vpop.f32.mrf.mxu0 }
 0x3a1   : > { %v1273_v45 = vadd.f32 %v3956_v14, %v1272_v44 }
 0x3a3   : > { %v1349_v46 = vsel %vm1044_vm12, %v1273_v45, -inf }
 0x3a4   : > { %1350 = vmax.xlane.f32.xlu1 %v1349_v46  ;;  %v1596_v38 = vpop.permute.xlu1 %1595 }
 0x3a5   : > { %v1601_v51 = vsel %vm933_vm11, %v1596_v38, 0 }
 0x3a6   : > { %1610 = vmatpush.bf16.xpose.msra.mxu2 %v1601_v51 }
 0x3a8   : > { %v1274_v50 = vpop.f32.mrf.mxu0 }
 0x3a9   : > { %v1275_v41 = vadd.f32 %v3960_v19, %v1274_v50 }
 0x3ab   : > { %v1352_v58 = vsel %vm1044_vm12, %v1275_v41, -inf }
 0x3ac   : > { %1353 = vmax.xlane.f32.xlu0 %v1352_v58 }
 0x3b6   : > { %v4074_v48 = vpop.f32.mrf.mxu2 }
 0x3bd   : > { %1509 = vrot.lane.b32.xlu1 %v4002_v16, %s3492_s16 }
 0x3be   : > { %v4078_v61 = vpop.f32.mrf.mxu2 }
 0x3c0   : > { %1571 = vrot.lane.b32.xlu0 %v3908_v54, %s3493_s28 }
 0x3c5   : > { %1593 = vrot.lane.b32.xlu1 %v3930_v10, %s3493_s28 }
 0x3c6   : > { %v1320_v0 = vpop.f32.mrf.mxu2 }
 0x3c7   : > { %v4085_v9 = vadd.f32 %v3956_v14, %v1320_v0 }
 0x3c9   : > { %v1361_v24 = vsel %vm1044_vm12, %v4085_v9, -inf }
 0x3ce   : > { %v1322_v26 = vpop.f32.mrf.mxu2 }
 0x3cf   : > { %v1323_v31 = vadd.f32 %v3960_v19, %v1322_v26 }
 0x3d1   : > { %v4076_v27 = vpop.f32.mrf.mxu1  ;;  %v1364_v32 = vsel %vm1044_vm12, %v1323_v31, -inf }
 0x3d9   : > { %v4080_v62 = vpop.f32.mrf.mxu1 }
 0x402   : > { %v1296_v40 = vpop.f32.mrf.mxu1 }
 0x403   : > { %v1297_v63 = vadd.f32 %v3956_v14, %v1296_v40 }
 0x405   : > { %v1355_v8 = vsel %vm1044_vm12, %v1297_v63, -inf }
 0x406   : > { %1356 = vmax.xlane.f32.xlu2 %v1355_v8 }
 0x409   : > { %v4087_v11 = vpop.f32.mrf.mxu3 }
 0x40a   : > { %v1298_v15 = vpop.f32.mrf.mxu1 }
 0x40b   : > { %v1299_v20 = vadd.f32 %v3960_v19, %v1298_v15 }
 0x40d   : > { %v1358_v21 = vsel %vm1044_vm12, %v1299_v20, -inf }
 0x40e   : > { %1359 = vmax.xlane.f32.xlu1 %v1358_v21  ;;  %1362 = vmax.xlane.f32.xlu2 %v1361_v24 }
 0x411   : > { %v4094_v29 = vpop.f32.mrf.mxu3 }
 0x416   : > { %1365 = vmax.xlane.f32.xlu1 %v1364_v32 }
 0x417   : > { %v1351_v33 = vpop.xlane.xlu1 %1350 }
 0x418   : > { %v1373_v52 = vsub.f32 %v1273_v45, %v1351_v33 }
 0x419   : > { %v1344_v37 = vpop.f32.mrf.mxu3 }
 0x41a   : > { %v4098_v57 = vadd.f32 %v3956_v14, %v1344_v37  ;;  %v1381_v44 = vmul.f32 1.442695, %v1373_v52 }
 0x41c   : > { %v1367_v46 = vsel %vm1044_vm12, %v4098_v57, -inf  ;;  %3162 = vpow2.f32 %v1381_v44 }
 0x41d   : > { %1368 = vmax.xlane.f32.xlu0 %v1367_v46 }
 0x41f   : > { %v1354_v38 = vpop.xlane.xlu0 %1353 }
 0x420   : > { %v1374_v51 = vsub.f32 %v1275_v41, %v1354_v38 }
 0x421   : > { %v1346_v50 = vpop.f32.mrf.mxu3 }
 0x422   : > { %v1383_v58 = vmul.f32 1.442695, %v1374_v51  ;;  %v4103_v40 = vadd.f32 %v3960_v19, %v1346_v50  ;;  %v4107_v0 = vpop.eup %3162 }
 0x423   : > { %v1421_v8 = vpack.c.bf16 %v4107_v0, %v4107_v0 }
 0x424   : > { %3164 = vpow2.f32 %v1383_v58  ;;  %v1370_v45 = vsel %vm1044_vm12, %v4103_v40, -inf }
 0x425   : > { %1371 = vmax.xlane.f32.xlu2 %v1370_v45  ;;  %v1431_v21 = vunpack.c.l.b16 %v1421_v8 }
 0x42a   : > { %v4111_v15 = vpop.eup %3164 }
 0x42b   : > { %v1422_v41 = vpack.c.bf16 %v4111_v15, %v4111_v15 }
 0x42d   : > { %v1432_v24 = vunpack.c.l.b16 %v1422_v41 }
 0x42f   : > { %v1433_v26 = vpack.c.b16 %v1432_v24, %v1431_v21  ;;  %1619 = vrot.lane.b32.xlu1 %v3944_v56, %s3493_s28  ;;  %v1510_v32 = vpop.permute.xlu1 %1509 }
 0x430   : > { %1522 = vmatpush.bf16.msrb.mxu3 %v1510_v32 }
 0x431   : > { %1617 = vrot.lane.b32.xlu0 %v3949_v4, %s3493_s28  ;;  %2874 = vmatmul.msk.bf16.vlgmr.msrb.gmra.mxu0 %vm1044_vm12, %v1433_v26 }
 0x432   : > { %v1572_v33 = vpop.permute.xlu0 %1571 }
 0x433   : > { %v1577_v52 = vsel %vm933_vm11, %v1572_v33, 0 }
 0x434   : > { %1586 = vmatpush.bf16.xpose.msra.mxu1 %v1577_v52 }
 0x439   : > { %1839 = vrot.lane.b32.xlu0 %v3906_v53, %s3494_s18  ;;  %v1594_v53 = vpop.permute.xlu1 %1593 }
 0x43d   : > { %1569 = vrot.lane.b32.xlu2 %v3926_v39, %s3493_s28 }
 0x441   : > { %2878 = vmatmul.msk.bf16.vlgmr.msra.gmra.mxu0 %vm933_vm11, %v4061_v43 }
 0x445   : > { %1726 = vrot.lane.b32.xlu2 %v3940_v30, %s3493_s28 }
 0x44d   : > { %1837 = vrot.lane.b32.xlu2 %v3902_v35, %s3494_s18 }
 0x455   : > { %1863 = vrot.lane.b32.xlu2 %v3908_v54, %s3494_s18 }
 0x45d   : > { %1887 = vrot.lane.b32.xlu2 %v3920_v1, %s3494_s18 }
 0x465   : > { %1861 = vrot.lane.b32.xlu2 %v3926_v39, %s3494_s18 }
 0x46d   : > { %1801 = vrot.lane.b32.xlu2 %v4002_v16, %s3493_s28 }
 0x479   : > { %v1357_v43 = vpop.xlane.xlu2 %1356 }
 0x47a   : > { %v1375_v37 = vsub.f32 %v1297_v63, %v1357_v43 }
 0x47c   : > { %v1385_v44 = vmul.f32 1.442695, %v1375_v37 }
 0x47e   : > { %3166 = vpow2.f32 %v1385_v44 }
 0x481   : > { %v1363_v46 = vpop.xlane.xlu2 %1362  ;;  %v1360_v38 = vpop.xlane.xlu1 %1359 }
 0x482   : > { %v1377_v35 = vsub.f32 %v4085_v9, %v1363_v46  ;;  %v1376_v51 = vsub.f32 %v1299_v20, %v1360_v38 }
 0x484   : > { %v1387_v54 = vmul.f32 1.442695, %v1376_v51  ;;  %v1389_v50 = vmul.f32 1.442695, %v1377_v35  ;;  %v4140_v1 = vpop.eup %3166 }
 0x485   : > { %v1423_v45 = vpack.c.bf16 %v4140_v1, %v4140_v1 }
 0x486   : > { %3168 = vpow2.f32 %v1387_v54 }
 0x487   : > { %3170 = vpow2.f32 %v1389_v50  ;;  %v1456_v20 = vunpack.c.l.b16 %v1423_v45 }
 0x489   : > { %v1366_v58 = vpop.xlane.xlu1 %1365 }
 0x48a   : > { %v1378_v39 = vsub.f32 %v1323_v31, %v1366_v58 }
 0x48c   : > { %v1391_v8 = vmul.f32 1.442695, %v1378_v39  ;;  %v4144_v63 = vpop.eup %3168 }
 0x48d   : > { %v1424_v41 = vpack.c.bf16 %v4144_v63, %v4144_v63  ;;  %v4148_v9 = vpop.eup %3170 }
 0x48e   : > { %3172 = vpow2.f32 %v1391_v8  ;;  %v1425_v31 = vpack.c.bf16 %v4148_v9, %v4148_v9 }
 0x48f   : > { %v1457_v21 = vunpack.c.l.b16 %v1424_v41 }
 0x490   : > { %v1369_v24 = vpop.xlane.xlu0 %1368  ;;  %v1481_v37 = vunpack.c.l.b16 %v1425_v31 }
 0x491   : > { %v1379_v26 = vsub.f32 %v4098_v57, %v1369_v24  ;;  %v1458_v32 = vpack.c.b16 %v1457_v21, %v1456_v20 }
 0x493   : > { %2875 = vmatmul.msk.bf16.vlgmr.msrb.gmra.mxu1 %vm1044_vm12, %v1458_v32  ;;  %v1393_v43 = vmul.f32 1.442695, %v1379_v26 }
 0x494   : > { %v4153_v33 = vpop.eup %3172 }
 0x495   : > { %v1426_v52 = vpack.c.bf16 %v4153_v33, %v4153_v33  ;;  %3174 = vpow2.f32 %v1393_v43 }
 0x497   : > { %v1482_v44 = vunpack.c.l.b16 %v1426_v52 }
 0x498   : > { %v1372_v46 = vpop.xlane.xlu2 %1371 }
 0x499   : > { %v1483_v38 = vpack.c.b16 %v1482_v44, %v1481_v37  ;;  %v1380_v35 = vsub.f32 %v4103_v40, %v1372_v46 }
 0x49b   : > { %v1395_v57 = vmul.f32 1.442695, %v1380_v35  ;;  %2876 = vmatmul.msk.bf16.vlgmr.msrb.gmra.mxu2 %vm1044_vm12, %v1483_v38  ;;  %v4160_v51 = vpop.eup %3174 }
 0x49c   : > { %v1427_v58 = vpack.c.bf16 %v4160_v51, %v4160_v51 }
 0x49d   : > { %3176 = vpow2.f32 %v1395_v57 }
 0x49e   : > { %v1506_v41 = vunpack.c.l.b16 %v1427_v58 }
 0x4a0   : > { %v1570_v54 = vpop.permute.xlu2 %1569 }
 0x4a1   : > { %v1620_v50 = vpop.permute.xlu1 %1619 }
 0x4a2   : > { %v1625_v39 = vsel %vm933_vm11, %v1620_v50, 0 }
 0x4a3   : > { %v4165_v45 = vpop.eup %3176  ;;  %v1618_v8 = vpop.permute.xlu0 %1617  ;;  %1634 = vmatpush.bf16.xpose.msra.mxu3 %v1625_v39  ;;  %2879 = vmatmul.msk.bf16.vlgmr.msra.gmra.mxu1 %vm933_vm11, %v1570_v54 }
 0x4a4   : > { %v1428_v40 = vpack.c.bf16 %v4165_v45, %v4165_v45 }
 0x4a6   : > { %v1507_v20 = vunpack.c.l.b16 %v1428_v40 }
 0x4a8   : > { %v1508_v21 = vpack.c.b16 %v1507_v20, %v1506_v41  ;;  %v1727_v24 = vpop.permute.xlu2 %1726 }
 0x4a9   : > { %1739 = vmatpush.bf16.msrb.mxu0 %v1727_v24 }
 0x4aa   : > { %2877 = vmatmul.msk.bf16.vlgmr.msrb.gmra.mxu3 %vm1044_vm12, %v1508_v21 }
 0x4ab   : > { %v1840_v26 = vpop.permute.xlu0 %1839  ;;  %2880 = vmatmul.msk.bf16.vlgmr.msra.gmra.mxu2 %vm933_vm11, %v1594_v53 }
 0x4ac   : > { %v1845_v32 = vsel %vm933_vm11, %v1840_v26, 0 }
 0x4ad   : > { %1854 = vmatpush.bf16.xpose.msra.mxu0 %v1845_v32 }
 0x4ae   : > { %v4173_v31 = vpop.f32.mrf.mxu0 }
 0x4b0   : > { %v4175_v52 = vpop.permute.xlu2 %1837 }
 0x4b6   : > { %v4177_v43 = vpop.f32.mrf.mxu0 }
 0x4b8   : > { %v4179_v37 = vpop.permute.xlu2 %1863 }
 0x4ba   : > { %2881 = vmatmul.msk.bf16.vlgmr.msra.gmra.mxu3 %vm933_vm11, %v1618_v8 }
 0x4be   : > { %v1564_v44 = vpop.f32.mrf.mxu0 }
 0x4bf   : > { %v1565_v46 = vadd.f32 %v3956_v14, %v1564_v44 }
 0x4c0   : > { %v4183_v38 = vpop.permute.xlu2 %1887 }
 0x4c1   : > { %v1641_v53 = vsel %vm1044_vm12, %v1565_v46, -inf }
 0x4c2   : > { %1642 = vmax.xlane.f32.xlu1 %v1641_v53 }
 0x4c6   : > { %v1566_v35 = vpop.f32.mrf.mxu0 }
 0x4c7   : > { %v1567_v57 = vadd.f32 %v3960_v19, %v1566_v35 }
 0x4c8   : > { %v4187_v54 = vpop.permute.xlu2 %1861 }
 0x4c9   : > { %v1644_v50 = vsel %vm1044_vm12, %v1567_v57, -inf }
 0x4ca   : > { %1645 = vmax.xlane.f32.xlu0 %v1644_v50 }
 0x4d0   : > { %v1802_v58 = vpop.permute.xlu2 %1801 }
 0x4d1   : > { %1814 = vmatpush.bf16.msrb.mxu3 %v1802_v58 }
 0x4db   : > { %1751 = vrot.lane.b32.xlu1 %v3934_v28, %s3493_s28 }
 0x4de   : > { %1776 = vrot.lane.b32.xlu0 %v3937_v36, %s3493_s28 }
 0x510   : > { %v4194_v39 = vpop.f32.mrf.mxu1 }
 0x518   : > { %v4196_v8 = vpop.f32.mrf.mxu1 }
 0x51e   : > { %v4198_v40 = vpop.f32.mrf.mxu2 }
 0x520   : > { %v1588_v41 = vpop.f32.mrf.mxu1 }
 0x521   : > { %v1589_v20 = vadd.f32 %v3956_v14, %v1588_v41 }
 0x523   : > { %v1647_v21 = vsel %vm1044_vm12, %v1589_v20, -inf }
 0x524   : > { %1648 = vmax.xlane.f32.xlu2 %v1647_v21 }
 0x526   : > { %v4202_v24 = vpop.f32.mrf.mxu2 }
 0x528   : > { %v1590_v26 = vpop.f32.mrf.mxu1 }
 0x529   : > { %v1591_v32 = vadd.f32 %v3960_v19, %v1590_v26 }
 0x52b   : > { %v1650_v44 = vsel %vm1044_vm12, %v1591_v32, -inf }
 0x52c   : > { %1651 = vmax.xlane.f32.xlu1 %v1650_v44 }
 0x52d   : > { %v4206_v53 = vpop.f32.mrf.mxu3 }
 0x52e   : > { %v1612_v35 = vpop.f32.mrf.mxu2 }
 0x52f   : > { %v1613_v50 = vadd.f32 %v3956_v14, %v1612_v35 }
 0x531   : > { %v1653_v58 = vsel %vm1044_vm12, %v1613_v50, -inf }
 0x532   : > { %1654 = vmax.xlane.f32.xlu0 %v1653_v58 }
 0x535   : > { %v4210_v41 = vpop.f32.mrf.mxu3  ;;  %v1643_v17 = vpop.xlane.xlu1 %1642 }
 0x536   : > { %v1665_v21 = vsub.f32 %v1565_v46, %v1643_v17  ;;  %v1614_v47 = vpop.f32.mrf.mxu2 }
 0x537   : > { %v1615_v25 = vadd.f32 %v3960_v19, %v1614_v47 }
 0x538   : > { %v1673_v12 = vmul.f32 1.442695, %v1665_v21 }
 0x539   : > { %v1656_v26 = vsel %vm1044_vm12, %v1615_v25, -inf }
 0x53a   : > { %1657 = vmax.xlane.f32.xlu1 %v1656_v26  ;;  %3178 = vpow2.f32 %v1673_v12 }
 0x53c   : > { %1885 = vrot.lane.b32.xlu2 %v3930_v10, %s3494_s18 }
 0x53d   : > { %v1646_v44 = vpop.xlane.xlu0 %1645  ;;  %v1636_v13 = vpop.f32.mrf.mxu3 }
 0x53e   : > { %v1666_v35 = vsub.f32 %v1567_v57, %v1646_v44  ;;  %v1637_v58 = vadd.f32 %v3956_v14, %v1636_v13  ;;  %v1869_v44 = vsel %vm933_vm11, %v4179_v37, 0 }
 0x540   : > { %v1675_v6 = vmul.f32 1.442695, %v1666_v35  ;;  %v1659_v2 = vsel %vm1044_vm12, %v1637_v58, -inf  ;;  %v4218_v17 = vpop.eup %3178 }
 0x541   : > { %1660 = vmax.xlane.f32.xlu0 %v1659_v2  ;;  %v1713_v21 = vpack.c.bf16 %v4218_v17, %v4218_v17 }
 0x542   : > { %3180 = vpow2.f32 %v1675_v6 }
 0x543   : > { %v1723_v57 = vunpack.c.l.b16 %v1713_v21 }
 0x545   : > { %v1638_v47 = vpop.f32.mrf.mxu3 }
 0x546   : > { %v1639_v46 = vadd.f32 %v3960_v19, %v1638_v47  ;;  %v1893_v47 = vsel %vm933_vm11, %v4183_v38, 0 }
 0x548   : > { %v4223_v10 = vpop.eup %3180  ;;  %v1662_v12 = vsel %vm1044_vm12, %v1639_v46, -inf }
 0x549   : > { %v1714_v13 = vpack.c.bf16 %v4223_v10, %v4223_v10  ;;  %1663 = vmax.xlane.f32.xlu1 %v1662_v12 }
 0x54b   : > { %v1724_v26 = vunpack.c.l.b16 %v1714_v13 }
 0x54d   : > { %v1725_v2 = vpack.c.b16 %v1724_v26, %v1723_v57  ;;  %v1752_v6 = vpop.permute.xlu1 %1751 }
 0x54e   : > { %1764 = vmatpush.bf16.msrb.mxu1 %v1752_v6 }
 0x54f   : > { %2882 = vmatmul.msk.bf16.vlgmr.msrb.gmra.mxu0 %vm1044_vm12, %v1725_v2 }
 0x550   : > { %v1777_v35 = vpop.permute.xlu0 %1776 }
 0x551   : > { %1789 = vmatpush.bf16.msrb.mxu2 %v1777_v35 }
 0x552   : > { %1878 = vmatpush.bf16.xpose.msra.mxu1 %v1869_v44 }
 0x555   : > { %1902 = vmatpush.bf16.xpose.msra.mxu2 %v1893_v47  ;;  %1911 = vrot.lane.b32.xlu0 %v3944_v56, %s3494_s18 }
 0x55f   : > { %2886 = vmatmul.msk.bf16.vlgmr.msra.gmra.mxu0 %vm933_vm11, %v4175_v52 }
 0x562   : > { %1909 = vrot.lane.b32.xlu1 %v3949_v4, %s3494_s18 }
 0x56a   : > { %2018 = vrot.lane.b32.xlu1 %v3940_v30, %s3494_s18 }
 0x597   : > { %v1649_v37 = vpop.xlane.xlu2 %1648 }
 0x598   : > { %v1667_v21 = vsub.f32 %v1589_v20, %v1649_v37 }
 0x59a   : > { %v1677_v12 = vmul.f32 1.442695, %v1667_v21 }
 0x59c   : > { %3182 = vpow2.f32 %v1677_v12 }
 0x59f   : > { %v1652_v13 = vpop.xlane.xlu1 %1651 }
 0x5a0   : > { %v1668_v38 = vsub.f32 %v1591_v32, %v1652_v13 }
 0x5a2   : > { %v1679_v57 = vmul.f32 1.442695, %v1668_v38  ;;  %v4241_v56 = vpop.eup %3182 }
 0x5a3   : > { %v1715_v52 = vpack.c.bf16 %v4241_v56, %v4241_v56 }
 0x5a4   : > { %3184 = vpow2.f32 %v1679_v57 }
 0x5a5   : > { %v1655_v26 = vpop.xlane.xlu0 %1654  ;;  %v1748_v44 = vunpack.c.l.b16 %v1715_v52 }
 0x5a6   : > { %v1669_v2 = vsub.f32 %v1613_v50, %v1655_v26 }
 0x5a8   : > { %v1681_v6 = vmul.f32 1.442695, %v1669_v2 }
 0x5aa   : > { %v4245_v4 = vpop.eup %3184  ;;  %3186 = vpow2.f32 %v1681_v6 }
 0x5ab   : > { %v1716_v30 = vpack.c.bf16 %v4245_v4, %v4245_v4 }
 0x5ad   : > { %v1658_v20 = vpop.xlane.xlu1 %1657  ;;  %v1749_v35 = vunpack.c.l.b16 %v1716_v30 }
 0x5ae   : > { %v1670_v32 = vsub.f32 %v1615_v25, %v1658_v20 }
 0x5af   : > { %v1750_v47 = vpack.c.b16 %v1749_v35, %v1748_v44 }
 0x5b0   : > { %v1683_v37 = vmul.f32 1.442695, %v1670_v32  ;;  %v4250_v50 = vpop.eup %3186 }
 0x5b1   : > { %2883 = vmatmul.msk.bf16.vlgmr.msrb.gmra.mxu1 %vm1044_vm12, %v1750_v47  ;;  %v1717_v13 = vpack.c.bf16 %v4250_v50, %v4250_v50 }
 0x5b2   : > { %3188 = vpow2.f32 %v1683_v37 }
 0x5b3   : > { %v1773_v2 = vunpack.c.l.b16 %v1717_v13 }
 0x5b4   : > { %v1661_v21 = vpop.xlane.xlu0 %1660 }
 0x5b5   : > { %v1671_v12 = vsub.f32 %v1637_v58, %v1661_v21 }
 0x5b7   : > { %v1685_v26 = vmul.f32 1.442695, %v1671_v12 }
 0x5b8   : > { %v4254_v38 = vpop.eup %3188 }
 0x5b9   : > { %v1718_v57 = vpack.c.bf16 %v4254_v38, %v4254_v38  ;;  %3190 = vpow2.f32 %v1685_v26 }
 0x5bb   : > { %v1774_v25 = vunpack.c.l.b16 %v1718_v57 }
 0x5bc   : > { %v1664_v52 = vpop.xlane.xlu1 %1663 }
 0x5bd   : > { %v1775_v6 = vpack.c.b16 %v1774_v25, %v1773_v2  ;;  %v1672_v30 = vsub.f32 %v1639_v46, %v1664_v52 }
 0x5bf   : > { %v1687_v20 = vmul.f32 1.442695, %v1672_v30  ;;  %2884 = vmatmul.msk.bf16.vlgmr.msrb.gmra.mxu2 %vm1044_vm12, %v1775_v6  ;;  %v4261_v58 = vpop.eup %3190 }
 0x5c0   : > { %v1719_v44 = vpack.c.bf16 %v4261_v58, %v4261_v58 }
 0x5c1   : > { %3192 = vpow2.f32 %v1687_v20  ;;  %2887 = vmatmul.msk.bf16.vlgmr.msra.gmra.mxu1 %vm933_vm11, %v4187_v54  ;;  %v1886_v54 = vpop.permute.xlu2 %1885 }
 0x5c2   : > { %v1798_v37 = vunpack.c.l.b16 %v1719_v44 }
 0x5c7   : > { %v4265_v35 = vpop.eup %3192  ;;  %v1912_v32 = vpop.permute.xlu0 %1911 }
 0x5c8   : > { %v1720_v47 = vpack.c.bf16 %v4265_v35, %v4265_v35  ;;  %v1917_v46 = vsel %vm933_vm11, %v1912_v32, 0  ;;  %v1397_v32 = vsel %vm1044_vm12, %v4107_v0, 0.0 }
 0x5c9   : > { %1926 = vmatpush.bf16.xpose.msra.mxu3 %v1917_v46  ;;  %v1692_v46 = vsel %vm1044_vm12, %v4223_v10, 0.0 }
 0x5ca   : > { %v1799_v21 = vunpack.c.l.b16 %v1720_v47  ;;  %v1689_v47 = vsel %vm1044_vm12, %v4218_v17, 0.0 }
 0x5cc   : > { %v1800_v12 = vpack.c.b16 %v1799_v21, %v1798_v37  ;;  %v4270_v13 = vpop.f32.mrf.mxu0 }
 0x5ce   : > { %2885 = vmatmul.msk.bf16.vlgmr.msrb.gmra.mxu3 %vm1044_vm12, %v1800_v12 }
 0x5cf   : > { %2888 = vmatmul.msk.bf16.vlgmr.msra.gmra.mxu2 %vm933_vm11, %v1886_v54 }
 0x5d4   : > { %v4274_v57 = vpop.f32.mrf.mxu0  ;;  %v1910_v26 = vpop.permute.xlu1 %1909 }
 0x5dc   : > { %v1856_v2 = vpop.f32.mrf.mxu0  ;;  %v2019_v25 = vpop.permute.xlu1 %2018 }
 0x5dd   : > { %v1857_v52 = vadd.f32 %v3956_v14, %v1856_v2  ;;  %2031 = vmatpush.bf16.msrb.mxu0 %v2019_v25 }
 0x5de   : > { %2889 = vmatmul.msk.bf16.vlgmr.msra.gmra.mxu3 %vm933_vm11, %v1910_v26 }
 0x5df   : > { %v1933_v6 = vsel %vm1044_vm12, %v1857_v52, -inf }
 0x5e0   : > { %1934 = vmax.xlane.f32.xlu2 %v1933_v6 }
 0x5e4   : > { %v1858_v30 = vpop.f32.mrf.mxu0 }
 0x5e5   : > { %v1859_v20 = vadd.f32 %v3960_v19, %v1858_v30 }
 0x5e7   : > { %v1936_v44 = vsel %vm1044_vm12, %v1859_v20, -inf }
 0x5e8   : > { %1937 = vmax.xlane.f32.xlu0 %v1936_v44 }
 0x5f8   : > { %2068 = vrot.lane.b32.xlu2 %v3937_v36, %s3494_s18  ;;  %v1406_v36 = vsel %vm1044_vm12, %v4144_v63, 0.0 }
 0x5fc   : > { %2043 = vrot.lane.b32.xlu0 %v3934_v28, %s3494_s18 }
 0x621   : > { %1398 = vadd.xlane.f32.xlu2 %v1397_v32 }
 0x626   : > { %1690 = vadd.xlane.f32.xlu0 %v1689_v47 }
 0x62e   : > { %1693 = vadd.xlane.f32.xlu0 %v1692_v46  ;;  %v4291_v37 = vpop.f32.mrf.mxu1 }
 0x636   : > { %1407 = vadd.xlane.f32.xlu0 %v1406_v36  ;;  %v4295_v21 = vpop.f32.mrf.mxu1 }
 0x63e   : > { %v1880_v28 = vpop.f32.mrf.mxu1 }
 0x63f   : > { %v4298_v0 = vadd.f32 %v3956_v14, %v1880_v28 }
 0x641   : > { %v1939_v17 = vsel %vm1044_vm12, %v4298_v0, -inf }
 0x642   : > { %v4302_v12 = vpop.f32.mrf.mxu2  ;;  %1940 = vmax.xlane.f32.xlu1 %v1939_v17 }
 0x646   : > { %v1882_v10 = vpop.f32.mrf.mxu1 }
 0x647   : > { %v4305_v54 = vadd.f32 %v3960_v19, %v1882_v10 }
 0x649   : > { %v1942_v63 = vsel %vm1044_vm12, %v4305_v54, -inf }
 0x64a   : > { %v4309_v26 = vpop.f32.mrf.mxu2  ;;  %1943 = vmax.xlane.f32.xlu2 %v1942_v63 }
 0x651   : > { %v4311_v2 = vpop.f32.mrf.mxu3 }
 0x652   : > { %v1904_v25 = vpop.f32.mrf.mxu2 }
 0x653   : > { %v4314_v6 = vadd.f32 %v3956_v14, %v1904_v25  ;;  %v1935_v30 = vpop.xlane.xlu2 %1934 }
 0x654   : > { %v1957_v44 = vsub.f32 %v1857_v52, %v1935_v30 }
 0x655   : > { %v1945_v32 = vsel %vm1044_vm12, %v4314_v6, -inf }
 0x656   : > { %1946 = vmax.xlane.f32.xlu2 %v1945_v32  ;;  %v1965_v47 = vmul.f32 1.442695, %v1957_v44 }
 0x658   : > { %3194 = vpow2.f32 %v1965_v47  ;;  %v1403_v47 = vsel %vm1044_vm12, %v4140_v1, 0.0  ;;  %v1695_v1 = vsel %vm1044_vm12, %v4241_v56, 0.0 }
 0x659   : > { %v4318_v46 = vpop.f32.mrf.mxu3 }
 0x65a   : > { %v1906_v36 = vpop.f32.mrf.mxu2 }
 0x65b   : > { %v4321_v28 = vadd.f32 %v3960_v19, %v1906_v36  ;;  %v1938_v17 = vpop.xlane.xlu0 %1937  ;;  %v2069_v10 = vpop.permute.xlu2 %2068  ;;  %2093 = vrot.lane.b32.xlu1 %v4002_v16, %s3494_s18  ;;  %s3430_s18 = scalar_lea.hbm %s4752_s12, 128 }
 0x65c   : > { %v1958_v63 = vsub.f32 %v1859_v20, %v1938_v17  ;;  %2081 = vmatpush.bf16.msrb.mxu2 %v2069_v10 }
 0x65d   : > { %v1948_v52 = vsel %vm1044_vm12, %v4321_v28, -inf }
 0x65e   : > { %v1967_v25 = vmul.f32 1.442695, %v1958_v63  ;;  %1949 = vmax.xlane.f32.xlu2 %v1948_v52  ;;  %v4327_v44 = vpop.eup %3194 }
 0x65f   : > { %v2005_v32 = vpack.c.bf16 %v4327_v44, %v4327_v44 }
 0x660   : > { %3196 = vpow2.f32 %v1967_v25 }
 0x661   : > { %v1928_v30 = vpop.f32.mrf.mxu3  ;;  %v2015_v36 = vunpack.c.l.b16 %v2005_v32  ;;  %v1412_v32 = vsel %vm1044_vm12, %v4153_v33, 0.0 }
 0x662   : > { %v4354_v56 = vadd.f32 %v3956_v14, %v1928_v30  ;;  %v1698_v14 = vsel %vm1044_vm12, %v4245_v4, 0.0 }
 0x664   : > { %v1951_v33 = vsel %vm1044_vm12, %v4354_v56, -inf }
 0x666   : > { %v4333_v20 = vpop.eup %3196  ;;  %1404 = vadd.xlane.f32.xlu2 %v1403_v47 }
 0x667   : > { %v2006_v16 = vpack.c.bf16 %v4333_v20, %v4333_v20 }
 0x669   : > { %v2016_v17 = vunpack.c.l.b16 %v2006_v16  ;;  %v1930_v10 = vpop.f32.mrf.mxu3  ;;  %v1096_v16 = vsel %vm1044_vm12, %v3998_v5, 0.0  ;;  %v1400_v5 = vsel %vm1044_vm12, %v4111_v15, 0.0 }
 0x66a   : > { %v4338_v63 = vadd.f32 %v3960_v19, %v1930_v10  ;;  %v1701_v19 = vsel %vm1044_vm12, %v4250_v50, 0.0  ;;  %v1710_v50 = vsel %vm1044_vm12, %v4265_v35, 0.0  ;;  %v1704_v35 = vsel %vm1044_vm12, %v4254_v38, 0.0 }
 0x66b   : > { %v2017_v52 = vpack.c.b16 %v2016_v17, %v2015_v36  ;;  %v1415_v36 = vsel %vm1044_vm12, %v4160_v51, 0.0  ;;  %v1707_v17 = vsel %vm1044_vm12, %v4261_v58, 0.0  ;;  %v1409_v58 = vsel %vm1044_vm12, %v4148_v9, 0.0 }
 0x66c   : > { %v1954_v25 = vsel %vm1044_vm12, %v4338_v63, -inf  ;;  %v1093_v9 = vsel %vm1044_vm12, %v3994_v49, 0.0 }
 0x66d   : > { %1955 = vmax.xlane.f32.xlu0 %v1954_v25  ;;  %2890 = vmatmul.msk.bf16.vlgmr.msrb.gmra.mxu0 %vm1044_vm12, %v2017_v52 }
 0x66e   : > { %v2044_v47 = vpop.permute.xlu0 %2043  ;;  %1696 = vadd.xlane.f32.xlu2 %v1695_v1  ;;  %v1418_v1 = vsel %vm1044_vm12, %v4165_v45, 0.0 }
 0x66f   : > { %2056 = vmatpush.bf16.msrb.mxu1 %v2044_v47 }
 0x675   : > { %1413 = vadd.xlane.f32.xlu0 %v1412_v32 }
 0x676   : > { %1702 = vadd.xlane.f32.xlu2 %v1701_v19 }
 0x67d   : > { %1097 = vadd.xlane.f32.xlu0 %v1096_v16 }
 0x67e   : > { %1416 = vadd.xlane.f32.xlu2 %v1415_v36 }
 0x685   : > { %1708 = vadd.xlane.f32.xlu0 %v1707_v17  ;;  %1952 = vmax.xlane.f32.xlu1 %v1951_v33 }
 0x686   : > { %1711 = vadd.xlane.f32.xlu2 %v1710_v50 }
 0x68d   : > { %1401 = vadd.xlane.f32.xlu1 %v1400_v5 }
 0x694   : > { %v4377_v47 = vpop.xlane.xlu2 %1398 }
 0x695   : > { %1699 = vadd.xlane.f32.xlu1 %v1698_v14 }
 0x699   : > { %v1691_v51 = vpop.xlane.xlu0 %1690 }
 0x69a   : > { %3198 = vrcp.f32 %v1691_v51 }
 0x69d   : > { %1410 = vadd.xlane.f32.xlu1 %v1409_v58 }
 0x6a0   : > { %v3199_v10 = vpop.eup %3198 }
 0x6a1   : > { %v1694_v30 = vpop.xlane.xlu0 %1693  ;;  %v1829_v15 = vmul.f32 %v3199_v10, %v4270_v13 }
 0x6a2   : > { %3200 = vrcp.f32 %v1694_v30 }
 0x6a5   : > { %1705 = vadd.xlane.f32.xlu1 %v1704_v35 }
 0x6a8   : > { %v3201_v52 = vpop.eup %3200 }
 0x6a9   : > { %v1830_v25 = vmul.f32 %v3201_v52, %v4274_v57  ;;  %v1408_v10 = vpop.xlane.xlu0 %1407  ;;  %v1102_v52 = vsel %vm1044_vm12, %v4034_v55, 0.0 }
 0x6ab   : > { %v3069_v4 = vpack.i.bf16 %v1830_v25, %v1829_v15 }
 0x6ad   : > { %3070 = vrot.lane.b32.xlu0 %v3069_v4, %s3495_s17  ;;  %1094 = vadd.xlane.f32.xlu1 %v1093_v9 }
 0x6b5   : > { %1419 = vadd.xlane.f32.xlu1 %v1418_v1  ;;  %v1941_v38 = vpop.xlane.xlu1 %1940 }
 0x6b6   : > { %v1959_v32 = vsub.f32 %v4298_v0, %v1941_v38 }
 0x6b8   : > { %v1969_v13 = vmul.f32 1.442695, %v1959_v32 }
 0x6ba   : > { %3202 = vpow2.f32 %v1969_v13 }
 0x6bd   : > { %v1944_v19 = vpop.xlane.xlu2 %1943 }
 0x6be   : > { %v1960_v57 = vsub.f32 %v4305_v54, %v1944_v19 }
 0x6c0   : > { %v1971_v16 = vmul.f32 1.442695, %v1960_v57  ;;  %v3203_v36 = vpop.eup %3202 }
 0x6c1   : > { %v2007_v17 = vpack.c.bf16 %v3203_v36, %v3203_v36 }
 0x6c2   : > { %3204 = vpow2.f32 %v1971_v16 }
 0x6c3   : > { %v2040_v5 = vunpack.c.l.b16 %v2007_v17  ;;  %v1987_v17 = vsel %vm1044_vm12, %v3203_v36, 0.0 }
 0x6c8   : > { %v4381_v49 = vpop.eup %3204 }
 0x6c9   : > { %v1947_v33 = vpop.xlane.xlu2 %1946  ;;  %v2008_v45 = vpack.c.bf16 %v4381_v49, %v4381_v49 }
 0x6ca   : > { %v1961_v50 = vsub.f32 %v4314_v6, %v1947_v33 }
 0x6cb   : > { %v2041_v14 = vunpack.c.l.b16 %v2008_v45 }
 0x6cc   : > { %v1973_v51 = vmul.f32 1.442695, %v1961_v50 }
 0x6cd   : > { %v2042_v0 = vpack.c.b16 %v2041_v14, %v2040_v5  ;;  %v2094_v58 = vpop.permute.xlu1 %2093 }
 0x6ce   : > { %2106 = vmatpush.bf16.msrb.mxu3 %v2094_v58  ;;  %3206 = vpow2.f32 %v1973_v51 }
 0x6cf   : > { %2891 = vmatmul.msk.bf16.vlgmr.msrb.gmra.mxu1 %vm1044_vm12, %v2042_v0 }
 0x6d1   : > { %v1950_v54 = vpop.xlane.xlu2 %1949 }
 0x6d2   : > { %v1962_v30 = vsub.f32 %v4321_v28, %v1950_v54  ;;  %v1984_v28 = vsel %vm1044_vm12, %v4333_v20, 0.0 }
 0x6d4   : > { %v1975_v35 = vmul.f32 1.442695, %v1962_v30  ;;  %v3207_v6 = vpop.eup %3206 }
 0x6d5   : > { %v2009_v25 = vpack.c.bf16 %v3207_v6, %v3207_v6  ;;  %v1993_v20 = vsel %vm1044_vm12, %v3207_v6, 0.0 }
 0x6d6   : > { %3208 = vpow2.f32 %v1975_v35 }
 0x6d7   : > { %1103 = vadd.xlane.f32.xlu0 %v1102_v52  ;;  %3210 = vrcp.f32 %v1408_v10  ;;  %v2065_v38 = vunpack.c.l.b16 %v2009_v25 }
 0x6d9   : > { %v1405_v15 = vpop.xlane.xlu2 %1404 }
 0x6da   : > { %3212 = vrcp.f32 %v1405_v15 }
 0x6dc   : > { %v4390_v4 = vpop.eup %3208 }
 0x6dd   : > { %v2010_v9 = vpack.c.bf16 %v4390_v4, %v4390_v4  ;;  %v3211_v1 = vpop.eup %3210 }
 0x6de   : > { %v1540_v57 = vmul.f32 %v3211_v1, %v4196_v8 }
 0x6df   : > { %v2066_v32 = vunpack.c.l.b16 %v2010_v9  ;;  %1985 = vadd.xlane.f32.xlu0 %v1984_v28 }
 0x6e0   : > { %v3213_v13 = vpop.eup %3212  ;;  %v1956_v33 = vpop.xlane.xlu0 %1955 }
 0x6e1   : > { %v2067_v55 = vpack.c.b16 %v2066_v32, %v2065_v38  ;;  %v1539_v19 = vmul.f32 %v3213_v13, %v4194_v39  ;;  %v1964_v45 = vsub.f32 %v4338_v63, %v1956_v33  ;;  %v1697_v58 = vpop.xlane.xlu2 %1696 }
 0x6e3   : > { %2892 = vmatmul.msk.bf16.vlgmr.msrb.gmra.mxu2 %vm1044_vm12, %v2067_v55  ;;  %v3074_v16 = vpack.i.bf16 %v1540_v57, %v1539_v19  ;;  %v1979_v50 = vmul.f32 1.442695, %v1964_v45  ;;  %v1981_v45 = vsel %vm1044_vm12, %v4327_v44, 0.0  ;;  %v1996_v44 = vsel %vm1044_vm12, %v4390_v4, 0.0 }
 0x6e5   : > { %3075 = vrot.lane.b32.xlu2 %v3074_v16, %s3496_s13  ;;  %3214 = vpow2.f32 %v1979_v50  ;;  %v1990_v50 = vsel %vm1044_vm12, %v4381_v49, 0.0 }
 0x6e7   : > { %1988 = vadd.xlane.f32.xlu0 %v1987_v17 }
 0x6e8   : > { %v1414_v9 = vpop.xlane.xlu0 %1413 }
 0x6eb   : > { %v4404_v14 = vpop.eup %3214 }
 0x6ec   : > { %v2012_v36 = vpack.c.bf16 %v4404_v14, %v4404_v14  ;;  %v2002_v4 = vsel %vm1044_vm12, %v4404_v14, 0.0  ;;  %v1111_v14 = vsel %vm1044_vm12, %v4045_v18, 0.0 }
 0x6ee   : > { %v2091_v35 = vunpack.c.l.b16 %v2012_v36 }
 0x6ef   : > { %1994 = vadd.xlane.f32.xlu0 %v1993_v20  ;;  %v1703_v20 = vpop.xlane.xlu2 %1702 }
 0x6f0   : > { %v1098_v17 = vpop.xlane.xlu0 %1097 }
 0x6f7   : > { %v4424_v33 = vpop.xlane.xlu2 %1416 }
 0x6f8   : > { %v1953_v5 = vpop.xlane.xlu1 %1952 }
 0x6f9   : > { %v1963_v39 = vsub.f32 %v4354_v56, %v1953_v5 }
 0x6fb   : > { %v1977_v8 = vmul.f32 1.442695, %v1963_v39 }
 0x6fd   : > { %3216 = vpow2.f32 %v1977_v8 }
 0x6fe   : > { %3218 = vrcp.f32 %v4377_v47 }
 0x700   : > { %v1402_v0 = vpop.xlane.xlu1 %1401 }
 0x701   : > { %3220 = vrcp.f32 %v1402_v0 }
 0x702   : > { %3222 = vrcp.f32 %v1697_v58 }
 0x703   : > { %v3217_v51 = vpop.eup %3216 }
 0x704   : > { %v2011_v54 = vpack.c.bf16 %v3217_v51, %v3217_v51  ;;  %v1999_v63 = vsel %vm1044_vm12, %v3217_v51, 0.0  ;;  %v3219_v30 = vpop.eup %3218 }
 0x705   : > { %2000 = vadd.xlane.f32.xlu0 %v1999_v63  ;;  %v1537_v47 = vmul.f32 %v3219_v30, %v4173_v31 }
 0x706   : > { %v2090_v56 = vunpack.c.l.b16 %v2011_v54 }
 0x707   : > { %v3221_v10 = vpop.eup %3220 }
 0x708   : > { %v2092_v52 = vpack.c.b16 %v2091_v35, %v2090_v56  ;;  %v1700_v6 = vpop.xlane.xlu1 %1699  ;;  %v1538_v15 = vmul.f32 %v3221_v10, %v4177_v43  ;;  %v3223_v1 = vpop.eup %3222 }
 0x709   : > { %3224 = vrcp.f32 %v1700_v6  ;;  %v1831_v32 = vmul.f32 %v3223_v1, %v4291_v37  ;;  %v1099_v37 = vsel %vm1044_vm12, %v4038_v60, 0.0  ;;  %v4434_v60 = vpop.xlane.xlu2 %1711 }
 0x70a   : > { %2893 = vmatmul.msk.bf16.vlgmr.msrb.gmra.mxu3 %vm1044_vm12, %v2092_v52  ;;  %v3064_v25 = vpack.i.bf16 %v1538_v15, %v1537_v47  ;;  %3226 = vrcp.f32 %v1414_v9  ;;  %v2033_v9 = vpop.f32.mrf.mxu0 }
 0x70c   : > { %3065 = vrot.lane.b32.xlu1 %v3064_v25, %s3496_s13 }
 0x70f   : > { %v3225_v28 = vpop.eup %3224 }
 0x710   : > { %v1411_v38 = vpop.xlane.xlu1 %1410  ;;  %v1832_v13 = vmul.f32 %v3225_v28, %v4295_v21  ;;  %v3227_v31 = vpop.eup %3226 }
 0x711   : > { %3228 = vrcp.f32 %v1411_v38  ;;  %v1542_v57 = vmul.f32 %v3227_v31, %v4202_v24  ;;  %v4422_v21 = vpop.xlane.xlu0 %1708 }
 0x712   : > { %v3079_v55 = vpack.i.bf16 %v1832_v13, %v1831_v32  ;;  %v2035_v13 = vpop.f32.mrf.mxu0 }
 0x714   : > { %3080 = vrot.lane.b32.xlu2 %v3079_v55, %s3495_s17 }
 0x717   : > { %v3229_v43 = vpop.eup %3228 }
 0x718   : > { %v1541_v19 = vmul.f32 %v3229_v43, %v4198_v40  ;;  %v1108_v40 = vsel %vm1044_vm12, %v4023_v59, 0.0  ;;  %v1706_v5 = vpop.xlane.xlu1 %1705 }
 0x719   : > { %3230 = vrcp.f32 %v1706_v5 }
 0x71a   : > { %v3094_v16 = vpack.i.bf16 %v1542_v57, %v1541_v19  ;;  %3232 = vrcp.f32 %v1703_v20 }
 0x71c   : > { %3095 = vrot.lane.b32.xlu0 %v3094_v16, %s3496_s13 }
 0x71f   : > { %v4430_v24 = vpop.permute.xlu0 %3070  ;;  %v3231_v8 = vpop.eup %3230 }
 0x720   : > { %v3233_v0 = vpop.eup %3232  ;;  %v1834_v58 = vmul.f32 %v3231_v8, %v4309_v26  ;;  %v4450_v35 = vpop.xlane.xlu1 %1094  ;;  %v3073_v52 = vunpack.i.h.bf16 %v4430_v24 }
 0x721   : > { %v1833_v54 = vmul.f32 %v3233_v0, %v4302_v12 }
 0x723   : > { %v3099_v30 = vpack.i.bf16 %v1834_v58, %v1833_v54  ;;  %v1114_v58 = vsel %vm1044_vm12, %v4049_v22, 0.0  ;;  %v2956_v54 = vld [vmem:[#allocation7] sm:$0xff] }
 0x728   : > { %v1420_v56 = vpop.xlane.xlu1 %1419 }
 0x736   : > { %1100 = vadd.xlane.f32.xlu1 %v1099_v37 }
 0x73d   : > { %1982 = vadd.xlane.f32.xlu2 %v1981_v45 }
 0x73e   : > { %1109 = vadd.xlane.f32.xlu1 %v1108_v40 }
 0x73f   : > { %v4438_v59 = vpop.permute.xlu2 %3075 }
 0x740   : > { %v3078_v51 = vunpack.i.h.bf16 %v4438_v59 }
 0x745   : > { %1991 = vadd.xlane.f32.xlu2 %v1990_v50 }
 0x74a   : > { %v1104_v39 = vpop.xlane.xlu0 %1103 }
 0x74b   : > { %3234 = vrcp.f32 %v1104_v39 }
 0x74c   : > { %3236 = vrcp.f32 %v1098_v17  ;;  %v2058_v38 = vpop.f32.mrf.mxu1 }
 0x74d   : > { %1997 = vadd.xlane.f32.xlu2 %v1996_v44 }
 0x751   : > { %v3235_v36 = vpop.eup %3234 }
 0x752   : > { %v1248_v49 = vmul.f32 %v3235_v36, %v4080_v62  ;;  %v3237_v10 = vpop.eup %3236  ;;  %v1986_v15 = vpop.xlane.xlu0 %1985 }
 0x753   : > { %v1246_v26 = vmul.f32 %v3237_v10, %v4059_v42  ;;  %3238 = vrcp.f32 %v1986_v15 }
 0x754   : > { %v4445_v63 = vsel %vm933_vm11, %v1248_v49, %v3078_v51  ;;  %v2060_v20 = vpop.f32.mrf.mxu1  ;;  %v1105_v51 = vsel %vm1044_vm12, %v4017_v23, 0.0  ;;  %v2957_v49 = vld [vmem:[#allocation7 + $0x8] sm:$0xff] }
 0x755   : > { %2003 = vadd.xlane.f32.xlu2 %v2002_v4  ;;  %2288 = vmatpush.bf16.msra.mxu0 %v2957_v49 }
 0x757   : > { %3100 = vrot.lane.b32.xlu1 %v3099_v30, %s3495_s17 }
 0x759   : > { %v3239_v28 = vpop.eup %3238  ;;  %2289 = vmatpush.bf16.msra.mxu0 %v2956_v54 }
 0x75a   : > { %v1989_v42 = vpop.xlane.xlu0 %1988  ;;  %v2122_v31 = vmul.f32 %v3239_v28, %v2035_v13 }
 0x762   : > { %v1995_v19 = vpop.xlane.xlu0 %1994 }
 0x766   : > { %v2083_v16 = vpop.f32.mrf.mxu2 }
 0x76e   : > { %v4463_v25 = vpop.permute.xlu2 %3080  ;;  %v2085_v44 = vpop.f32.mrf.mxu2 }
 0x77e   : > { %v4452_v62 = vpop.permute.xlu1 %3065 }
 0x77f   : > { %v3068_v12 = vunpack.i.h.bf16 %v4452_v62 }
 0x781   : > { %v2226_v6 = vsel %vm933_vm11, %v1246_v26, %v3068_v12  ;;  %1112 = vadd.xlane.f32.xlu1 %v1111_v14 }
 0x782   : > { %v4461_v47 = vsel %vm1044_vm12, %v2226_v6, %v3073_v52 }
 0x7a9   : > { %v1101_v6 = vpop.xlane.xlu1 %1100 }
 0x7b0   : > { %v1983_v1 = vpop.xlane.xlu2 %1982 }
 0x7b1   : > { %3240 = vrcp.f32 %v1983_v1 }
 0x7b2   : > { %3242 = vrcp.f32 %v1989_v42  ;;  %v3067_v42 = vunpack.i.l.bf16 %v4452_v62 }
 0x7b7   : > { %v3241_v32 = vpop.eup %3240 }
 0x7b8   : > { %v1992_v18 = vpop.xlane.xlu2 %1991  ;;  %v2121_v55 = vmul.f32 %v3241_v32, %v2033_v9  ;;  %v3243_v57 = vpop.eup %3242  ;;  %v3072_v32 = vunpack.i.l.bf16 %v4430_v24 }
 0x7b9   : > { %3244 = vrcp.f32 %v1992_v18  ;;  %v2123_v45 = vmul.f32 %v3243_v57, %v2058_v38  ;;  %v3077_v57 = vunpack.i.l.bf16 %v4438_v59 }
 0x7ba   : > { %v3084_v43 = vpack.i.bf16 %v2122_v31, %v2121_v55  ;;  %3246 = vrcp.f32 %v1995_v19 }
 0x7bc   : > { %3085 = vrot.lane.b32.xlu2 %v3084_v43, %s3497_s1 }
 0x7bf   : > { %v3245_v17 = vpop.eup %3244 }
 0x7c0   : > { %v1998_v37 = vpop.xlane.xlu2 %1997  ;;  %v2124_v40 = vmul.f32 %v3245_v17, %v2060_v20  ;;  %v3247_v5 = vpop.eup %3246  ;;  %v3082_v17 = vunpack.i.l.bf16 %v4463_v25 }
 0x7c1   : > { %3248 = vrcp.f32 %v1998_v37  ;;  %v2125_v8 = vmul.f32 %v3247_v5, %v2083_v16  ;;  %v3083_v16 = vunpack.i.h.bf16 %v4463_v25 }
 0x7c2   : > { %v3089_v50 = vpack.i.bf16 %v2124_v40, %v2123_v45  ;;  %3250 = vrcp.f32 %v1420_v56  ;;  %v2108_v56 = vpop.f32.mrf.mxu3 }
 0x7c3   : > { %3252 = vrcp.f32 %v4424_v33  ;;  %v2001_v33 = vpop.xlane.xlu0 %2000 }
 0x7c4   : > { %3090 = vrot.lane.b32.xlu2 %v3089_v50, %s3497_s1  ;;  %3254 = vrcp.f32 %v4422_v21 }
 0x7c5   : > { %3256 = vrcp.f32 %v4434_v60 }
 0x7c7   : > { %v3249_v39 = vpop.eup %3248 }
 0x7c8   : > { %v2126_v0 = vmul.f32 %v3249_v39, %v2085_v44  ;;  %v3251_v4 = vpop.eup %3250  ;;  %v2004_v12 = vpop.xlane.xlu2 %2003 }
 0x7c9   : > { %v3253_v30 = vpop.eup %3252  ;;  %v1544_v23 = vmul.f32 %v3251_v4, %v4210_v41  ;;  %3258 = vrcp.f32 %v2004_v12  ;;  %v1110_v39 = vpop.xlane.xlu1 %1109 }
 0x7ca   : > { %v3104_v36 = vpack.i.bf16 %v2126_v0, %v2125_v8  ;;  %v1543_v10 = vmul.f32 %v3253_v30, %v4206_v53  ;;  %v3255_v26 = vpop.eup %3254  ;;  %3260 = vrcp.f32 %v4450_v35  ;;  %v2110_v53 = vpop.f32.mrf.mxu3 }
 0x7cb   : > { %v3257_v22 = vpop.eup %3256  ;;  %v1835_v14 = vmul.f32 %v3255_v26, %v4311_v2  ;;  %3262 = vrcp.f32 %v2001_v33  ;;  %v3096_v5 = vpop.permute.xlu0 %3095 }
 0x7cc   : > { %3105 = vrot.lane.b32.xlu0 %v3104_v36, %s3497_s1  ;;  %v3109_v52 = vpack.i.bf16 %v1544_v23, %v1543_v10  ;;  %v1836_v21 = vmul.f32 %v3257_v22, %v4318_v46  ;;  %3264 = vrcp.f32 %v1101_v6  ;;  %v3098_v49 = vunpack.i.h.bf16 %v3096_v5 }
 0x7cd   : > { %3266 = vrcp.f32 %v1110_v39 }
 0x7ce   : > { %v3114_v60 = vpack.i.bf16 %v1836_v21, %v1835_v14 }
 0x7cf   : > { %v3259_v41 = vpop.eup %3258 }
 0x7d0   : > { %v3261_v15 = vpop.eup %3260  ;;  %v2128_v9 = vmul.f32 %v3259_v41, %v2110_v53 }
 0x7d1   : > { %v3263_v1 = vpop.eup %3262  ;;  %v1245_v2 = vmul.f32 %v3261_v15, %v4056_v34  ;;  %v3101_v0 = vpop.permute.xlu1 %3100 }
 0x7d2   : > { %v2127_v28 = vmul.f32 %v3263_v1, %v2108_v56  ;;  %v3265_v35 = vpop.eup %3264  ;;  %v3102_v23 = vunpack.i.l.bf16 %v3101_v0 }
 0x7d3   : > { %v2225_v46 = vsel %vm933_vm11, %v1245_v2, %v3067_v42  ;;  %v1247_v43 = vmul.f32 %v3265_v35, %v4076_v27  ;;  %v2236_v27 = vsel %vm1044_vm12, %v4445_v63, %v3083_v16  ;;  %v3267_v8 = vpop.eup %3266  ;;  %v4791_v16 = vld [vmem:[#allocation18_spill] sm:$0xff] }
 0x7d4   : > { %v3119_v38 = vpack.i.bf16 %v2128_v9, %v2127_v28  ;;  %v2233_v31 = vsel %vm1044_vm12, %v2225_v46, %v3072_v32  ;;  %v1250_v36 = vmul.f32 %v3267_v8, %v4078_v61 }
 0x7d5   : > { %v2227_v24 = vsel %vm933_vm11, %v1247_v43, %v3077_v57 }
 0x7d6   : > { %v2235_v40 = vsel %vm1044_vm12, %v2227_v24, %v3082_v17  ;;  %v2230_v26 = vsel %vm933_vm11, %v1250_v36, %v3098_v49 }
 0x7ed   : > { %1106 = vadd.xlane.f32.xlu2 %v1105_v51  ;;  %v3103_v51 = vunpack.i.h.bf16 %v3101_v0 }
 0x7ef   : > { %v2238_v22 = vsel %vm1044_vm12, %v2230_v26, %v3103_v51 }
 0x7f4   : > { %v1113_v56 = vpop.xlane.xlu1 %1112 }
 0x7f6   : > { %1115 = vadd.xlane.f32.xlu0 %v1114_v58  ;;  %v3097_v58 = vunpack.i.l.bf16 %v3096_v5 }
 0x805   : > { %3110 = vrot.lane.b32.xlu2 %v3109_v52, %s3496_s13 }
 0x80d   : > { %3115 = vrot.lane.b32.xlu2 %v3114_v60, %s3495_s17 }
 0x815   : > { %3120 = vrot.lane.b32.xlu2 %v3119_v38, %s3497_s1  ;;  %s4682_s1 = scalar_lea.vmem [#allocation10], %s2805_s23  ;;  %s2965_s23 = sshll.u32 %s3586_s25, 5 }
 0x816   : > { %v3086_v13 = vpop.permute.xlu2 %3085  ;;  %s2688_s19 = scalar_lea.hbm %s4752_s12, %s2965_s23  ;;  %s2689_s27 = sshll.u32 %s4682_s1, 4  ;;  %s2690_s27 = int_to_ptr.vmem [resolvable:$true] %s2689_s27 }
 0x817   : > { %v3088_v18 = vunpack.i.h.bf16 %v3086_v13  ;;  %v3087_v55 = vunpack.i.l.bf16 %v3086_v13  ;;  %s2691_s14 = sshll.u32 %s2688_s19, 4  ;;  %s2692_s14 = int_to_ptr.hbm [resolvable:$true] %s2691_s14 }
 0x818   : > { %s3424_s25 = sshra.s32 %s2692_s14, 4  ;;  %s3425_s25 = int_to_ptr.hbm [resolvable:$true] %s3424_s25 }
 0x819   : > { %v2242_v62 = vsel %vm2241_vm13, %v2233_v31, %v3087_v55  ;;  %v2243_v34 = vsel %vm2241_vm13, %v4461_v47, %v3088_v18  ;;  %s3426_s29 = scalar_lea.hbm %s3425_s25, 32  ;;  %p3431_p7 = scmp.lt.s32.totalorder %s3425_s25, %s4752_s12 }
 0x81a   : > { %v2250_v19 = vpack.c.bf16 %v2243_v34, %v2242_v62  ;;  %p3427_p1 = scmp.ne.s32.totalorder %s3425_s25, %s3426_s29  ;;  %p3432_p2 = scmp.lt.s32.totalorder %s3430_s18, %s3426_s29 }
 0x81c   : > { %2902 = vmatmul.msk.bf16.vlgmr.msra.gmra.mxu0 %vm508_vm0, %v2250_v19  ;;  %p3428_p4 = pnand %p3427_p1, %p3655_p0  ;;  %p3433_p9 = por %p3432_p2, %p3431_p7 }
 0x81e   : > { %v3091_v20 = vpop.permute.xlu2 %3090  ;;  %p3429_p8 = pneg %p3428_p4 }
 0x81f   : > { %v3093_v37 = vunpack.i.h.bf16 %v3091_v20  ;;  %v3092_v45 = vunpack.i.l.bf16 %v3091_v20  ;;  %v4792_v20 = vld [vmem:[#allocation19_spill] sm:$0xff] }
 0x820   : > { %p3434_p10 = pnand %p3433_p9, %p3429_p8 }
 0x821   : > { %v2244_v47 = vsel %vm2241_vm13, %v2235_v40, %v3092_v45  ;;  %v2245_v59 = vsel %vm2241_vm13, %v2236_v27, %v3093_v37  ;;  %v4793_v27 = vld [vmem:[#allocation21_spill] sm:$0xff] }
 0x822   : > { %v2251_v50 = vpack.c.bf16 %v2245_v59, %v2244_v47 }
 0x82c   : > { %2903 = vmatmul.msk.bf16.gmra.mxu0 %vm508_vm0, %v2251_v50  ;;  %v4794_v50 = vld [vmem:[#allocation20_spill] sm:$0xff] }
 0x83e   : > { %v3106_v25 = vpop.permute.xlu0 %3105 }
 0x83f   : > { %v3108_v54 = vunpack.i.h.bf16 %v3106_v25  ;;  %v3107_v12 = vunpack.i.l.bf16 %v3106_v25  ;;  %v4795_v25 = vld [vmem:[#allocation23_spill] sm:$0xff] }
 0x841   : > { %v2247_v33 = vsel %vm2241_vm13, %v2238_v22, %v3108_v54  ;;  %v4796_v54 = vld [vmem:[#allocation24_spill] sm:$0xff] }
 0x860   : > { %v1107_v44 = vpop.xlane.xlu2 %1106 }
 0x861   : > { %3268 = vrcp.f32 %v1107_v44 }
 0x867   : > { %v3269_v63 = vpop.eup %3268 }
 0x868   : > { %v1249_v4 = vmul.f32 %v3269_v63, %v4074_v48  ;;  %v3111_v30 = vpop.permute.xlu2 %3110 }
 0x869   : > { %v1116_v10 = vpop.xlane.xlu0 %1115  ;;  %v3113_v53 = vunpack.i.h.bf16 %v3111_v30  ;;  %v3112_v15 = vunpack.i.l.bf16 %v3111_v30 }
 0x86a   : > { %v2229_v52 = vsel %vm933_vm11, %v1249_v4, %v3097_v58  ;;  %3270 = vrcp.f32 %v1116_v10 }
 0x86b   : > { %v2237_v61 = vsel %vm1044_vm12, %v2229_v52, %v3102_v23  ;;  %3272 = vrcp.f32 %v1113_v56  ;;  %v4797_v56 = vld [vmem:[#allocation22_spill] sm:$0xff] }
 0x86c   : > { %v2246_v14 = vsel %vm2241_vm13, %v2237_v61, %v3107_v12 }
 0x86d   : > { %v2252_v21 = vpack.c.bf16 %v2247_v33, %v2246_v14 }
 0x86f   : > { %2904 = vmatmul.msk.bf16.gmra.mxu0 %vm508_vm0, %v2252_v21 }
 0x870   : > { %v3271_v48 = vpop.eup %3270  ;;  %v3116_v60 = vpop.permute.xlu2 %3115 }
 0x871   : > { %v1252_v41 = vmul.f32 %v3271_v48, %v4094_v29  ;;  %v3273_v6 = vpop.eup %3272  ;;  %v3118_v9 = vunpack.i.h.bf16 %v3116_v60  ;;  %v3117_v1 = vunpack.i.l.bf16 %v3116_v60 }
 0x872   : > { %v1251_v42 = vmul.f32 %v3273_v6, %v4087_v11 }
 0x873   : > { %v2232_v28 = vsel %vm933_vm11, %v1252_v41, %v3113_v53 }
 0x874   : > { %v2231_v38 = vsel %vm933_vm11, %v1251_v42, %v3112_v15  ;;  %v2240_v13 = vsel %vm1044_vm12, %v2232_v28, %v3118_v9 }
 0x875   : > { %v2239_v32 = vsel %vm1044_vm12, %v2231_v38, %v3117_v1 }
 0x878   : > { %v3121_v2 = vpop.permute.xlu2 %3120 }
 0x879   : > { %v3123_v46 = vunpack.i.h.bf16 %v3121_v2  ;;  %v3122_v35 = vunpack.i.l.bf16 %v3121_v2 }
 0x87b   : > { %v2248_v29 = vsel %vm2241_vm13, %v2239_v32, %v3122_v35  ;;  %v2249_v18 = vsel %vm2241_vm13, %v2240_v13, %v3123_v46 }
 0x87c   : > { %v2253_v55 = vpack.c.bf16 %v2249_v18, %v2248_v29 }
 0x87f   : > { %2905 = vmatmul.msk.bf16.gmra.mxu0 %vm508_vm0, %v2253_v55  ;;  %v2959_v55 = vld [vmem:[#allocation8 + $0x8] sm:$0xff] }
 0x880   : > { %2549 = vmatpush.bf16.msra.mxu1 %v2959_v55 }
 0x899   : > { %v2291_v31 = vpop.f32.mrf.mxu0 }
 0x89a   : > { %v4522_v11 = vadd.f32 %v2291_v31, %v3709_v3 }
 0x89c   : > { %v2313_v43 = vsel %vm508_vm0, %v4522_v11, 0.0 }
 0x89d   : > { %2314 = vadd.xlane.f32.xlu1 %v2313_v43  ;;  %v2958_v43 = vld [vmem:[#allocation8] sm:$0xff] }
 0x89e   : > { %2550 = vmatpush.bf16.msra.mxu1 %v2958_v43 }
 0x8a1   : > { %v2293_v62 = vpop.f32.mrf.mxu0 }
 0x8a2   : > { %v4527_v34 = vadd.f32 %v2293_v62, %v3717_v7 }
 0x8a4   : > { %v2316_v19 = vsel %vm508_vm0, %v4527_v34, 0.0 }
 0x8a5   : > { %2317 = vadd.xlane.f32.xlu2 %v2316_v19 }
 0x8a9   : > { %v2296_v57 = vpop.f32.mrf.mxu0 }
 0x8aa   : > { %v4532_v24 = vadd.f32 %v2296_v57, %v4791_v16 }
 0x8ac   : > { %v2319_v3 = vsel %vm508_vm0, %v4532_v24, 0.0 }
 0x8ad   : > { %2320 = vadd.xlane.f32.xlu0 %v2319_v3 }
 0x8b1   : > { %v2298_v17 = vpop.f32.mrf.mxu0 }
 0x8b2   : > { %v4537_v37 = vadd.f32 %v2298_v17, %v4792_v20 }
 0x8b4   : > { %v2322_v7 = vsel %vm508_vm0, %v4537_v37, 0.0 }
 0x8b5   : > { %2323 = vadd.xlane.f32.xlu1 %v2322_v7 }
 0x8ec   : > { %v2301_v45 = vpop.f32.mrf.mxu0 }
 0x8ed   : > { %v4542_v40 = vadd.f32 %v2301_v45, %v4793_v27 }
 0x8ef   : > { %v2325_v47 = vsel %vm508_vm0, %v4542_v40, 0.0 }
 0x8f0   : > { %2326 = vadd.xlane.f32.xlu0 %v2325_v47 }
 0x8f4   : > { %v2303_v59 = vpop.f32.mrf.mxu0 }
 0x8f5   : > { %v4547_v5 = vadd.f32 %v2303_v59, %v4794_v50 }
 0x8f7   : > { %v2328_v39 = vsel %vm508_vm0, %v4547_v5, 0.0 }
 0x8f8   : > { %2329 = vadd.xlane.f32.xlu1 %v2328_v39 }
 0x8fc   : > { %v2306_v63 = vpop.f32.mrf.mxu0 }
 0x8fd   : > { %v4560_v4 = vadd.f32 %v2306_v63, %v4796_v54 }
 0x8ff   : > { %v2331_v26 = vsel %vm508_vm0, %v4560_v4, 0.0 }
 0x904   : > { %v2308_v12 = vpop.f32.mrf.mxu0 }
 0x905   : > { %v4572_v61 = vadd.f32 %v2308_v12, %v4797_v56 }
 0x907   : > { %v2334_v21 = vsel %vm508_vm0, %v4572_v61, 0.0 }
 0x910   : > { %v2315_v44 = vpop.xlane.xlu1 %2314 }
 0x911   : > { %v2337_v8 = vmul.f32 %v2315_v44, %v4795_v25 }
 0x913   : > { %v4553_v0 = vsub.f32 %v4522_v11, %v2337_v8 }
 0x915   : > { %v2353_v36 = vmul.f32 %v4553_v0, %v4553_v0 }
 0x917   : > { %v2361_v51 = vsel %vm508_vm0, %v2353_v36, 0.0 }
 0x918   : > { %v2318_v49 = vpop.xlane.xlu2 %2317  ;;  %2362 = vadd.xlane.f32.xlu0 %v2361_v51 }
 0x919   : > { %v2338_v58 = vmul.f32 %v2318_v49, %v4795_v25 }
 0x91b   : > { %v4563_v30 = vsub.f32 %v4527_v34, %v2338_v58 }
 0x91d   : > { %v2354_v23 = vmul.f32 %v4563_v30, %v4563_v30 }
 0x91f   : > { %v2364_v10 = vsel %vm508_vm0, %v2354_v23, 0.0 }
 0x920   : > { %v2321_v52 = vpop.xlane.xlu0 %2320  ;;  %2365 = vadd.xlane.f32.xlu1 %v2364_v10  ;;  %2332 = vadd.xlane.f32.xlu0 %v2331_v26 }
 0x921   : > { %v2339_v22 = vmul.f32 %v2321_v52, %v4795_v25 }
 0x923   : > { %v4575_v33 = vsub.f32 %v4532_v24, %v2339_v22 }
 0x925   : > { %v2355_v14 = vmul.f32 %v4575_v33, %v4575_v33 }
 0x927   : > { %v2367_v48 = vsel %vm508_vm0, %v2355_v14, 0.0 }
 0x928   : > { %2335 = vadd.xlane.f32.xlu1 %v2334_v21  ;;  %2368 = vadd.xlane.f32.xlu0 %v2367_v48  ;;  %v2324_v60 = vpop.xlane.xlu1 %2323  ;;  %v4624_v48 = vld [vmem:[%s4748_s8] ss:$0 sm:$0xff] }
 0x929   : > { %v2340_v41 = vmul.f32 %v2324_v60, %v4795_v25 }
 0x92b   : > { %v4584_v6 = vsub.f32 %v4537_v37, %v2340_v41 }
 0x92d   : > { %v2356_v53 = vmul.f32 %v4584_v6, %v4584_v6 }
 0x92f   : > { %v2370_v15 = vsel %vm508_vm0, %v2356_v53, 0.0 }
 0x930   : > { %2371 = vadd.xlane.f32.xlu1 %v2370_v15 }
 0x963   : > { %v2327_v9 = vpop.xlane.xlu0 %2326 }
 0x964   : > { %v2341_v1 = vmul.f32 %v2327_v9, %v4795_v25 }
 0x966   : > { %v4591_v42 = vsub.f32 %v4542_v40, %v2341_v1 }
 0x968   : > { %v2357_v28 = vmul.f32 %v4591_v42, %v4591_v42 }
 0x96a   : > { %v2373_v2 = vsel %vm508_vm0, %v2357_v28, 0.0  ;;  %v4630_v28 = vld [vmem:[%s4749_s9] ss:$0 sm:$0xff] }
 0x96b   : > { %2374 = vadd.xlane.f32.xlu2 %v2373_v2  ;;  %v2330_v38 = vpop.xlane.xlu1 %2329 }
 0x96c   : > { %v2342_v46 = vmul.f32 %v2330_v38, %v4795_v25 }
 0x96e   : > { %v4598_v35 = vsub.f32 %v4547_v5, %v2342_v46 }
 0x970   : > { %v2358_v32 = vmul.f32 %v4598_v35, %v4598_v35 }
 0x972   : > { %v2376_v13 = vsel %vm508_vm0, %v2358_v32, 0.0 }
 0x973   : > { %2377 = vadd.xlane.f32.xlu0 %v2376_v13 }
 0x98b   : > { %v2363_v29 = vpop.xlane.xlu0 %2362 }
 0x98c   : > { %v2385_v18 = vmul.f32 %v2363_v29, %v4795_v25 }
 0x98e   : > { %v2393_v31 = vadd.f32 1e-05, %v2385_v18 }
 0x990   : > { %3274 = vrsqrt.f32 %v2393_v31  ;;  %vm2407_vm15 = vweird.f32 %v2393_v31 }
 0x993   : > { %v2333_v62 = vpop.xlane.xlu0 %2332  ;;  %v2366_v19 = vpop.xlane.xlu1 %2365 }
 0x994   : > { %v2343_v57 = vmul.f32 %v2333_v62, %v4795_v25  ;;  %v2386_v16 = vmul.f32 %v2366_v19, %v4795_v25 }
 0x996   : > { %v3275_v3 = vpop.eup %3274  ;;  %v4607_v17 = vsub.f32 %v4560_v4, %v2343_v57  ;;  %v2394_v20 = vadd.f32 1e-05, %v2386_v16 }
 0x997   : > { %v2402_v7 = vmul.f32 %v3275_v3, %v2393_v31  ;;  %vm2408_vm14 = vweird.f32 %v3275_v3 }
 0x998   : > { %3276 = vrsqrt.f32 %v2394_v20  ;;  %v2359_v45 = vmul.f32 %v4607_v17, %v4607_v17  ;;  %vm2409_vm1 = vmor %vm2407_vm15, %vm2408_vm14  ;;  %vm2417_vm3 = vweird.f32 %v2394_v20 }
 0x999   : > { %v2403_v27 = vmul.f32 %v3275_v3, %v2402_v7 }
 0x99a   : > { %v2379_v47 = vsel %vm508_vm0, %v2359_v45, 0.0 }
 0x99b   : > { %v2404_v59 = vmul.f32 0.5, %v2403_v27  ;;  %v2369_v50 = vpop.xlane.xlu0 %2368  ;;  %2380 = vadd.xlane.f32.xlu1 %v2379_v47  ;;  %v2336_v39 = vpop.xlane.xlu1 %2335 }
 0x99c   : > { %v2387_v44 = vmul.f32 %v2369_v50, %v4795_v25  ;;  %v2344_v8 = vmul.f32 %v2336_v39, %v4795_v25 }
 0x99d   : > { %v2405_v36 = vsub.f32 1.5, %v2404_v59 }
 0x99e   : > { %v3277_v63 = vpop.eup %3276  ;;  %v2395_v51 = vadd.f32 1e-05, %v2387_v44  ;;  %v4615_v49 = vsub.f32 %v4572_v61, %v2344_v8 }
 0x99f   : > { %v2406_v58 = vmul.f32 %v3275_v3, %v2405_v36  ;;  %v2412_v54 = vmul.f32 %v3277_v63, %v2394_v20  ;;  %vm2418_vm2 = vweird.f32 %v3277_v63 }
 0x9a0   : > { %3278 = vrsqrt.f32 %v2395_v51  ;;  %v2360_v23 = vmul.f32 %v4615_v49, %v4615_v49  ;;  %vm2419_vm4 = vmor %vm2417_vm3, %vm2418_vm2  ;;  %vm2427_vm6 = vweird.f32 %v2395_v51 }
 0x9a1   : > { %v2413_v10 = vmul.f32 %v3277_v63, %v2412_v54  ;;  %v2410_v12 = vsel %vm2409_vm1, %v3275_v3, %v2406_v58 }
 0x9a2   : > { %v2382_v26 = vsel %vm508_vm0, %v2360_v23, 0.0  ;;  %v2481_v60 = vmul.f32 %v2410_v12, %v4553_v0 }
 0x9a3   : > { %v2414_v52 = vmul.f32 0.5, %v2413_v10  ;;  %2383 = vadd.xlane.f32.xlu2 %v2382_v26  ;;  %v2372_v22 = vpop.xlane.xlu1 %2371 }
 0x9a4   : > { %v2388_v56 = vmul.f32 %v2372_v22, %v4795_v25  ;;  %v2492_v2 = vmul.f32 %v4624_v48, %v2481_v60 }
 0x9a5   : > { %v2415_v14 = vsub.f32 1.5, %v2414_v52 }
 0x9a6   : > { %v3279_v21 = vpop.eup %3278  ;;  %v2396_v41 = vadd.f32 1e-05, %v2388_v56  ;;  %v2503_v29 = vadd.f32 %v4630_v28, %v2492_v2 }
 0x9a7   : > { %v2416_v53 = vmul.f32 %v3277_v63, %v2415_v14  ;;  %v2422_v15 = vmul.f32 %v3279_v21, %v2395_v51  ;;  %vm2428_vm5 = vweird.f32 %v3279_v21 }
 0x9a8   : > { %3280 = vrsqrt.f32 %v2396_v41  ;;  %vm2429_vm7 = vmor %vm2427_vm6, %vm2428_vm5  ;;  %vm2437_vm9 = vweird.f32 %v2396_v41 }
 0x9a9   : > { %v2420_v9 = vsel %vm2419_vm4, %v3277_v63, %v2416_v53  ;;  %v2423_v1 = vmul.f32 %v3279_v21, %v2422_v15 }
 0x9aa   : > { %v2482_v38 = vmul.f32 %v2420_v9, %v4563_v30 }
 0x9ab   : > { %v2424_v46 = vmul.f32 0.5, %v2423_v1 }
 0x9ac   : > { %v2493_v0 = vmul.f32 %v4624_v48, %v2482_v38 }
 0x9ad   : > { %v2425_v32 = vsub.f32 1.5, %v2424_v46 }
 0x9ae   : > { %v3281_v13 = vpop.eup %3280  ;;  %v2504_v18 = vadd.f32 %v4630_v28, %v2493_v0 }
 0x9af   : > { %v2426_v55 = vmul.f32 %v3279_v21, %v2425_v32  ;;  %v2432_v31 = vmul.f32 %v3281_v13, %v2396_v41  ;;  %vm2438_vm8 = vweird.f32 %v3281_v13 }
 0x9b0   : > { %v2511_v43 = vpack.c.bf16 %v2504_v18, %v2503_v29  ;;  %vm2439_vm10 = vmor %vm2437_vm9, %vm2438_vm8  ;;  %vm2616_vm8 = vcmask 523264  }
 0x9b1   : > { %v2433_v62 = vmul.f32 %v3281_v13, %v2432_v31  ;;  %v2430_v19 = vsel %vm2429_vm7, %v3279_v21, %v2426_v55 }
 0x9b2   : > { %2914 = vmatmul.msk.bf16.vlgmr.msra.gmra.mxu1 %vm508_vm0, %v2511_v43  ;;  %v2483_v16 = vmul.f32 %v2430_v19, %v4575_v33 }
 0x9b3   : > { %v2434_v30 = vmul.f32 0.5, %v2433_v62  ;;  %v2960_v62 = vld [vmem:[%s4751_s11] sm:$0xff] }
 0x9b4   : > { %v2494_v45 = vmul.f32 %v4624_v48, %v2483_v16 }
 0x9b5   : > { %v2435_v57 = vsub.f32 1.5, %v2434_v30 }
 0x9b6   : > { %v2505_v47 = vadd.f32 %v4630_v28, %v2494_v45 }
 0x9b7   : > { %v2436_v3 = vmul.f32 %v3281_v13, %v2435_v57 }
 0x9b9   : > { %v2440_v20 = vsel %vm2439_vm10, %v3281_v13, %v2436_v3  ;;  %v2961_v13 = vld [vmem:[%s4751_s11 + $0x8] sm:$0xff] }
 0x9ba   : > { %v2484_v7 = vmul.f32 %v2440_v20, %v4584_v6 }
 0x9bc   : > { %v2495_v27 = vmul.f32 %v4624_v48, %v2484_v7 }
 0x9be   : > { %v2506_v59 = vadd.f32 %v4630_v28, %v2495_v27 }
 0x9c0   : > { %v2512_v50 = vpack.c.bf16 %v2506_v59, %v2505_v47 }
 0x9c2   : > { %2915 = vmatmul.msk.bf16.gmra.mxu1 %vm508_vm0, %v2512_v50 }
 0x9de   : > { %v2375_v39 = vpop.xlane.xlu2 %2374 }
 0x9df   : > { %v2389_v33 = vmul.f32 %v2375_v39, %v4795_v25 }
 0x9e1   : > { %v2397_v44 = vadd.f32 1e-05, %v2389_v33 }
 0x9e3   : > { %3282 = vrsqrt.f32 %v2397_v44  ;;  %vm2447_vm12 = vweird.f32 %v2397_v44 }
 0x9e6   : > { %v2378_v8 = vpop.xlane.xlu0 %2377 }
 0x9e7   : > { %v2390_v36 = vmul.f32 %v2378_v8, %v4795_v25 }
 0x9e9   : > { %v3283_v6 = vpop.eup %3282  ;;  %v2398_v63 = vadd.f32 1e-05, %v2390_v36 }
 0x9ea   : > { %v2442_v51 = vmul.f32 %v3283_v6, %v2397_v44  ;;  %vm2448_vm11 = vweird.f32 %v3283_v6 }
 0x9eb   : > { %3284 = vrsqrt.f32 %v2398_v63  ;;  %vm2449_vm13 = vmor %vm2447_vm12, %vm2448_vm11  ;;  %vm2457_vm15 = vweird.f32 %v2398_v63 }
 0x9ec   : > { %v2443_v58 = vmul.f32 %v3283_v6, %v2442_v51 }
 0x9ee   : > { %v2444_v54 = vmul.f32 0.5, %v2443_v58 }
 0x9f0   : > { %v2445_v23 = vsub.f32 1.5, %v2444_v54 }
 0x9f1   : > { %v3285_v10 = vpop.eup %3284 }
 0x9f2   : > { %v2446_v26 = vmul.f32 %v3283_v6, %v2445_v23  ;;  %v2452_v12 = vmul.f32 %v3285_v10, %v2398_v63  ;;  %vm2458_vm14 = vweird.f32 %v3285_v10 }
 0x9f3   : > { %vm2459_vm1 = vmor %vm2457_vm15, %vm2458_vm14 }
 0x9f4   : > { %v2453_v52 = vmul.f32 %v3285_v10, %v2452_v12  ;;  %v2450_v22 = vsel %vm2449_vm13, %v3283_v6, %v2446_v26 }
 0x9f5   : > { %v2485_v21 = vmul.f32 %v2450_v22, %v4591_v42  ;;  %v2963_v42 = vld [vmem:[%s4751_s11 + $0x18] sm:$0xff] }
 0x9f6   : > { %v2454_v56 = vmul.f32 0.5, %v2453_v52  ;;  %2633 = vmatpush.bf16.msra.mxu2 %v2963_v42 }
 0x9f7   : > { %v2496_v15 = vmul.f32 %v4624_v48, %v2485_v21 }
 0x9f8   : > { %v2455_v14 = vsub.f32 1.5, %v2454_v56 }
 0x9f9   : > { %v2507_v1 = vadd.f32 %v4630_v28, %v2496_v15 }
 0x9fa   : > { %v2456_v60 = vmul.f32 %v3285_v10, %v2455_v14 }
 0x9fc   : > { %v2460_v41 = vsel %vm2459_vm1, %v3285_v10, %v2456_v60 }
 0x9fd   : > { %v2486_v53 = vmul.f32 %v2460_v41, %v4598_v35  ;;  %v2962_v35 = vld [vmem:[%s4751_s11 + $0x10] sm:$0xff] }
 0x9fe   : > { %2634 = vmatpush.bf16.msra.mxu2 %v2962_v35 }
 0x9ff   : > { %v2497_v9 = vmul.f32 %v4624_v48, %v2486_v53 }
 0xa01   : > { %v2508_v2 = vadd.f32 %v4630_v28, %v2497_v9 }
 0xa02   : > { %2635 = vmatpush.bf16.msra.mxu2 %v2961_v13 }
 0xa03   : > { %v2513_v38 = vpack.c.bf16 %v2508_v2, %v2507_v1 }
 0xa05   : > { %2916 = vmatmul.msk.bf16.gmra.mxu1 %vm508_vm0, %v2513_v38 }
 0xa06   : > { %2636 = vmatpush.bf16.msra.mxu2 %v2960_v62 }
 0xa0e   : > { %v2381_v46 = vpop.xlane.xlu1 %2380 }
 0xa0f   : > { %v2391_v0 = vmul.f32 %v2381_v46, %v4795_v25 }
 0xa11   : > { %v2399_v32 = vadd.f32 1e-05, %v2391_v0 }
 0xa13   : > { %3286 = vrsqrt.f32 %v2399_v32  ;;  %vm2467_vm3 = vweird.f32 %v2399_v32 }
 0xa16   : > { %v2384_v29 = vpop.xlane.xlu2 %2383 }
 0xa17   : > { %v2392_v18 = vmul.f32 %v2384_v29, %v4795_v25 }
 0xa19   : > { %v3287_v55 = vpop.eup %3286  ;;  %v2400_v31 = vadd.f32 1e-05, %v2392_v18 }
 0xa1a   : > { %v2462_v43 = vmul.f32 %v3287_v55, %v2399_v32  ;;  %vm2468_vm2 = vweird.f32 %v3287_v55 }
 0xa1b   : > { %3288 = vrsqrt.f32 %v2400_v31  ;;  %vm2469_vm4 = vmor %vm2467_vm3, %vm2468_vm2  ;;  %vm2477_vm6 = vweird.f32 %v2400_v31 }
 0xa1c   : > { %v2463_v19 = vmul.f32 %v3287_v55, %v2462_v43 }
 0xa1e   : > { %v2464_v30 = vmul.f32 0.5, %v2463_v19 }
 0xa20   : > { %v2465_v57 = vsub.f32 1.5, %v2464_v30 }
 0xa21   : > { %v3289_v16 = vpop.eup %3288 }
 0xa22   : > { %v2466_v3 = vmul.f32 %v3287_v55, %v2465_v57  ;;  %v2472_v20 = vmul.f32 %v3289_v16, %v2400_v31  ;;  %vm2478_vm5 = vweird.f32 %v3289_v16 }
 0xa23   : > { %vm2479_vm7 = vmor %vm2477_vm6, %vm2478_vm5 }
 0xa24   : > { %v2473_v7 = vmul.f32 %v3289_v16, %v2472_v20  ;;  %v2470_v25 = vsel %vm2469_vm4, %v3287_v55, %v2466_v3 }
 0xa25   : > { %v2487_v47 = vmul.f32 %v2470_v25, %v4607_v17 }
 0xa26   : > { %v2474_v45 = vmul.f32 0.5, %v2473_v7 }
 0xa27   : > { %v2498_v33 = vmul.f32 %v4624_v48, %v2487_v47 }
 0xa28   : > { %v2475_v27 = vsub.f32 1.5, %v2474_v45 }
 0xa29   : > { %v2509_v36 = vadd.f32 %v4630_v28, %v2498_v33 }
 0xa2a   : > { %v2476_v59 = vmul.f32 %v3289_v16, %v2475_v27 }
 0xa2c   : > { %v2480_v50 = vsel %vm2479_vm7, %v3289_v16, %v2476_v59 }
 0xa2d   : > { %v2488_v39 = vmul.f32 %v2480_v50, %v4615_v49 }
 0xa2f   : > { %v2552_v44 = vpop.f32.mrf.mxu1  ;;  %v2499_v8 = vmul.f32 %v4624_v48, %v2488_v39 }
 0xa30   : > { %v2572_v17 = vmax.f32 %v2552_v44, 0.0 }
 0xa31   : > { %v2510_v6 = vadd.f32 %v4630_v28, %v2499_v8 }
 0xa33   : > { %v2514_v63 = vpack.c.bf16 %v2510_v6, %v2509_v36 }
 0xa35   : > { %2917 = vmatmul.msk.bf16.gmra.mxu1 %vm508_vm0, %v2514_v63  ;;  %vm2666_vm0 = vcmask 257024  }
 0xa37   : > { %v2554_v51 = vpop.f32.mrf.mxu1 }
 0xa38   : > { %v2573_v58 = vmax.f32 %v2554_v51, 0.0 }
 0xa3a   : > { %v2580_v54 = vpack.c.bf16 %v2573_v58, %v2572_v17 }
 0xa3c   : > { %2934 = vmatmul.msk.bf16.vlgmr.msra.gmra.mxu2 %vm2616_vm8, %v2580_v54 }
 0xa3f   : > { %v2557_v49 = vpop.f32.mrf.mxu1 }
 0xa40   : > { %v2574_v10 = vmax.f32 %v2557_v49, 0.0 }
 0xa47   : > { %v2559_v23 = vpop.f32.mrf.mxu1 }
 0xa48   : > { %v2575_v26 = vmax.f32 %v2559_v23, 0.0 }
 0xa4a   : > { %v2581_v12 = vpack.c.bf16 %v2575_v26, %v2574_v10 }
 0xa4c   : > { %2935 = vmatmul.msk.bf16.gmra.mxu2 %vm2616_vm8, %v2581_v12 }
 0xa82   : > { %v2562_v48 = vpop.f32.mrf.mxu1 }
 0xa83   : > { %v2576_v52 = vmax.f32 %v2562_v48, 0.0 }
 0xa8a   : > { %v2564_v28 = vpop.f32.mrf.mxu1 }
 0xa8b   : > { %v2577_v22 = vmax.f32 %v2564_v28, 0.0 }
 0xa8d   : > { %v2582_v56 = vpack.c.bf16 %v2577_v22, %v2576_v52 }
 0xa8f   : > { %2936 = vmatmul.msk.bf16.gmra.mxu2 %vm2616_vm8, %v2582_v56 }
 0xab2   : > { %v2567_v14 = vpop.f32.mrf.mxu1 }
 0xab3   : > { %v2578_v60 = vmax.f32 %v2567_v14, 0.0 }
 0xaba   : > { %v2569_v21 = vpop.f32.mrf.mxu1 }
 0xabb   : > { %v2579_v41 = vmax.f32 %v2569_v21, 0.0 }
 0xabd   : > { %v2583_v53 = vpack.c.bf16 %v2579_v41, %v2578_v60 }
 0xabf   : > { %v2638_v15 = vpop.f32.mrf.mxu2  ;;  %2937 = vmatmul.msk.bf16.gmra.mxu2 %vm2616_vm8, %v2583_v53 }
 0xac0   : > { %v2639_v9 = vadd.f32 %v2638_v15, %v4522_v11 }
 0xac2   : > { %v2658_v1 = vpack.c.bf16 %v2639_v9, %v2639_v9 }
 0xac4   : > { %2667 = vst.msk [vmem:[%s4682_s1] sm:$0xf] %vm2666_vm0, %v2658_v1 }
 0xac7   : > { %v2640_v2 = vpop.f32.mrf.mxu2 }
 0xac8   : > { %v2641_v38 = vadd.f32 %v2640_v2, %v4527_v34 }
 0xaca   : > { %v2659_v42 = vpack.c.bf16 %v2641_v38, %v2641_v38 }
 0xacc   : > { %2668 = vst.msk [vmem:[%s4682_s1 + $0x4] sm:$0xf] %vm2666_vm0, %v2659_v42 }
 0xacf   : > { %v2643_v11 = vpop.f32.mrf.mxu2 }
 0xad0   : > { %v2644_v46 = vadd.f32 %v2643_v11, %v4532_v24 }
 0xad2   : > { %v2660_v0 = vpack.c.bf16 %v2644_v46, %v2644_v46 }
 0xad4   : > { %2669 = vst.msk [vmem:[%s4682_s1 + $0x8] sm:$0xf] %vm2666_vm0, %v2660_v0 }
 0xad7   : > { %v2645_v35 = vpop.f32.mrf.mxu2 }
 0xad8   : > { %v2646_v32 = vadd.f32 %v2645_v35, %v4537_v37 }
 0xada   : > { %v2661_v13 = vpack.c.bf16 %v2646_v32, %v2646_v32 }
 0xadc   : > { %2670 = vst.msk [vmem:[%s4682_s1 + $0xc] sm:$0xf] %vm2666_vm0, %v2661_v13 }
 0xb12   : > { %v2648_v34 = vpop.f32.mrf.mxu2 }
 0xb13   : > { %v2649_v29 = vadd.f32 %v2648_v34, %v4542_v40 }
 0xb15   : > { %v2662_v18 = vpack.c.bf16 %v2649_v29, %v2649_v29 }
 0xb17   : > { %2671 = vst.msk [vmem:[%s4682_s1 + $0x10] sm:$0xf] %vm2666_vm0, %v2662_v18 }
 0xb1a   : > { %v2650_v55 = vpop.f32.mrf.mxu2 }
 0xb1b   : > { %v2651_v24 = vadd.f32 %v2650_v55, %v4547_v5 }
 0xb1d   : > { %v2663_v31 = vpack.c.bf16 %v2651_v24, %v2651_v24 }
 0xb1f   : > { %2672 = vst.msk [vmem:[%s4682_s1 + $0x14] sm:$0xf] %vm2666_vm0, %v2663_v31 }
 0xb42   : > { %v2653_v37 = vpop.f32.mrf.mxu2 }
 0xb43   : > { %v2654_v43 = vadd.f32 %v2653_v37, %v4560_v4 }
 0xb45   : > { %v2664_v62 = vpack.c.bf16 %v2654_v43, %v2654_v43 }
 0xb47   : > { %2673 = vst.msk [vmem:[%s4682_s1 + $0x18] sm:$0xf] %vm2666_vm0, %v2664_v62 }
 0xb4a   : > { %v2655_v40 = vpop.f32.mrf.mxu2 }
 0xb4b   : > { %v2656_v5 = vadd.f32 %v2655_v40, %v4572_v61 }
 0xb4d   : > { %v2665_v19 = vpack.c.bf16 %v2656_v5, %v2656_v5 }
 0xb4f   : > { %2674 = vst.msk [vmem:[%s4682_s1 + $0x1c] sm:$0xf] %vm2666_vm0, %v2665_v19 }
 0xb50   : > { %3437 = shalt.err (!%p3434_p10)
}
 0xb51   : > { %s3498_s10 = smov 64   ;;  %s3499_s1 = smov 4  }
 0xb52   : > { %2990 = dma.vmem_to_hbm [thread:$0]  (%p3655_p0), %s2690_s27, 512, %s2692_s14, %s2676_s26, %s3498_s10, %s3498_s10, %s3499_s1  }
 0xb53 PF: > { %p3017_p11 = scmp.ge.s32.totalorder %s3484_s24, 2  ;;  %s2706_s15 = sand.u32 1, %s3472_s21  }
 0xb54   : > { %s2707_s30 = scalar_lea.sflag [#allocation4], %s2706_s15 }
 0xb55   : > { %p3007_p12 = pnand %p3017_p11, %p3600_p6 }
 0xb57   : > { %p3008_p13 = pneg %p3007_p12 }
 0xb59   : > { %3467 = dma.done.wait (%p3008_p13), %s2707_s30, 512  }
 0xb5a   : > { %3469 = vsyncadd (%p3008_p13), %s2707_s30, 4294966784  ;;  %s4799_s19 = sld [smem:[#allocation15_spill]]  ;;  %p27_p3 = scmp.ge.s32.totalorder %s3637_s7, 6  }
 0xb5b   : > { %s4800_s23 = sld [smem:[#allocation17_spill]]  ;;  %s4801_s21 = smov %s3476_s22 }
 0xb5c   : > { %s4803_s24 = smov %s3637_s7  ;;  %29 = sbr.rel (!%p27_p3) target bundleno = 11 (0xb), region = 125 }
 0xb60   : > { %s4802_s22 = smov %s4799_s19 }
 0xb61   :  { %2713 = vsyncpa [#allocation3], 1 }
 0xb62   :  { %2715 = vsyncpa [#allocation3 + $0x1], 1 }
 0xb63   :  { %2716 = vsyncpa [#allocation6], 1 }
 0xb64   :  { %2717 = vsyncpa [#allocation9], 1 }
 0xb65   :  { %2718 = vsyncpa [#allocation4], 1 }
 0xb66   :  { %2720 = vsyncpa [#allocation4 + $0x1], 1 }

// kernel: tpu_custom_call.1
= control target key start
LH: loop header
LB: loop body
LE: loop exit
PB: predicated region body
PF: predicated region fallthrough
CT: control target
= control target key end

     0   :  { %s4740_s0 = inlined_call_operand.hbm [shape: bf16[16,16,32], index: 0, kind: input, shape index: {}]   ;;  %s4741_s1 = inlined_call_operand.hbm [shape: bf16[16,16], index: 1, kind: input, shape index: {}]   ;;  %s4742_s2 = inlined_call_operand.vmem [shape: f32[1,32], index: 2, kind: input, shape index: {}]   ;;  %s4743_s3 = inlined_call_operand.vmem [shape: f32[1,32], index: 3, kind: input, shape index: {}]   ;;  %s4744_s4 = inlined_call_operand.vmem [shape: bf16[32,32], index: 4, kind: input, shape index: {}]   ;;  %s4745_s5 = inlined_call_operand.vmem [shape: bf16[32,32], index: 5, kind: input, shape index: {}]   ;;  %s4746_s6 = inlined_call_operand.vmem [shape: bf16[32,32], index: 6, kind: input, shape index: {}]   ;;  %s4747_s7 = inlined_call_operand.hbm [shape: bf16[32,32], index: 7, kind: input, shape index: {}]   ;;  %s4748_s8 = inlined_call_operand.vmem [shape: f32[1,32], index: 8, kind: input, shape index: {}]   ;;  %s4749_s9 = inlined_call_operand.vmem [shape: f32[1,32], index: 9, kind: input, shape index: {}]   ;;  %s4750_s10 = inlined_call_operand.hbm [shape: bf16[32,64], index: 10, kind: input, shape index: {}]   ;;  %s4751_s11 = inlined_call_operand.vmem [shape: bf16[64,32], index: 11, kind: input, shape index: {}]   ;;  %s4752_s12 = inlined_call_operand.hbm [shape: bf16[16,16,32], index: 12, kind: output, shape index: {}]  }
   0x1   :  { %4765 = sst [smem:[#allocation25_spill]] %s4741_s1 }
   0x2   :  { %4766 = sst [smem:[#allocation26_spill]] %s4747_s7 }
   0x3   :  { %4767 = sst [smem:[#allocation27_spill]] %s4750_s10 }
   0x4   :  { %17 = vsyncpa [#allocation3], 0 }
   0x5   :  { %19 = vsyncpa [#allocation3 + $0x1], 0 }
   0x6   :  { %20 = vsyncpa [#allocation6], 0 }
   0x7   :  { %21 = vsyncpa [#allocation9], 0 }
   0x8   :  { %22 = vsyncpa [#allocation4], 0 }
   0x9   :  { %24 = vsyncpa [#allocation4 + $0x1], 0  ;;  %s3565_s21 = smov 0   ;;  %s3567_s22 = smov 0  }
   0xa   :  { %s3569_s23 = smov 0   ;;  %s3571_s24 = smov 0  }
   0xb LB: > { %4768 = sst [smem:[#allocation15_spill]] %s3480_s23  ;;  %s3586_s25 = sadd.s32 4294967295, %s3484_s24   ;;  %s3484_s24 = sphi %s3571_s24, %s4803_s24   ;;  %s3480_s23 = sphi %s3569_s23, %s4800_s23   ;;  %s3476_s22 = sphi %s3567_s22, %s4802_s22   ;;  %s3472_s21 = sphi %s3565_s21, %s4801_s21  }
   0xc   : > { %s2794_s26 = sadd.s32 4294967294, %s3484_s24   ;;  %p50_p0 = scmp.ne.s32.totalorder %s3476_s22, %s3472_s21 }
   0xd   : > { %p51_p1 = scmp.eq.s32.totalorder %s3586_s25, 0  ;;  %p305_p2 = scmp.eq.s32.totalorder %s3586_s25, 3 }
   0xe   : > { %p311_p3 = scmp.eq.s32.totalorder %s2794_s26, 3  ;;  %p2795_p5 = scmp.ge.s32.totalorder %s3484_s24, 1 }
   0xf   : > { %p3595_p4 = por %p51_p1, %p50_p0  ;;  %p318_p7 = scmp.lt.s32.totalorder %s3484_s24, 5 }
  0x10   : > { %p3600_p6 = por %p311_p3, %p50_p0  ;;  %s4772_s1 = sld [smem:[#allocation25_spill]] }
  0x11   : > { %p3608_p8 = pnand %p2795_p5, %p318_p7  ;;  %s3486_s15 = smov [#allocation5]  }
  0x12   : > { %s4770_s28 = scalar_select %p3600_p6, 1, 0 }
  0x13   : > { %p2992_p9 = pneg %p3608_p8  ;;  %s331_s16 = sshll.u32 %s3486_s15, 4  ;;  %s332_s16 = int_to_ptr.vmem [resolvable:$true] %s331_s16 }
  0x14   : > { %4771 = sst [smem:[#allocation16_spill]] %s4770_s28  ;;  %s4754_s26 = smov 64  }
  0x15   : > { %p3616_p10 = pnand %p2992_p9, %p51_p1  ;;  %s4775_s7 = sld [smem:[#allocation26_spill]] }
  0x16   : > { %s329_s13 = sshll.u32 %s4772_s1, 4  ;;  %s4755_s29 = smov 4   ;;  %s330_s13 = int_to_ptr.hbm [resolvable:$true] %s329_s13 }
  0x17   : > { %2995 = dma.hbm_to_vmem [thread:$0]  (!%p3616_p10), %s330_s13, 128, %s332_s16, [#allocation6], %s4754_s26, %s4754_s26, %s4755_s29  }
  0x18   : > { %s3489_s30 = smov [#allocation7]   ;;  %s4776_s10 = sld [smem:[#allocation27_spill]] }
  0x19   : > { %s360_s15 = sshll.u32 %s3489_s30, 4  ;;  %s3490_s13 = smov [#allocation8]   ;;  %s361_s15 = int_to_ptr.vmem [resolvable:$true] %s360_s15 }
  0x1a   : > { %s380_s16 = sshll.u32 %s3490_s13, 4  ;;  %s37_s18 = sadd.s32 1, %s3480_s23  ;;  %s381_s16 = int_to_ptr.vmem [resolvable:$true] %s380_s16 }
  0x1b   : > { %s358_s20 = sshll.u32 %s4775_s7, 4  ;;  %s3637_s7 = sadd.s32 1, %s3484_s24   ;;  %s359_s20 = int_to_ptr.hbm [resolvable:$true] %s358_s20 }
  0x1c   : > { %2998 = dma.hbm_to_vmem [thread:$0]  (!%p3616_p10), %s359_s20, 256, %s361_s15, [#allocation6], %s4754_s26, %s4754_s26, %s4755_s29  }
  0x1d   : > { %s34_s30 = ssub.s32 %s3484_s24, %s3637_s7  ;;  %p44_p12 = scmp.ne.s32.totalorder %s3480_s23, %s3476_s22 }
  0x1e   : > { %s378_s1 = sshll.u32 %s4776_s10, 4  ;;  %p35_p11 = scmp.eq.s32.totalorder %s34_s30, 0  ;;  %s379_s1 = int_to_ptr.hbm [resolvable:$true] %s378_s1 }
  0x1f   : > { %3001 = dma.hbm_to_vmem [thread:$0]  (!%p3616_p10), %s379_s1, 256, %s381_s16, [#allocation9], %s4754_s26, %s4754_s26, %s4755_s29  }
  0x20   : > { %p45_p13 = scmp.eq.s32.totalorder %s3484_s24, 0  ;;  %p3655_p0 = por %p305_p2, %p44_p12 }
  0x21   : > { %s3651_s19 = scalar_select %p35_p11, %s3480_s23, %s37_s18  }
  0x22   : > { %p3013_p3 = scmp.lt.s32.totalorder %s3484_s24, 4  ;;  %s397_s15 = sand.u32 1, %s3480_s23  }
  0x23   : > { %4777 = sst [smem:[#allocation17_spill]] %s3651_s19  ;;  %s2945_s17 = sshll.u32 %s3484_s24, 5 }
  0x24   : > { %p46_p5 = por %p45_p13, %p44_p12  ;;  %s2800_s13 = sshll.u32 %s397_s15, 5 }
  0x25   : > { %s407_s1 = scalar_lea.hbm %s4740_s0, %s2945_s17  ;;  %s401_s30 = scalar_lea.vmem [#allocation2], %s2800_s13 }
  0x26   : > { %s408_s16 = sshll.u32 %s407_s1, 4  ;;  %s410_s26 = sshll.u32 %s401_s30, 4  ;;  %s409_s16 = int_to_ptr.hbm [resolvable:$true] %s408_s16  ;;  %s411_s26 = int_to_ptr.vmem [resolvable:$true] %s410_s26 }
  0x27   : > { %p3665_p7 = pnand %p3013_p3, %p46_p5  ;;  %s398_s29 = scalar_lea.sflag [#allocation3], %s397_s15 }
  0x28   : > { %s3380_s19 = sshra.s32 %s409_s16, 4  ;;  %s3387_s17 = scalar_lea.hbm %s4740_s0, 128  ;;  %s3381_s19 = int_to_ptr.hbm [resolvable:$true] %s3380_s19 }
  0x29   : > { %s3382_s23 = scalar_lea.hbm %s3381_s19, 32  ;;  %p3384_p9 = pneg %p3665_p7 }
  0x2a   : > { %p3383_p2 = scmp.ne.s32.totalorder %s3381_s19, %s3382_s23  ;;  %p3388_p12 = scmp.lt.s32.totalorder %s3381_s19, %s4740_s0 }
  0x2b   : > { %p3389_p13 = scmp.lt.s32.totalorder %s3387_s17, %s3382_s23 }
  0x2c   : > { %p3385_p10 = pnand %p3384_p9, %p3383_p2 }
  0x2d   : > { %p3390_p3 = por %p3389_p13, %p3388_p12 }
  0x2e   : > { %p3386_p11 = pneg %p3385_p10 }
  0x30   : > { %p3391_p5 = pnand %p3390_p3, %p3386_p11 }
  0x32   : > { %3394 = shalt.err (!%p3391_p5)
}
  0x33   : > { %s4780_s15 = smov 4   ;;  %s4781_s30 = smov 64  }
  0x34   : > { %3005 = dma.hbm_to_vmem [thread:$0]  (!%p3665_p7), %s409_s16, 512, %s411_s26, %s398_s29, %s4781_s30, %s4781_s30, %s4780_s15  }
  0x35   : > { %422 = sbr.rel (%p3608_p8) target bundleno = 2899 (0xb53), region = 68 }
  0x3a   : > { %s3685_s10 = sand.u32 1, %s3476_s22  }
  0x3b   : > { %s2805_s23 = sshll.u32 %s3685_s10, 5  ;;  %s425_s19 = scalar_lea.sflag [#allocation3], %s3685_s10 }
  0x3c   : > { %s3691_s28 = scalar_lea.vmem [#allocation2], %s2805_s23 }
  0x3d   : > { %3455 = dma.done.wait (%p3595_p4), %s425_s19, 512  }
  0x3e   : > { %3457 = vsyncadd (%p3595_p4), %s425_s19, 4294966784 }
  0x3f   : > { %3459 = dma.done.wait (%p51_p1), [#allocation6], 384  }
  0x40   : > { %3461 = vsyncadd (%p51_p1), [#allocation6], 4294966912 }
  0x41   : > { %3463 = dma.done.wait (%p51_p1), [#allocation9], 256  }
  0x42   : > { %3465 = vsyncadd (%p51_p1), [#allocation9], 4294967040  ;;  %v492_v0 = vld [vmem:[%s3691_s28 + $0x8] sm:$0xff]   ;;  %vm508_vm0 = vcmask 261120   ;;  %v490_v1 = vld [vmem:[%s3691_s28] sm:$0xff]   ;;  %v3491_v19 = vmov 32.0  }
  0x43   : > { %v3707_v2 = vunpack.c.l.bf16 %v492_v0  ;;  %v3709_v3 = vunpack.c.l.bf16 %v490_v1  ;;  %v3715_v6 = vunpack.c.h.bf16 %v492_v0  ;;  %v3717_v7 = vunpack.c.h.bf16 %v490_v1  ;;  %v495_v10 = vld [vmem:[%s3691_s28 + $0x14] sm:$0xff]   ;;  %v494_v11 = vld [vmem:[%s3691_s28 + $0x10] sm:$0xf]  ;;  %v497_v16 = vld [vmem:[%s3691_s28 + $0x1c] sm:$0xf]  ;;  %s3492_s16 = smov 120  }
  0x44   : > { %v3725_v12 = vunpack.c.l.bf16 %v495_v10  ;;  %v3727_v13 = vunpack.c.l.bf16 %v494_v11  ;;  %v3734_v17 = vunpack.c.l.bf16 %v497_v16  ;;  %3128 = vrcp.f32 %v3491_v19  ;;  %v2951_v63 = vld [vmem:[%s4744_s4 + $0x8] sm:$0xff]  ;;  %s3494_s18 = smov 104   ;;  %s3495_s17 = smov 16  }
  0x45   : > { %4782 = vst [vmem:[#allocation18_spill] sm:$0xff] %v3707_v2  ;;  %v515_v4 = vsel %vm508_vm0, %v3707_v2, 0.0  ;;  %v509_v5 = vsel %vm508_vm0, %v3709_v3, 0.0  ;;  %v518_v8 = vsel %vm508_vm0, %v3715_v6, 0.0  ;;  %v512_v9 = vsel %vm508_vm0, %v3717_v7, 0.0  ;;  %752 = vmatpush.bf16.msra.mxu0 %v2951_v63  ;;  %2970 = vmatpush.bf16.msra.mxu3 %v2951_v63  ;;  %s3496_s13 = smov 8  }
  0x46   : > { %516 = vadd.xlane.f32.xlu1 %v515_v4  ;;  %510 = vadd.xlane.f32.xlu0 %v509_v5  ;;  %4783 = vst [vmem:[#allocation19_spill] sm:$0xff] %v3715_v6  ;;  %v524_v14 = vsel %vm508_vm0, %v3725_v12, 0.0  ;;  %v521_v15 = vsel %vm508_vm0, %v3727_v13, 0.0  ;;  %v530_v18 = vsel %vm508_vm0, %v3734_v17, 0.0  ;;  %v3764_v47 = vunpack.c.h.bf16 %v495_v10  ;;  %s3497_s1 = smov 24   ;;  %s2676_s26 = scalar_lea.sflag [#allocation4], %s3685_s10 }
  0x47   : > { %4784 = vst [vmem:[#allocation20_spill] sm:$0xff] %v3725_v12 }
  0x48   : > { %4785 = vst [vmem:[#allocation21_spill] sm:$0xff] %v3727_v13  ;;  %v527_v52 = vsel %vm508_vm0, %v3764_v47, 0.0 }
  0x49   : > { %4786 = vst [vmem:[#allocation22_spill] sm:$0xff] %v3734_v17 }
  0x4a   : > { %v3129_v20 = vpop.eup %3128  ;;  %4788 = vst [vmem:[#allocation24_spill] sm:$0xff] %v3764_v47 }
  0x4b   : > { %v534_v21 = vmul.f32 32.0, %v3129_v20  ;;  %vm538_vm1 = vweird.f32 %v3129_v20 }
  0x4d   : > { %v535_v22 = vsub.f32 1.0, %v534_v21 }
  0x4e   : > { %519 = vadd.xlane.f32.xlu1 %v518_v8  ;;  %513 = vadd.xlane.f32.xlu0 %v512_v9  ;;  %v2950_v9 = vld [vmem:[%s4744_s4] sm:$0xff] }
  0x4f   : > { %v536_v23 = vmul.f32 %v3129_v20, %v535_v22  ;;  %753 = vmatpush.bf16.msra.mxu0 %v2950_v9  ;;  %2971 = vmatpush.bf16.msra.mxu3 %v2950_v9  ;;  %v2953_v22 = vld [vmem:[%s4745_s5 + $0x8] sm:$0xff] }
  0x50   : > { %2972 = vmatpush.bf16.msra.mxu1 %v2953_v22 }
  0x51   : > { %v537_v24 = vadd.f32 %v3129_v20, %v536_v23 }
  0x53   : > { %v3738_v25 = vsel %vm538_vm1, %v3129_v20, %v537_v24  ;;  %797 = vmatpush.bf16.msrb.mxu0 %v2953_v22 }
  0x54   : > { %4787 = vst [vmem:[#allocation23_spill] sm:$0xff] %v3738_v25 }
  0x56   : > { %525 = vadd.xlane.f32.xlu1 %v524_v14  ;;  %522 = vadd.xlane.f32.xlu0 %v521_v15 }
  0x5e   : > { %531 = vadd.xlane.f32.xlu0 %v530_v18 }
  0xb9   : > { %v517_v26 = vpop.xlane.xlu1 %516  ;;  %v511_v27 = vpop.xlane.xlu0 %510 }
  0xba   : > { %v542_v28 = vmul.f32 %v3738_v25, %v517_v26  ;;  %v540_v29 = vmul.f32 %v3738_v25, %v511_v27 }
  0xbc   : > { %v3743_v30 = vsub.f32 %v3707_v2, %v542_v28  ;;  %v3746_v31 = vsub.f32 %v3709_v3, %v540_v29 }
  0xbe   : > { %v558_v32 = vmul.f32 %v3743_v30, %v3743_v30  ;;  %v556_v33 = vmul.f32 %v3746_v31, %v3746_v31 }
  0xc0   : > { %v570_v34 = vsel %vm508_vm0, %v558_v32, 0.0  ;;  %v564_v35 = vsel %vm508_vm0, %v556_v33, 0.0  ;;  %v2952_v32 = vld [vmem:[%s4745_s5] sm:$0xff] }
  0xc1   : > { %571 = vadd.xlane.f32.xlu1 %v570_v34  ;;  %v520_v36 = vpop.xlane.xlu1 %519  ;;  %565 = vadd.xlane.f32.xlu2 %v564_v35  ;;  %v514_v37 = vpop.xlane.xlu0 %513 }
  0xc2   : > { %v541_v38 = vmul.f32 %v3738_v25, %v514_v37  ;;  %v543_v44 = vmul.f32 %v3738_v25, %v520_v36  ;;  %798 = vmatpush.bf16.msrb.mxu0 %v2952_v32  ;;  %2973 = vmatpush.bf16.msra.mxu1 %v2952_v32  ;;  %v2954_v32 = vld [vmem:[%s4746_s6] sm:$0xff] }
  0xc4   : > { %v3756_v39 = vsub.f32 %v3717_v7, %v541_v38  ;;  %v3773_v50 = vsub.f32 %v3715_v6, %v543_v44 }
  0xc6   : > { %v557_v40 = vmul.f32 %v3756_v39, %v3756_v39  ;;  %v559_v58 = vmul.f32 %v3773_v50, %v3773_v50 }
  0xc8   : > { %v567_v41 = vsel %vm508_vm0, %v557_v40, 0.0  ;;  %v573_v60 = vsel %vm508_vm0, %v559_v58, 0.0 }
  0xc9   : > { %v526_v42 = vpop.xlane.xlu1 %525  ;;  %568 = vadd.xlane.f32.xlu2 %v567_v41  ;;  %v523_v43 = vpop.xlane.xlu0 %522 }
  0xca   : > { %v545_v45 = vmul.f32 %v3738_v25, %v526_v42  ;;  %v544_v46 = vmul.f32 %v3738_v25, %v523_v43 }
  0xcc   : > { %v3767_v48 = vsub.f32 %v3725_v12, %v545_v45  ;;  %v3770_v49 = vsub.f32 %v3727_v13, %v544_v46 }
  0xce   : > { %v561_v51 = vmul.f32 %v3767_v48, %v3767_v48  ;;  %v560_v53 = vmul.f32 %v3770_v49, %v3770_v49 }
  0xd0   : > { %v579_v54 = vsel %vm508_vm0, %v561_v51, 0.0  ;;  %v576_v55 = vsel %vm508_vm0, %v560_v53, 0.0 }
  0xd1   : > { %580 = vadd.xlane.f32.xlu1 %v579_v54  ;;  %528 = vadd.xlane.f32.xlu2 %v527_v52  ;;  %v532_v56 = vpop.xlane.xlu0 %531 }
  0xd2   : > { %577 = vadd.xlane.f32.xlu0 %v576_v55  ;;  %v547_v57 = vmul.f32 %v3738_v25, %v532_v56 }
  0xd4   : > { %v3787_v59 = vsub.f32 %v3734_v17, %v547_v57  ;;  %v3836_v57 = vld [vmem:[%s4742_s2] ss:$0 sm:$0xff] }
  0xd6   : > { %v563_v61 = vmul.f32 %v3787_v59, %v3787_v59 }
  0xd8   : > { %v585_v62 = vsel %vm508_vm0, %v563_v61, 0.0 }
  0xd9   : > { %574 = vadd.xlane.f32.xlu2 %v573_v60 }
  0xda   : > { %586 = vadd.xlane.f32.xlu0 %v585_v62 }
 0x134   : > { %v572_v0 = vpop.xlane.xlu1 %571  ;;  %v566_v1 = vpop.xlane.xlu2 %565 }
 0x135   : > { %v588_v4 = vmul.f32 %v566_v1, %v3738_v25  ;;  %v590_v5 = vmul.f32 %v572_v0, %v3738_v25 }
 0x137   : > { %v596_v8 = vadd.f32 1e-05, %v588_v4  ;;  %v3801_v10 = vadd.f32 1e-05, %v590_v5 }
 0x139   : > { %3130 = vrsqrt.f32 %v596_v8  ;;  %vm610_vm3 = vweird.f32 %v596_v8  ;;  %vm630_vm8 = vweird.f32 %v3801_v10 }
 0x13a   : > { %3132 = vrsqrt.f32 %v3801_v10 }
 0x13c   : > { %v569_v11 = vpop.xlane.xlu2 %568 }
 0x13d   : > { %v589_v14 = vmul.f32 %v569_v11, %v3738_v25 }
 0x13f   : > { %v597_v15 = vadd.f32 1e-05, %v589_v14  ;;  %v3131_v16 = vpop.eup %3130 }
 0x140   : > { %v605_v18 = vmul.f32 %v3131_v16, %v596_v8  ;;  %v3808_v23 = vpop.eup %3132  ;;  %vm611_vm2 = vweird.f32 %v3131_v16 }
 0x141   : > { %3134 = vrsqrt.f32 %v597_v15  ;;  %v625_v36 = vmul.f32 %v3808_v23, %v3801_v10  ;;  %vm612_vm4 = vmor %vm610_vm3, %vm611_vm2  ;;  %vm620_vm6 = vweird.f32 %v597_v15  ;;  %vm631_vm9 = vweird.f32 %v3808_v23 }
 0x142   : > { %v606_v19 = vmul.f32 %v3131_v16, %v605_v18  ;;  %vm3853_vm10 = vmor %vm630_vm8, %vm631_vm9 }
 0x143   : > { %v626_v45 = vmul.f32 %v3808_v23, %v625_v36 }
 0x144   : > { %v581_v20 = vpop.xlane.xlu1 %580  ;;  %v529_v21 = vpop.xlane.xlu2 %528  ;;  %v607_v24 = vmul.f32 0.5, %v606_v19 }
 0x145   : > { %v593_v26 = vmul.f32 %v581_v20, %v3738_v25  ;;  %v546_v27 = vmul.f32 %v3738_v25, %v529_v21  ;;  %v578_v28 = vpop.xlane.xlu0 %577  ;;  %v627_v58 = vmul.f32 0.5, %v626_v45 }
 0x146   : > { %v592_v29 = vmul.f32 %v578_v28, %v3738_v25  ;;  %v608_v34 = vsub.f32 1.5, %v607_v24 }
 0x147   : > { %v3135_v33 = vpop.eup %3134  ;;  %v3817_v35 = vsub.f32 %v3764_v47, %v546_v27  ;;  %v3821_v38 = vadd.f32 1e-05, %v593_v26  ;;  %v628_v4 = vsub.f32 1.5, %v627_v58  ;;  %v2955_v26 = vld [vmem:[%s4746_s6 + $0x8] sm:$0xff] }
 0x148   : > { %v615_v37 = vmul.f32 %v3135_v33, %v597_v15  ;;  %v609_v40 = vmul.f32 %v3131_v16, %v608_v34  ;;  %v3823_v41 = vadd.f32 1e-05, %v592_v29  ;;  %vm621_vm5 = vweird.f32 %v3135_v33  ;;  %2974 = vmatpush.bf16.msra.mxu2 %v2955_v26 }
 0x149   : > { %v562_v42 = vmul.f32 %v3817_v35, %v3817_v35  ;;  %3136 = vrsqrt.f32 %v3821_v38  ;;  %vm622_vm7 = vmor %vm620_vm6, %vm621_vm5  ;;  %v629_v15 = vmul.f32 %v3808_v23, %v628_v4  ;;  %vm660_vm14 = vweird.f32 %v3821_v38 }
 0x14a   : > { %v616_v43 = vmul.f32 %v3135_v33, %v615_v37  ;;  %v613_v46 = vsel %vm612_vm4, %v3131_v16, %v609_v40  ;;  %3138 = vrsqrt.f32 %v3823_v41  ;;  %vm650_vm1 = vweird.f32 %v3823_v41 }
 0x14b   : > { %v582_v44 = vsel %vm508_vm0, %v562_v42, 0.0  ;;  %v684_v56 = vmul.f32 %v613_v46, %v3746_v31  ;;  %v3843_v31 = vld [vmem:[%s4743_s3] ss:$0 sm:$0xff]  ;;  %v633_v22 = vsel %vm3853_vm10, %v3808_v23, %v629_v15 }
 0x14c   : > { %v617_v51 = vmul.f32 0.5, %v616_v43  ;;  %583 = vadd.xlane.f32.xlu2 %v582_v44  ;;  %v575_v52 = vpop.xlane.xlu2 %574  ;;  %2975 = vmatpush.bf16.msra.mxu2 %v2954_v32 }
 0x14d   : > { %v591_v53 = vmul.f32 %v575_v52, %v3738_v25  ;;  %v695_v1 = vmul.f32 %v3836_v57, %v684_v56 }
 0x14e   : > { %v618_v54 = vsub.f32 1.5, %v617_v51 }
 0x14f   : > { %v599_v55 = vadd.f32 1e-05, %v591_v53  ;;  %v3137_v61 = vpop.eup %3136 }
 0x150   : > { %v619_v60 = vmul.f32 %v3135_v33, %v618_v54  ;;  %v3139_v63 = vpop.eup %3138  ;;  %v655_v8 = vmul.f32 %v3137_v61, %v3821_v38  ;;  %vm661_vm15 = vweird.f32 %v3137_v61 }
 0x151   : > { %3140 = vrsqrt.f32 %v599_v55  ;;  %v645_v9 = vmul.f32 %v3139_v63, %v3823_v41  ;;  %vm640_vm11 = vweird.f32 %v599_v55  ;;  %vm651_vm2 = vweird.f32 %v3139_v63  ;;  %vm662_vm3 = vmor %vm660_vm14, %vm661_vm15 }
 0x152   : > { %v623_v62 = vsel %vm622_vm7, %v3135_v33, %v619_v60  ;;  %v656_v10 = vmul.f32 %v3137_v61, %v655_v8  ;;  %v686_v33 = vmul.f32 %v633_v22, %v3743_v30  ;;  %vm652_vm4 = vmor %vm650_vm1, %vm651_vm2  ;;  %v2947_v60 = vld [vmem:[%s3691_s28 + $0x8] sm:$0xff] }
 0x153   : > { %v685_v0 = vmul.f32 %v623_v62, %v3756_v39  ;;  %v706_v39 = vadd.f32 %v3843_v31, %v695_v1  ;;  %v646_v20 = vmul.f32 %v3139_v63, %v645_v9  ;;  %2859 = vmatmul.msk.bf16.vlgmr.msra.gmra.mxu2 %vm508_vm0, %v2947_v60  ;;  %v2948_v62 = vld [vmem:[%s3691_s28 + $0x10] sm:$0xff] }
 0x154   : > { %v657_v27 = vmul.f32 0.5, %v656_v10  ;;  %v697_v42 = vmul.f32 %v3836_v57, %v686_v33 }
 0x155   : > { %v696_v5 = vmul.f32 %v3836_v57, %v685_v0  ;;  %v647_v28 = vmul.f32 0.5, %v646_v20 }
 0x156   : > { %v658_v34 = vsub.f32 1.5, %v657_v27  ;;  %v708_v45 = vadd.f32 %v3843_v31, %v697_v42 }
 0x157   : > { %v3141_v11 = vpop.eup %3140  ;;  %v707_v14 = vadd.f32 %v3843_v31, %v696_v5  ;;  %v648_v36 = vsub.f32 1.5, %v647_v28 }
 0x158   : > { %v635_v16 = vmul.f32 %v3141_v11, %v599_v55  ;;  %vm641_vm12 = vweird.f32 %v3141_v11  ;;  %v659_v30 = vmul.f32 %v3137_v61, %v658_v34 }
 0x159   : > { %v714_v19 = vpack.c.bf16 %v707_v14, %v706_v39  ;;  %vm642_vm13 = vmor %vm640_vm11, %vm641_vm12  ;;  %v649_v44 = vmul.f32 %v3139_v63, %v648_v36  ;;  %vm933_vm11 = vcmask 64512   ;;  %vm1044_vm12 = vcmask 130048  }
 0x15a   : > { %v636_v21 = vmul.f32 %v3141_v11, %v635_v16  ;;  %v663_v51 = vsel %vm662_vm3, %v3137_v61, %v659_v30 }
 0x15b   : > { %2818 = vmatmul.msk.bf16.vlgmr.msra.gmra.mxu0 %vm508_vm0, %v714_v19  ;;  %v653_v52 = vsel %vm652_vm4, %v3139_v63, %v649_v44 }
 0x15c   : > { %v637_v24 = vmul.f32 0.5, %v636_v21  ;;  %874 = vmatpush.bf16.msra.mxu0 %v2955_v26  ;;  %v688_v41 = vmul.f32 %v653_v52, %v3770_v49 }
 0x15e   : > { %v638_v29 = vsub.f32 1.5, %v637_v24  ;;  %v699_v53 = vmul.f32 %v3836_v57, %v688_v41 }
 0x160   : > { %v639_v23 = vmul.f32 %v3141_v11, %v638_v29  ;;  %875 = vmatpush.bf16.msra.mxu0 %v2954_v32  ;;  %v710_v55 = vadd.f32 %v3843_v31, %v699_v53 }
 0x162   : > { %v643_v37 = vsel %vm642_vm13, %v3141_v11, %v639_v23  ;;  %v2946_v11 = vld [vmem:[%s3691_s28] sm:$0xff]  ;;  %vm2241_vm13 = vcmask 195584  }
 0x163   : > { %v687_v40 = vmul.f32 %v643_v37, %v3773_v50  ;;  %v689_v50 = vmul.f32 %v663_v51, %v3767_v48  ;;  %v587_v48 = vpop.xlane.xlu0 %586  ;;  %2860 = vmatmul.msk.bf16.gmra.mxu2 %vm508_vm0, %v2948_v62 }
 0x164   : > { %v595_v49 = vmul.f32 %v587_v48, %v3738_v25 }
 0x165   : > { %v698_v43 = vmul.f32 %v3836_v57, %v687_v40  ;;  %v700_v54 = vmul.f32 %v3836_v57, %v689_v50 }
 0x166   : > { %v603_v61 = vadd.f32 1e-05, %v595_v49 }
 0x167   : > { %v709_v46 = vadd.f32 %v3843_v31, %v698_v43  ;;  %v711_v56 = vadd.f32 %v3843_v31, %v700_v54 }
 0x168   : > { %3142 = vrsqrt.f32 %v603_v61  ;;  %vm680_vm5 = vweird.f32 %v603_v61 }
 0x169   : > { %v715_v38 = vpack.c.bf16 %v709_v46, %v708_v45  ;;  %v716_v58 = vpack.c.bf16 %v711_v56, %v710_v55 }
 0x16b   : > { %2819 = vmatmul.msk.bf16.vlgmr.msra.gmra.mxu3 %vm508_vm0, %v715_v38  ;;  %2830 = vmatmul.msk.bf16.vlgmr.msrb.gmra.mxu0 %vm508_vm0, %v714_v19 }
 0x16c   : > { %2831 = vmatmul.msk.bf16.vlgmr.msra.gmra.mxu1 %vm508_vm0, %v715_v38 }
 0x16e   : > { %v3143_v63 = vpop.eup %3142 }
 0x16f   : > { %v675_v0 = vmul.f32 %v3143_v63, %v603_v61  ;;  %vm681_vm6 = vweird.f32 %v3143_v63 }
 0x170   : > { %vm682_vm7 = vmor %vm680_vm5, %vm681_vm6 }
 0x171   : > { %v676_v1 = vmul.f32 %v3143_v63, %v675_v0 }
 0x173   : > { %v677_v9 = vmul.f32 0.5, %v676_v1 }
 0x175   : > { %v678_v39 = vsub.f32 1.5, %v677_v9 }
 0x177   : > { %v679_v15 = vmul.f32 %v3143_v63, %v678_v39 }
 0x179   : > { %v683_v19 = vsel %vm682_vm7, %v3143_v63, %v679_v15 }
 0x17a   : > { %v691_v21 = vmul.f32 %v683_v19, %v3787_v59 }
 0x17b   : > { %2820 = vmatmul.msk.bf16.gmra.mxu3 %vm508_vm0, %v716_v58  ;;  %2858 = vmatmul.msk.bf16.vlgmr.msra.gmra.mxu0 %vm508_vm0, %v2946_v11 }
 0x17c   : > { %2832 = vmatmul.msk.bf16.gmra.mxu1 %vm508_vm0, %v716_v58  ;;  %v702_v27 = vmul.f32 %v3836_v57, %v691_v21 }
 0x17e   : > { %v713_v33 = vadd.f32 %v3843_v31, %v702_v27 }
 0x1bf   : > { %v584_v4 = vpop.xlane.xlu2 %583 }
 0x1c0   : > { %v594_v5 = vmul.f32 %v584_v4, %v3738_v25 }
 0x1c2   : > { %v602_v8 = vadd.f32 1e-05, %v594_v5 }
 0x1c4   : > { %3144 = vrsqrt.f32 %v602_v8  ;;  %vm670_vm9 = vweird.f32 %v602_v8 }
 0x1ca   : > { %v3145_v14 = vpop.eup %3144 }
 0x1cb   : > { %v665_v16 = vmul.f32 %v3145_v14, %v602_v8  ;;  %vm671_vm8 = vweird.f32 %v3145_v14 }
 0x1cc   : > { %vm672_vm10 = vmor %vm670_vm9, %vm671_vm8 }
 0x1cd   : > { %v666_v18 = vmul.f32 %v3145_v14, %v665_v16 }
 0x1cf   : > { %v667_v10 = vmul.f32 0.5, %v666_v18 }
 0x1d1   : > { %v668_v20 = vsub.f32 1.5, %v667_v10 }
 0x1d3   : > { %v669_v22 = vmul.f32 %v3145_v14, %v668_v20 }
 0x1d5   : > { %v673_v24 = vsel %vm672_vm10, %v3145_v14, %v669_v22 }
 0x1d6   : > { %v690_v26 = vmul.f32 %v673_v24, %v3817_v35  ;;  %v882_v20 = vpop.f32.mrf.mxu2 }
 0x1d7   : > { %v915_v21 = vpack.c.bf16 %v882_v20, %v882_v20 }
 0x1d8   : > { %v755_v28 = vpop.f32.mrf.mxu0  ;;  %v701_v29 = vmul.f32 %v3836_v57, %v690_v26 }
 0x1d9   : > { %v897_v59 = vpack.c.bf16 %v755_v28, %v755_v28  ;;  %v1160_v24 = vunpack.c.l.b16 %v915_v21 }
 0x1da   : > { %v712_v32 = vadd.f32 %v3843_v31, %v701_v29 }
 0x1db   : > { %v925_v37 = vunpack.c.l.b16 %v897_v59 }
 0x1dc   : > { %v717_v23 = vpack.c.bf16 %v713_v33, %v712_v32 }
 0x1de   : > { %2821 = vmatmul.msk.bf16.gmra.mxu3 %vm508_vm0, %v717_v23  ;;  %2833 = vmatmul.msk.bf16.gmra.mxu1 %vm508_vm0, %v717_v23  ;;  %v884_v22 = vpop.f32.mrf.mxu2 }
 0x1df   : > { %v916_v26 = vpack.c.bf16 %v884_v22, %v884_v22 }
 0x1e0   : > { %v757_v34 = vpop.f32.mrf.mxu0 }
 0x1e1   : > { %v898_v36 = vpack.c.bf16 %v757_v34, %v757_v34  ;;  %v1161_v27 = vunpack.c.l.b16 %v916_v26 }
 0x1e3   : > { %v926_v40 = vunpack.c.l.b16 %v898_v36  ;;  %v3934_v28 = vpack.c.b16 %v1161_v27, %v1160_v24 }
 0x1e5   : > { %v3902_v35 = vpack.c.b16 %v926_v40, %v925_v37  ;;  %1174 = vmatpush.bf16.msrb.mxu1 %v3934_v28 }
 0x1e6   : > { %v887_v29 = vpop.f32.mrf.mxu2 }
 0x1e7   : > { %1253 = vrot.lane.b32.xlu1 %v3902_v35, %s3492_s16  ;;  %v917_v32 = vpack.c.bf16 %v887_v29, %v887_v29 }
 0x1e8   : > { %v800_v57 = vpop.f32.mrf.mxu0 }
 0x1e9   : > { %v805_v42 = vpop.f32.mrf.mxu1  ;;  %v905_v43 = vpack.c.bf16 %v800_v57, %v800_v57  ;;  %v1188_v23 = vunpack.c.l.b16 %v917_v32 }
 0x1ea   : > { %v907_v31 = vpack.c.bf16 %v805_v42, %v805_v42 }
 0x1eb   : > { %v930_v38 = vunpack.c.l.b16 %v905_v43 }
 0x1ec   : > { %v961_v52 = vunpack.c.l.b16 %v907_v31 }
 0x1ee   : > { %v760_v50 = vpop.f32.mrf.mxu3  ;;  %v889_v33 = vpop.f32.mrf.mxu2 }
 0x1ef   : > { %v899_v4 = vpack.c.bf16 %v760_v50, %v760_v50  ;;  %v918_v59 = vpack.c.bf16 %v889_v33, %v889_v33 }
 0x1f0   : > { %v802_v30 = vpop.f32.mrf.mxu0 }
 0x1f1   : > { %v906_v44 = vpack.c.bf16 %v802_v30, %v802_v30  ;;  %v807_v45 = vpop.f32.mrf.mxu1  ;;  %v956_v11 = vunpack.c.l.b16 %v899_v4  ;;  %v1189_v34 = vunpack.c.l.b16 %v918_v59 }
 0x1f2   : > { %v908_v46 = vpack.c.bf16 %v807_v45, %v807_v45 }
 0x1f3   : > { %v931_v51 = vunpack.c.l.b16 %v906_v44  ;;  %v3937_v36 = vpack.c.b16 %v1189_v34, %v1188_v23 }
 0x1f4   : > { %v962_v41 = vunpack.c.l.b16 %v908_v46 }
 0x1f5   : > { %v3906_v53 = vpack.c.b16 %v931_v51, %v930_v38  ;;  %1202 = vmatpush.bf16.msrb.mxu2 %v3937_v36 }
 0x1f6   : > { %v3908_v54 = vpack.c.b16 %v962_v41, %v961_v52  ;;  %v762_v60 = vpop.f32.mrf.mxu3 }
 0x1f7   : > { %v938_v55 = vsel %vm933_vm11, %v3906_v53, 0  ;;  %v900_v0 = vpack.c.bf16 %v762_v60, %v762_v60 }
 0x1f8   : > { %1279 = vrot.lane.b32.xlu0 %v3908_v54, %s3492_s16  ;;  %947 = vmatpush.bf16.xpose.msrb.mxu3 %v938_v55  ;;  %v968_v56 = vsel %vm933_vm11, %v3908_v54, 0  ;;  %v877_v37 = vpop.f32.mrf.mxu0 }
 0x1f9   : > { %v810_v58 = vpop.f32.mrf.mxu1  ;;  %v957_v9 = vunpack.c.l.b16 %v900_v0  ;;  %v913_v40 = vpack.c.bf16 %v877_v37, %v877_v37 }
 0x1fa   : > { %v909_v48 = vpack.c.bf16 %v810_v58, %v810_v58 }
 0x1fb   : > { %v3926_v39 = vpack.c.b16 %v957_v9, %v956_v11  ;;  %v1132_v42 = vunpack.c.l.b16 %v913_v40  ;;  %v2949_v9 = vld [vmem:[%s3691_s28 + $0x18] sm:$0xff]  ;;  %v2967_v11 = vld [vmem:[#allocation5] sm:$0xff]   ;;  %s3493_s28 = smov 112  }
 0x1fc   : > { %v991_v62 = vunpack.c.l.b16 %v909_v48  ;;  %2861 = vmatmul.msk.bf16.gmra.mxu2 %vm508_vm0, %v2949_v9 }
 0x1fe   : > { %v765_v5 = vpop.f32.mrf.mxu3 }
 0x1ff   : > { %2862 = vmatmul.msk.bf16.vlgmr.msrb.gmra.mxu3 %vm933_vm11, %v3902_v35  ;;  %v901_v16 = vpack.c.bf16 %v765_v5, %v765_v5 }
 0x200   : > { %977 = vmatpush.bf16.xpose.msra.mxu3 %v968_v56  ;;  %1255 = vrot.lane.b32.xlu0 %v3906_v53, %s3492_s16  ;;  %v879_v57 = vpop.f32.mrf.mxu0 }
 0x201   : > { %v812_v49 = vpop.f32.mrf.mxu1  ;;  %v986_v19 = vunpack.c.l.b16 %v901_v16  ;;  %v914_v43 = vpack.c.bf16 %v879_v57, %v879_v57 }
 0x202   : > { %v910_v61 = vpack.c.bf16 %v812_v49, %v812_v49 }
 0x203   : > { %v1133_v31 = vunpack.c.l.b16 %v914_v43 }
 0x204   : > { %v992_v63 = vunpack.c.l.b16 %v910_v61 }
 0x205   : > { %v3940_v30 = vpack.c.b16 %v1133_v31, %v1132_v42 }
 0x206   : > { %v3920_v1 = vpack.c.b16 %v992_v63, %v991_v62  ;;  %v767_v14 = vpop.f32.mrf.mxu3 }
 0x207   : > { %v902_v15 = vpack.c.bf16 %v767_v14, %v767_v14  ;;  %1146 = vmatpush.bf16.msrb.mxu0 %v3940_v30  ;;  %v3956_v14 = vunpack.c.l.bf16 %v2967_v11 }
 0x208   : > { %1303 = vrot.lane.b32.xlu2 %v3920_v1, %s3492_s16  ;;  %v998_v8 = vsel %vm933_vm11, %v3920_v1, 0 }
 0x209   : > { %1007 = vmatpush.bf16.xpose.msrb.mxu3 %v998_v8  ;;  %v987_v18 = vunpack.c.l.b16 %v902_v15 }
 0x20b   : > { %v3930_v10 = vpack.c.b16 %v987_v18, %v986_v19  ;;  %v3960_v19 = vunpack.c.h.bf16 %v2967_v11 }
 0x20f   : > { %2863 = vmatmul.msk.bf16.vlgmr.msra.gmra.mxu3 %vm933_vm11, %v3926_v39 }
 0x21f   : > { %2864 = vmatmul.msk.bf16.vlgmr.msrb.gmra.mxu3 %vm933_vm11, %v3930_v10 }
 0x259   : > { %v1254_v42 = vpop.permute.xlu1 %1253 }
 0x25b   : > { %v815_v44 = vpop.f32.mrf.mxu1 }
 0x25c   : > { %v911_v46 = vpack.c.bf16 %v815_v44, %v815_v44 }
 0x25e   : > { %v1021_v41 = vunpack.c.l.b16 %v911_v46 }
 0x261   : > { %v770_v45 = vpop.f32.mrf.mxu3 }
 0x262   : > { %v1304_v38 = vpop.permute.xlu2 %1303  ;;  %v903_v60 = vpack.c.bf16 %v770_v45, %v770_v45 }
 0x263   : > { %v1309_v51 = vsel %vm933_vm11, %v1304_v38, 0  ;;  %v817_v52 = vpop.f32.mrf.mxu1 }
 0x264   : > { %v912_v50 = vpack.c.bf16 %v817_v52, %v817_v52  ;;  %1318 = vmatpush.bf16.xpose.msra.mxu2 %v1309_v51  ;;  %v1016_v0 = vunpack.c.l.b16 %v903_v60 }
 0x266   : > { %v1022_v55 = vunpack.c.l.b16 %v912_v50 }
 0x268   : > { %v3944_v56 = vpack.c.b16 %v1022_v55, %v1021_v41 }
 0x269   : > { %v772_v58 = vpop.f32.mrf.mxu3 }
 0x26a   : > { %v904_v48 = vpack.c.bf16 %v772_v58, %v772_v58  ;;  %v1280_v49 = vpop.permute.xlu0 %1279  ;;  %v1028_v61 = vsel %vm933_vm11, %v3944_v56, 0 }
 0x26b   : > { %v1285_v62 = vsel %vm933_vm11, %v1280_v49, 0  ;;  %1037 = vmatpush.bf16.xpose.msra.mxu3 %v1028_v61 }
 0x26c   : > { %v1017_v63 = vunpack.c.l.b16 %v904_v48  ;;  %1294 = vmatpush.bf16.xpose.msra.mxu1 %v1285_v62 }
 0x26e   : > { %v3949_v4 = vpack.c.b16 %v1017_v63, %v1016_v0 }
 0x272   : > { %v1256_v5 = vpop.permute.xlu0 %1255  ;;  %2865 = vmatmul.msk.bf16.vlgmr.msra.gmra.mxu3 %vm933_vm11, %v3949_v4 }
 0x273   : > { %v1261_v8 = vsel %vm933_vm11, %v1256_v5, 0 }
 0x274   : > { %1270 = vmatpush.bf16.xpose.msra.mxu0 %v1261_v8 }
 0x27f   : > { %v892_v58 = vpop.f32.mrf.mxu2 }
 0x280   : > { %v919_v48 = vpack.c.bf16 %v892_v58, %v892_v58 }
 0x282   : > { %v949_v15 = vpop.f32.mrf.mxu3  ;;  %v1216_v63 = vunpack.c.l.b16 %v919_v48 }
 0x283   : > { %v950_v16 = vadd.f32 %v3956_v14, %v949_v15 }
 0x285   : > { %v1045_v18 = vsel %vm1044_vm12, %v950_v16, -inf }
 0x286   : > { %1046 = vmax.xlane.f32.xlu1 %v1045_v18 }
 0x287   : > { %v894_v61 = vpop.f32.mrf.mxu2 }
 0x288   : > { %v920_v0 = vpack.c.bf16 %v894_v61, %v894_v61 }
 0x28a   : > { %v951_v20 = vpop.f32.mrf.mxu3  ;;  %v1217_v9 = vunpack.c.l.b16 %v920_v0 }
 0x28b   : > { %v952_v21 = vadd.f32 %v3960_v19, %v951_v20 }
 0x28d   : > { %v1048_v22 = vsel %vm1044_vm12, %v952_v21, -inf }
 0x28e   : > { %1049 = vmax.xlane.f32.xlu2 %v1048_v22 }
 0x292   : > { %v979_v24 = vpop.f32.mrf.mxu3 }
 0x293   : > { %v3980_v40 = vadd.f32 %v3956_v14, %v979_v24 }
 0x295   : > { %v1051_v57 = vsel %vm1044_vm12, %v3980_v40, -inf }
 0x29a   : > { %v981_v26 = vpop.f32.mrf.mxu3 }
 0x29b   : > { %v3965_v27 = vadd.f32 %v3960_v19, %v981_v26 }
 0x29d   : > { %v1054_v29 = vsel %vm1044_vm12, %v3965_v27, -inf }
 0x29e   : > { %1055 = vmax.xlane.f32.xlu0 %v1054_v29 }
 0x2a2   : > { %v1009_v32 = vpop.f32.mrf.mxu3 }
 0x2a3   : > { %v1010_v33 = vadd.f32 %v3956_v14, %v1009_v32 }
 0x2a5   : > { %v1057_v23 = vsel %vm1044_vm12, %v1010_v33, -inf }
 0x2a6   : > { %1301 = vrot.lane.b32.xlu2 %v3930_v10, %s3492_s16  ;;  %1058 = vmax.xlane.f32.xlu0 %v1057_v23 }
 0x2aa   : > { %v1011_v59 = vpop.f32.mrf.mxu3 }
 0x2ab   : > { %v1012_v34 = vadd.f32 %v3960_v19, %v1011_v59 }
 0x2ad   : > { %v1060_v37 = vsel %vm1044_vm12, %v1012_v34, -inf }
 0x2ae   : > { %1061 = vmax.xlane.f32.xlu1 %v1060_v37 }
 0x2ba   : > { %1327 = vrot.lane.b32.xlu0 %v3944_v56, %s3492_s16 }
 0x2c2   : > { %1434 = vrot.lane.b32.xlu0 %v3940_v30, %s3492_s16 }
 0x2cf   : > { %1052 = vmax.xlane.f32.xlu2 %v1051_v57 }
 0x2f5   : > { %v1039_v43 = vpop.f32.mrf.mxu3 }
 0x2f6   : > { %v3985_v31 = vadd.f32 %v3956_v14, %v1039_v43 }
 0x2f8   : > { %v1063_v44 = vsel %vm1044_vm12, %v3985_v31, -inf }
 0x2f9   : > { %1064 = vmax.xlane.f32.xlu1 %v1063_v44  ;;  %v1047_v45 = vpop.xlane.xlu1 %1046 }
 0x2fa   : > { %v1069_v46 = vsub.f32 %v950_v16, %v1047_v45  ;;  %v4002_v16 = vpack.c.b16 %v1217_v9, %v1216_v63 }
 0x2fc   : > { %v1077_v51 = vmul.f32 1.442695, %v1069_v46  ;;  %1230 = vmatpush.bf16.msrb.mxu3 %v4002_v16 }
 0x2fd   : > { %v1041_v38 = vpop.f32.mrf.mxu3 }
 0x2fe   : > { %v3990_v52 = vadd.f32 %v3960_v19, %v1041_v38  ;;  %3146 = vpow2.f32 %v1077_v51 }
 0x300   : > { %v1066_v50 = vsel %vm1044_vm12, %v3990_v52, -inf }
 0x301   : > { %v1050_v41 = vpop.xlane.xlu2 %1049  ;;  %1067 = vmax.xlane.f32.xlu2 %v1066_v50 }
 0x302   : > { %v1070_v55 = vsub.f32 %v952_v21, %v1050_v41 }
 0x304   : > { %v1079_v60 = vmul.f32 1.442695, %v1070_v55  ;;  %v3994_v49 = vpop.eup %3146 }
 0x305   : > { %v1117_v62 = vpack.c.bf16 %v3994_v49, %v3994_v49 }
 0x306   : > { %3148 = vpow2.f32 %v1079_v60 }
 0x307   : > { %v1127_v11 = vunpack.c.l.b16 %v1117_v62 }
 0x309   : > { %v1302_v45 = vpop.permute.xlu2 %1301 }
 0x30c   : > { %v3998_v5 = vpop.eup %3148 }
 0x30d   : > { %v1118_v8 = vpack.c.bf16 %v3998_v5, %v3998_v5 }
 0x30f   : > { %v1128_v15 = vunpack.c.l.b16 %v1118_v8 }
 0x311   : > { %v1129_v18 = vpack.c.b16 %v1128_v15, %v1127_v11  ;;  %v1056_v20 = vpop.xlane.xlu0 %1055 }
 0x312   : > { %1277 = vrot.lane.b32.xlu1 %v3926_v39, %s3492_s16  ;;  %v1072_v46 = vsub.f32 %v3965_v27, %v1056_v20 }
 0x313   : > { %2866 = vmatmul.msk.bf16.vlgmr.msrb.gmra.mxu0 %vm1044_vm12, %v1129_v18 }
 0x314   : > { %v1083_v38 = vmul.f32 1.442695, %v1072_v46 }
 0x319   : > { %v1059_v21 = vpop.xlane.xlu0 %1058  ;;  %1325 = vrot.lane.b32.xlu2 %v3949_v4, %s3492_s16 }
 0x31a   : > { %v1073_v22 = vsub.f32 %v1010_v33, %v1059_v21  ;;  %1484 = vrot.lane.b32.xlu1 %v3937_v36, %s3492_s16 }
 0x31c   : > { %v1085_v24 = vmul.f32 1.442695, %v1073_v22 }
 0x31e   : > { %3150 = vpow2.f32 %v1085_v24 }
 0x321   : > { %1547 = vrot.lane.b32.xlu2 %v3906_v53, %s3493_s28  ;;  %v1062_v26 = vpop.xlane.xlu1 %1061 }
 0x322   : > { %v1074_v29 = vsub.f32 %v1012_v34, %v1062_v26  ;;  %1459 = vrot.lane.b32.xlu1 %v3934_v28, %s3492_s16 }
 0x323   : > { %2870 = vmatmul.msk.bf16.vlgmr.msra.gmra.mxu0 %vm933_vm11, %v1254_v42 }
 0x324   : > { %v1087_v32 = vmul.f32 1.442695, %v1074_v29  ;;  %v4017_v23 = vpop.eup %3150 }
 0x325   : > { %v1121_v33 = vpack.c.bf16 %v4017_v23, %v4017_v23 }
 0x326   : > { %3152 = vpow2.f32 %v1087_v32 }
 0x327   : > { %v1183_v42 = vunpack.c.l.b16 %v1121_v33  ;;  %3154 = vpow2.f32 %v1083_v38 }
 0x32a   : > { %1545 = vrot.lane.b32.xlu1 %v3902_v35, %s3493_s28 }
 0x32c   : > { %v4023_v59 = vpop.eup %3152  ;;  %v1328_v37 = vpop.permute.xlu0 %1327 }
 0x32d   : > { %v1122_v34 = vpack.c.bf16 %v4023_v59, %v4023_v59  ;;  %v1333_v57 = vsel %vm933_vm11, %v1328_v37, 0  ;;  %v4034_v55 = vpop.eup %3154 }
 0x32e   : > { %1342 = vmatpush.bf16.xpose.msra.mxu3 %v1333_v57  ;;  %v1120_v58 = vpack.c.bf16 %v4034_v55, %v4034_v55 }
 0x32f   : > { %v1184_v43 = vunpack.c.l.b16 %v1122_v34 }
 0x330   : > { %v1156_v27 = vunpack.c.l.b16 %v1120_v58 }
 0x331   : > { %v1185_v44 = vpack.c.b16 %v1184_v43, %v1183_v42 }
 0x332   : > { %1595 = vrot.lane.b32.xlu1 %v3920_v1, %s3493_s28 }
 0x333   : > { %2868 = vmatmul.msk.bf16.vlgmr.msrb.gmra.mxu2 %vm1044_vm12, %v1185_v44 }
 0x342   : > { %v1053_v51 = vpop.xlane.xlu2 %1052 }
 0x343   : > { %v1071_v50 = vsub.f32 %v3980_v40, %v1053_v51  ;;  %2872 = vmatmul.msk.bf16.vlgmr.msra.gmra.mxu2 %vm933_vm11, %v1302_v45  ;;  %v1435_v40 = vpop.permute.xlu0 %1434 }
 0x344   : > { %1447 = vmatpush.bf16.msrb.mxu0 %v1435_v40 }
 0x345   : > { %v1081_v41 = vmul.f32 1.442695, %v1071_v50 }
 0x347   : > { %3156 = vpow2.f32 %v1081_v41 }
 0x34d   : > { %v4038_v60 = vpop.eup %3156 }
 0x34e   : > { %v1119_v48 = vpack.c.bf16 %v4038_v60, %v4038_v60 }
 0x350   : > { %v1155_v61 = vunpack.c.l.b16 %v1119_v48 }
 0x352   : > { %v1157_v62 = vpack.c.b16 %v1156_v27, %v1155_v61 }
 0x354   : > { %2867 = vmatmul.msk.bf16.vlgmr.msrb.gmra.mxu1 %vm1044_vm12, %v1157_v62 }
 0x36c   : > { %v1065_v63 = vpop.xlane.xlu1 %1064 }
 0x36d   : > { %v1075_v0 = vsub.f32 %v3985_v31, %v1065_v63 }
 0x36f   : > { %v1089_v8 = vmul.f32 1.442695, %v1075_v0 }
 0x371   : > { %3158 = vpow2.f32 %v1089_v8 }
 0x374   : > { %v1068_v9 = vpop.xlane.xlu2 %1067 }
 0x375   : > { %v1076_v11 = vsub.f32 %v3990_v52, %v1068_v9 }
 0x377   : > { %v1091_v15 = vmul.f32 1.442695, %v1076_v11  ;;  %v4045_v18 = vpop.eup %3158 }
 0x378   : > { %v1123_v21 = vpack.c.bf16 %v4045_v18, %v4045_v18 }
 0x379   : > { %3160 = vpow2.f32 %v1091_v15 }
 0x37a   : > { %v1211_v26 = vunpack.c.l.b16 %v1123_v21 }
 0x37c   : > { %v1326_v20 = vpop.permute.xlu2 %1325 }
 0x37f   : > { %v4049_v22 = vpop.eup %3160 }
 0x380   : > { %v1124_v24 = vpack.c.bf16 %v4049_v22, %v4049_v22 }
 0x382   : > { %v1212_v31 = vunpack.c.l.b16 %v1124_v24 }
 0x384   : > { %v1213_v29 = vpack.c.b16 %v1212_v31, %v1211_v26  ;;  %v1548_v32 = vpop.permute.xlu2 %1547  ;;  %v1278_v33 = vpop.permute.xlu1 %1277 }
 0x385   : > { %v1553_v52 = vsel %vm933_vm11, %v1548_v32, 0  ;;  %2871 = vmatmul.msk.bf16.vlgmr.msra.gmra.mxu1 %vm933_vm11, %v1278_v33 }
 0x386   : > { %2869 = vmatmul.msk.bf16.vlgmr.msrb.gmra.mxu3 %vm1044_vm12, %v1213_v29  ;;  %1562 = vmatpush.bf16.xpose.msra.mxu0 %v1553_v52 }
 0x38c   : > { %v1485_v37 = vpop.permute.xlu1 %1484 }
 0x38d   : > { %1497 = vmatpush.bf16.msrb.mxu2 %v1485_v37 }
 0x390   : > { %v4056_v34 = vpop.f32.mrf.mxu0 }
 0x394   : > { %v1460_v57 = vpop.permute.xlu1 %1459 }
 0x395   : > { %1472 = vmatpush.bf16.msrb.mxu1 %v1460_v57 }
 0x396   : > { %2873 = vmatmul.msk.bf16.vlgmr.msra.gmra.mxu3 %vm933_vm11, %v1326_v20 }
 0x398   : > { %v4059_v42 = vpop.f32.mrf.mxu0 }
 0x39c   : > { %v4061_v43 = vpop.permute.xlu1 %1545 }
 0x3a0   : > { %v1272_v44 = vpop.f32.mrf.mxu0 }
 0x3a1   : > { %v1273_v45 = vadd.f32 %v3956_v14, %v1272_v44 }
 0x3a3   : > { %v1349_v46 = vsel %vm1044_vm12, %v1273_v45, -inf }
 0x3a4   : > { %1350 = vmax.xlane.f32.xlu1 %v1349_v46  ;;  %v1596_v38 = vpop.permute.xlu1 %1595 }
 0x3a5   : > { %v1601_v51 = vsel %vm933_vm11, %v1596_v38, 0 }
 0x3a6   : > { %1610 = vmatpush.bf16.xpose.msra.mxu2 %v1601_v51 }
 0x3a8   : > { %v1274_v50 = vpop.f32.mrf.mxu0 }
 0x3a9   : > { %v1275_v41 = vadd.f32 %v3960_v19, %v1274_v50 }
 0x3ab   : > { %v1352_v58 = vsel %vm1044_vm12, %v1275_v41, -inf }
 0x3ac   : > { %1353 = vmax.xlane.f32.xlu0 %v1352_v58 }
 0x3b6   : > { %v4074_v48 = vpop.f32.mrf.mxu2 }
 0x3bd   : > { %1509 = vrot.lane.b32.xlu1 %v4002_v16, %s3492_s16 }
 0x3be   : > { %v4078_v61 = vpop.f32.mrf.mxu2 }
 0x3c0   : > { %1571 = vrot.lane.b32.xlu0 %v3908_v54, %s3493_s28 }
 0x3c5   : > { %1593 = vrot.lane.b32.xlu1 %v3930_v10, %s3493_s28 }
 0x3c6   : > { %v1320_v0 = vpop.f32.mrf.mxu2 }
 0x3c7   : > { %v4085_v9 = vadd.f32 %v3956_v14, %v1320_v0 }
 0x3c9   : > { %v1361_v24 = vsel %vm1044_vm12, %v4085_v9, -inf }
 0x3ce   : > { %v1322_v26 = vpop.f32.mrf.mxu2 }
 0x3cf   : > { %v1323_v31 = vadd.f32 %v3960_v19, %v1322_v26 }
 0x3d1   : > { %v4076_v27 = vpop.f32.mrf.mxu1  ;;  %v1364_v32 = vsel %vm1044_vm12, %v1323_v31, -inf }
 0x3d9   : > { %v4080_v62 = vpop.f32.mrf.mxu1 }
 0x402   : > { %v1296_v40 = vpop.f32.mrf.mxu1 }
 0x403   : > { %v1297_v63 = vadd.f32 %v3956_v14, %v1296_v40 }
 0x405   : > { %v1355_v8 = vsel %vm1044_vm12, %v1297_v63, -inf }
 0x406   : > { %1356 = vmax.xlane.f32.xlu2 %v1355_v8 }
 0x409   : > { %v4087_v11 = vpop.f32.mrf.mxu3 }
 0x40a   : > { %v1298_v15 = vpop.f32.mrf.mxu1 }
 0x40b   : > { %v1299_v20 = vadd.f32 %v3960_v19, %v1298_v15 }
 0x40d   : > { %v1358_v21 = vsel %vm1044_vm12, %v1299_v20, -inf }
 0x40e   : > { %1359 = vmax.xlane.f32.xlu1 %v1358_v21  ;;  %1362 = vmax.xlane.f32.xlu2 %v1361_v24 }
 0x411   : > { %v4094_v29 = vpop.f32.mrf.mxu3 }
 0x416   : > { %1365 = vmax.xlane.f32.xlu1 %v1364_v32 }
 0x417   : > { %v1351_v33 = vpop.xlane.xlu1 %1350 }
 0x418   : > { %v1373_v52 = vsub.f32 %v1273_v45, %v1351_v33 }
 0x419   : > { %v1344_v37 = vpop.f32.mrf.mxu3 }
 0x41a   : > { %v4098_v57 = vadd.f32 %v3956_v14, %v1344_v37  ;;  %v1381_v44 = vmul.f32 1.442695, %v1373_v52 }
 0x41c   : > { %v1367_v46 = vsel %vm1044_vm12, %v4098_v57, -inf  ;;  %3162 = vpow2.f32 %v1381_v44 }
 0x41d   : > { %1368 = vmax.xlane.f32.xlu0 %v1367_v46 }
 0x41f   : > { %v1354_v38 = vpop.xlane.xlu0 %1353 }
 0x420   : > { %v1374_v51 = vsub.f32 %v1275_v41, %v1354_v38 }
 0x421   : > { %v1346_v50 = vpop.f32.mrf.mxu3 }
 0x422   : > { %v1383_v58 = vmul.f32 1.442695, %v1374_v51  ;;  %v4103_v40 = vadd.f32 %v3960_v19, %v1346_v50  ;;  %v4107_v0 = vpop.eup %3162 }
 0x423   : > { %v1421_v8 = vpack.c.bf16 %v4107_v0, %v4107_v0 }
 0x424   : > { %3164 = vpow2.f32 %v1383_v58  ;;  %v1370_v45 = vsel %vm1044_vm12, %v4103_v40, -inf }
 0x425   : > { %1371 = vmax.xlane.f32.xlu2 %v1370_v45  ;;  %v1431_v21 = vunpack.c.l.b16 %v1421_v8 }
 0x42a   : > { %v4111_v15 = vpop.eup %3164 }
 0x42b   : > { %v1422_v41 = vpack.c.bf16 %v4111_v15, %v4111_v15 }
 0x42d   : > { %v1432_v24 = vunpack.c.l.b16 %v1422_v41 }
 0x42f   : > { %v1433_v26 = vpack.c.b16 %v1432_v24, %v1431_v21  ;;  %1619 = vrot.lane.b32.xlu1 %v3944_v56, %s3493_s28  ;;  %v1510_v32 = vpop.permute.xlu1 %1509 }
 0x430   : > { %1522 = vmatpush.bf16.msrb.mxu3 %v1510_v32 }
 0x431   : > { %1617 = vrot.lane.b32.xlu0 %v3949_v4, %s3493_s28  ;;  %2874 = vmatmul.msk.bf16.vlgmr.msrb.gmra.mxu0 %vm1044_vm12, %v1433_v26 }
 0x432   : > { %v1572_v33 = vpop.permute.xlu0 %1571 }
 0x433   : > { %v1577_v52 = vsel %vm933_vm11, %v1572_v33, 0 }
 0x434   : > { %1586 = vmatpush.bf16.xpose.msra.mxu1 %v1577_v52 }
 0x439   : > { %1839 = vrot.lane.b32.xlu0 %v3906_v53, %s3494_s18  ;;  %v1594_v53 = vpop.permute.xlu1 %1593 }
 0x43d   : > { %1569 = vrot.lane.b32.xlu2 %v3926_v39, %s3493_s28 }
 0x441   : > { %2878 = vmatmul.msk.bf16.vlgmr.msra.gmra.mxu0 %vm933_vm11, %v4061_v43 }
 0x445   : > { %1726 = vrot.lane.b32.xlu2 %v3940_v30, %s3493_s28 }
 0x44d   : > { %1837 = vrot.lane.b32.xlu2 %v3902_v35, %s3494_s18 }
 0x455   : > { %1863 = vrot.lane.b32.xlu2 %v3908_v54, %s3494_s18 }
 0x45d   : > { %1887 = vrot.lane.b32.xlu2 %v3920_v1, %s3494_s18 }
 0x465   : > { %1861 = vrot.lane.b32.xlu2 %v3926_v39, %s3494_s18 }
 0x46d   : > { %1801 = vrot.lane.b32.xlu2 %v4002_v16, %s3493_s28 }
 0x479   : > { %v1357_v43 = vpop.xlane.xlu2 %1356 }
 0x47a   : > { %v1375_v37 = vsub.f32 %v1297_v63, %v1357_v43 }
 0x47c   : > { %v1385_v44 = vmul.f32 1.442695, %v1375_v37 }
 0x47e   : > { %3166 = vpow2.f32 %v1385_v44 }
 0x481   : > { %v1363_v46 = vpop.xlane.xlu2 %1362  ;;  %v1360_v38 = vpop.xlane.xlu1 %1359 }
 0x482   : > { %v1377_v35 = vsub.f32 %v4085_v9, %v1363_v46  ;;  %v1376_v51 = vsub.f32 %v1299_v20, %v1360_v38 }
 0x484   : > { %v1387_v54 = vmul.f32 1.442695, %v1376_v51  ;;  %v1389_v50 = vmul.f32 1.442695, %v1377_v35  ;;  %v4140_v1 = vpop.eup %3166 }
 0x485   : > { %v1423_v45 = vpack.c.bf16 %v4140_v1, %v4140_v1 }
 0x486   : > { %3168 = vpow2.f32 %v1387_v54 }
 0x487   : > { %3170 = vpow2.f32 %v1389_v50  ;;  %v1456_v20 = vunpack.c.l.b16 %v1423_v45 }
 0x489   : > { %v1366_v58 = vpop.xlane.xlu1 %1365 }
 0x48a   : > { %v1378_v39 = vsub.f32 %v1323_v31, %v1366_v58 }
 0x48c   : > { %v1391_v8 = vmul.f32 1.442695, %v1378_v39  ;;  %v4144_v63 = vpop.eup %3168 }
 0x48d   : > { %v1424_v41 = vpack.c.bf16 %v4144_v63, %v4144_v63  ;;  %v4148_v9 = vpop.eup %3170 }
 0x48e   : > { %3172 = vpow2.f32 %v1391_v8  ;;  %v1425_v31 = vpack.c.bf16 %v4148_v9, %v4148_v9 }
 0x48f   : > { %v1457_v21 = vunpack.c.l.b16 %v1424_v41 }
 0x490   : > { %v1369_v24 = vpop.xlane.xlu0 %1368  ;;  %v1481_v37 = vunpack.c.l.b16 %v1425_v31 }
 0x491   : > { %v1379_v26 = vsub.f32 %v4098_v57, %v1369_v24  ;;  %v1458_v32 = vpack.c.b16 %v1457_v21, %v1456_v20 }
 0x493   : > { %2875 = vmatmul.msk.bf16.vlgmr.msrb.gmra.mxu1 %vm1044_vm12, %v1458_v32  ;;  %v1393_v43 = vmul.f32 1.442695, %v1379_v26 }
 0x494   : > { %v4153_v33 = vpop.eup %3172 }
 0x495   : > { %v1426_v52 = vpack.c.bf16 %v4153_v33, %v4153_v33  ;;  %3174 = vpow2.f32 %v1393_v43 }
 0x497   : > { %v1482_v44 = vunpack.c.l.b16 %v1426_v52 }
 0x498   : > { %v1372_v46 = vpop.xlane.xlu2 %1371 }
 0x499   : > { %v1483_v38 = vpack.c.b16 %v1482_v44, %v1481_v37  ;;  %v1380_v35 = vsub.f32 %v4103_v40, %v1372_v46 }
 0x49b   : > { %v1395_v57 = vmul.f32 1.442695, %v1380_v35  ;;  %2876 = vmatmul.msk.bf16.vlgmr.msrb.gmra.mxu2 %vm1044_vm12, %v1483_v38  ;;  %v4160_v51 = vpop.eup %3174 }
 0x49c   : > { %v1427_v58 = vpack.c.bf16 %v4160_v51, %v4160_v51 }
 0x49d   : > { %3176 = vpow2.f32 %v1395_v57 }
 0x49e   : > { %v1506_v41 = vunpack.c.l.b16 %v1427_v58 }
 0x4a0   : > { %v1570_v54 = vpop.permute.xlu2 %1569 }
 0x4a1   : > { %v1620_v50 = vpop.permute.xlu1 %1619 }
 0x4a2   : > { %v1625_v39 = vsel %vm933_vm11, %v1620_v50, 0 }
 0x4a3   : > { %v4165_v45 = vpop.eup %3176  ;;  %v1618_v8 = vpop.permute.xlu0 %1617  ;;  %1634 = vmatpush.bf16.xpose.msra.mxu3 %v1625_v39  ;;  %2879 = vmatmul.msk.bf16.vlgmr.msra.gmra.mxu1 %vm933_vm11, %v1570_v54 }
 0x4a4   : > { %v1428_v40 = vpack.c.bf16 %v4165_v45, %v4165_v45 }
 0x4a6   : > { %v1507_v20 = vunpack.c.l.b16 %v1428_v40 }
 0x4a8   : > { %v1508_v21 = vpack.c.b16 %v1507_v20, %v1506_v41  ;;  %v1727_v24 = vpop.permute.xlu2 %1726 }
 0x4a9   : > { %1739 = vmatpush.bf16.msrb.mxu0 %v1727_v24 }
 0x4aa   : > { %2877 = vmatmul.msk.bf16.vlgmr.msrb.gmra.mxu3 %vm1044_vm12, %v1508_v21 }
 0x4ab   : > { %v1840_v26 = vpop.permute.xlu0 %1839  ;;  %2880 = vmatmul.msk.bf16.vlgmr.msra.gmra.mxu2 %vm933_vm11, %v1594_v53 }
 0x4ac   : > { %v1845_v32 = vsel %vm933_vm11, %v1840_v26, 0 }
 0x4ad   : > { %1854 = vmatpush.bf16.xpose.msra.mxu0 %v1845_v32 }
 0x4ae   : > { %v4173_v31 = vpop.f32.mrf.mxu0 }
 0x4b0   : > { %v4175_v52 = vpop.permute.xlu2 %1837 }
 0x4b6   : > { %v4177_v43 = vpop.f32.mrf.mxu0 }
 0x4b8   : > { %v4179_v37 = vpop.permute.xlu2 %1863 }
 0x4ba   : > { %2881 = vmatmul.msk.bf16.vlgmr.msra.gmra.mxu3 %vm933_vm11, %v1618_v8 }
 0x4be   : > { %v1564_v44 = vpop.f32.mrf.mxu0 }
 0x4bf   : > { %v1565_v46 = vadd.f32 %v3956_v14, %v1564_v44 }
 0x4c0   : > { %v4183_v38 = vpop.permute.xlu2 %1887 }
 0x4c1   : > { %v1641_v53 = vsel %vm1044_vm12, %v1565_v46, -inf }
 0x4c2   : > { %1642 = vmax.xlane.f32.xlu1 %v1641_v53 }
 0x4c6   : > { %v1566_v35 = vpop.f32.mrf.mxu0 }
 0x4c7   : > { %v1567_v57 = vadd.f32 %v3960_v19, %v1566_v35 }
 0x4c8   : > { %v4187_v54 = vpop.permute.xlu2 %1861 }
 0x4c9   : > { %v1644_v50 = vsel %vm1044_vm12, %v1567_v57, -inf }
 0x4ca   : > { %1645 = vmax.xlane.f32.xlu0 %v1644_v50 }
 0x4d0   : > { %v1802_v58 = vpop.permute.xlu2 %1801 }
 0x4d1   : > { %1814 = vmatpush.bf16.msrb.mxu3 %v1802_v58 }
 0x4db   : > { %1751 = vrot.lane.b32.xlu1 %v3934_v28, %s3493_s28 }
 0x4de   : > { %1776 = vrot.lane.b32.xlu0 %v3937_v36, %s3493_s28 }
 0x510   : > { %v4194_v39 = vpop.f32.mrf.mxu1 }
 0x518   : > { %v4196_v8 = vpop.f32.mrf.mxu1 }
 0x51e   : > { %v4198_v40 = vpop.f32.mrf.mxu2 }
 0x520   : > { %v1588_v41 = vpop.f32.mrf.mxu1 }
 0x521   : > { %v1589_v20 = vadd.f32 %v3956_v14, %v1588_v41 }
 0x523   : > { %v1647_v21 = vsel %vm1044_vm12, %v1589_v20, -inf }
 0x524   : > { %1648 = vmax.xlane.f32.xlu2 %v1647_v21 }
 0x526   : > { %v4202_v24 = vpop.f32.mrf.mxu2 }
 0x528   : > { %v1590_v26 = vpop.f32.mrf.mxu1 }
 0x529   : > { %v1591_v32 = vadd.f32 %v3960_v19, %v1590_v26 }
 0x52b   : > { %v1650_v44 = vsel %vm1044_vm12, %v1591_v32, -inf }
 0x52c   : > { %1651 = vmax.xlane.f32.xlu1 %v1650_v44 }
 0x52d   : > { %v4206_v53 = vpop.f32.mrf.mxu3 }
 0x52e   : > { %v1612_v35 = vpop.f32.mrf.mxu2 }
 0x52f   : > { %v1613_v50 = vadd.f32 %v3956_v14, %v1612_v35 }
 0x531   : > { %v1653_v58 = vsel %vm1044_vm12, %v1613_v50, -inf }
 0x532   : > { %1654 = vmax.xlane.f32.xlu0 %v1653_v58 }
 0x535   : > { %v4210_v41 = vpop.f32.mrf.mxu3  ;;  %v1643_v17 = vpop.xlane.xlu1 %1642 }
 0x536   : > { %v1665_v21 = vsub.f32 %v1565_v46, %v1643_v17  ;;  %v1614_v47 = vpop.f32.mrf.mxu2 }
 0x537   : > { %v1615_v25 = vadd.f32 %v3960_v19, %v1614_v47 }
 0x538   : > { %v1673_v12 = vmul.f32 1.442695, %v1665_v21 }
 0x539   : > { %v1656_v26 = vsel %vm1044_vm12, %v1615_v25, -inf }
 0x53a   : > { %1657 = vmax.xlane.f32.xlu1 %v1656_v26  ;;  %3178 = vpow2.f32 %v1673_v12 }
 0x53c   : > { %1885 = vrot.lane.b32.xlu2 %v3930_v10, %s3494_s18 }
 0x53d   : > { %v1646_v44 = vpop.xlane.xlu0 %1645  ;;  %v1636_v13 = vpop.f32.mrf.mxu3 }
 0x53e   : > { %v1666_v35 = vsub.f32 %v1567_v57, %v1646_v44  ;;  %v1637_v58 = vadd.f32 %v3956_v14, %v1636_v13  ;;  %v1869_v44 = vsel %vm933_vm11, %v4179_v37, 0 }
 0x540   : > { %v1675_v6 = vmul.f32 1.442695, %v1666_v35  ;;  %v1659_v2 = vsel %vm1044_vm12, %v1637_v58, -inf  ;;  %v4218_v17 = vpop.eup %3178 }
 0x541   : > { %1660 = vmax.xlane.f32.xlu0 %v1659_v2  ;;  %v1713_v21 = vpack.c.bf16 %v4218_v17, %v4218_v17 }
 0x542   : > { %3180 = vpow2.f32 %v1675_v6 }
 0x543   : > { %v1723_v57 = vunpack.c.l.b16 %v1713_v21 }
 0x545   : > { %v1638_v47 = vpop.f32.mrf.mxu3 }
 0x546   : > { %v1639_v46 = vadd.f32 %v3960_v19, %v1638_v47  ;;  %v1893_v47 = vsel %vm933_vm11, %v4183_v38, 0 }
 0x548   : > { %v4223_v10 = vpop.eup %3180  ;;  %v1662_v12 = vsel %vm1044_vm12, %v1639_v46, -inf }
 0x549   : > { %v1714_v13 = vpack.c.bf16 %v4223_v10, %v4223_v10  ;;  %1663 = vmax.xlane.f32.xlu1 %v1662_v12 }
 0x54b   : > { %v1724_v26 = vunpack.c.l.b16 %v1714_v13 }
 0x54d   : > { %v1725_v2 = vpack.c.b16 %v1724_v26, %v1723_v57  ;;  %v1752_v6 = vpop.permute.xlu1 %1751 }
 0x54e   : > { %1764 = vmatpush.bf16.msrb.mxu1 %v1752_v6 }
 0x54f   : > { %2882 = vmatmul.msk.bf16.vlgmr.msrb.gmra.mxu0 %vm1044_vm12, %v1725_v2 }
 0x550   : > { %v1777_v35 = vpop.permute.xlu0 %1776 }
 0x551   : > { %1789 = vmatpush.bf16.msrb.mxu2 %v1777_v35 }
 0x552   : > { %1878 = vmatpush.bf16.xpose.msra.mxu1 %v1869_v44 }
 0x555   : > { %1902 = vmatpush.bf16.xpose.msra.mxu2 %v1893_v47  ;;  %1911 = vrot.lane.b32.xlu0 %v3944_v56, %s3494_s18 }
 0x55f   : > { %2886 = vmatmul.msk.bf16.vlgmr.msra.gmra.mxu0 %vm933_vm11, %v4175_v52 }
 0x562   : > { %1909 = vrot.lane.b32.xlu1 %v3949_v4, %s3494_s18 }
 0x56a   : > { %2018 = vrot.lane.b32.xlu1 %v3940_v30, %s3494_s18 }
 0x597   : > { %v1649_v37 = vpop.xlane.xlu2 %1648 }
 0x598   : > { %v1667_v21 = vsub.f32 %v1589_v20, %v1649_v37 }
 0x59a   : > { %v1677_v12 = vmul.f32 1.442695, %v1667_v21 }
 0x59c   : > { %3182 = vpow2.f32 %v1677_v12 }
 0x59f   : > { %v1652_v13 = vpop.xlane.xlu1 %1651 }
 0x5a0   : > { %v1668_v38 = vsub.f32 %v1591_v32, %v1652_v13 }
 0x5a2   : > { %v1679_v57 = vmul.f32 1.442695, %v1668_v38  ;;  %v4241_v56 = vpop.eup %3182 }
 0x5a3   : > { %v1715_v52 = vpack.c.bf16 %v4241_v56, %v4241_v56 }
 0x5a4   : > { %3184 = vpow2.f32 %v1679_v57 }
 0x5a5   : > { %v1655_v26 = vpop.xlane.xlu0 %1654  ;;  %v1748_v44 = vunpack.c.l.b16 %v1715_v52 }
 0x5a6   : > { %v1669_v2 = vsub.f32 %v1613_v50, %v1655_v26 }
 0x5a8   : > { %v1681_v6 = vmul.f32 1.442695, %v1669_v2 }
 0x5aa   : > { %v4245_v4 = vpop.eup %3184  ;;  %3186 = vpow2.f32 %v1681_v6 }
 0x5ab   : > { %v1716_v30 = vpack.c.bf16 %v4245_v4, %v4245_v4 }
 0x5ad   : > { %v1658_v20 = vpop.xlane.xlu1 %1657  ;;  %v1749_v35 = vunpack.c.l.b16 %v1716_v30 }
 0x5ae   : > { %v1670_v32 = vsub.f32 %v1615_v25, %v1658_v20 }
 0x5af   : > { %v1750_v47 = vpack.c.b16 %v1749_v35, %v1748_v44 }
 0x5b0   : > { %v1683_v37 = vmul.f32 1.442695, %v1670_v32  ;;  %v4250_v50 = vpop.eup %3186 }
 0x5b1   : > { %2883 = vmatmul.msk.bf16.vlgmr.msrb.gmra.mxu1 %vm1044_vm12, %v1750_v47  ;;  %v1717_v13 = vpack.c.bf16 %v4250_v50, %v4250_v50 }
 0x5b2   : > { %3188 = vpow2.f32 %v1683_v37 }
 0x5b3   : > { %v1773_v2 = vunpack.c.l.b16 %v1717_v13 }
 0x5b4   : > { %v1661_v21 = vpop.xlane.xlu0 %1660 }
 0x5b5   : > { %v1671_v12 = vsub.f32 %v1637_v58, %v1661_v21 }
 0x5b7   : > { %v1685_v26 = vmul.f32 1.442695, %v1671_v12 }
 0x5b8   : > { %v4254_v38 = vpop.eup %3188 }
 0x5b9   : > { %v1718_v57 = vpack.c.bf16 %v4254_v38, %v4254_v38  ;;  %3190 = vpow2.f32 %v1685_v26 }
 0x5bb   : > { %v1774_v25 = vunpack.c.l.b16 %v1718_v57 }
 0x5bc   : > { %v1664_v52 = vpop.xlane.xlu1 %1663 }
 0x5bd   : > { %v1775_v6 = vpack.c.b16 %v1774_v25, %v1773_v2  ;;  %v1672_v30 = vsub.f32 %v1639_v46, %v1664_v52 }
 0x5bf   : > { %v1687_v20 = vmul.f32 1.442695, %v1672_v30  ;;  %2884 = vmatmul.msk.bf16.vlgmr.msrb.gmra.mxu2 %vm1044_vm12, %v1775_v6  ;;  %v4261_v58 = vpop.eup %3190 }
 0x5c0   : > { %v1719_v44 = vpack.c.bf16 %v4261_v58, %v4261_v58 }
 0x5c1   : > { %3192 = vpow2.f32 %v1687_v20  ;;  %2887 = vmatmul.msk.bf16.vlgmr.msra.gmra.mxu1 %vm933_vm11, %v4187_v54  ;;  %v1886_v54 = vpop.permute.xlu2 %1885 }
 0x5c2   : > { %v1798_v37 = vunpack.c.l.b16 %v1719_v44 }
 0x5c7   : > { %v4265_v35 = vpop.eup %3192  ;;  %v1912_v32 = vpop.permute.xlu0 %1911 }
 0x5c8   : > { %v1720_v47 = vpack.c.bf16 %v4265_v35, %v4265_v35  ;;  %v1917_v46 = vsel %vm933_vm11, %v1912_v32, 0  ;;  %v1397_v32 = vsel %vm1044_vm12, %v4107_v0, 0.0 }
 0x5c9   : > { %1926 = vmatpush.bf16.xpose.msra.mxu3 %v1917_v46  ;;  %v1692_v46 = vsel %vm1044_vm12, %v4223_v10, 0.0 }
 0x5ca   : > { %v1799_v21 = vunpack.c.l.b16 %v1720_v47  ;;  %v1689_v47 = vsel %vm1044_vm12, %v4218_v17, 0.0 }
 0x5cc   : > { %v1800_v12 = vpack.c.b16 %v1799_v21, %v1798_v37  ;;  %v4270_v13 = vpop.f32.mrf.mxu0 }
 0x5ce   : > { %2885 = vmatmul.msk.bf16.vlgmr.msrb.gmra.mxu3 %vm1044_vm12, %v1800_v12 }
 0x5cf   : > { %2888 = vmatmul.msk.bf16.vlgmr.msra.gmra.mxu2 %vm933_vm11, %v1886_v54 }
 0x5d4   : > { %v4274_v57 = vpop.f32.mrf.mxu0  ;;  %v1910_v26 = vpop.permute.xlu1 %1909 }
 0x5dc   : > { %v1856_v2 = vpop.f32.mrf.mxu0  ;;  %v2019_v25 = vpop.permute.xlu1 %2018 }
 0x5dd   : > { %v1857_v52 = vadd.f32 %v3956_v14, %v1856_v2  ;;  %2031 = vmatpush.bf16.msrb.mxu0 %v2019_v25 }
 0x5de   : > { %2889 = vmatmul.msk.bf16.vlgmr.msra.gmra.mxu3 %vm933_vm11, %v1910_v26 }
 0x5df   : > { %v1933_v6 = vsel %vm1044_vm12, %v1857_v52, -inf }
 0x5e0   : > { %1934 = vmax.xlane.f32.xlu2 %v1933_v6 }
 0x5e4   : > { %v1858_v30 = vpop.f32.mrf.mxu0 }
 0x5e5   : > { %v1859_v20 = vadd.f32 %v3960_v19, %v1858_v30 }
 0x5e7   : > { %v1936_v44 = vsel %vm1044_vm12, %v1859_v20, -inf }
 0x5e8   : > { %1937 = vmax.xlane.f32.xlu0 %v1936_v44 }
 0x5f8   : > { %2068 = vrot.lane.b32.xlu2 %v3937_v36, %s3494_s18  ;;  %v1406_v36 = vsel %vm1044_vm12, %v4144_v63, 0.0 }
 0x5fc   : > { %2043 = vrot.lane.b32.xlu0 %v3934_v28, %s3494_s18 }
 0x621   : > { %1398 = vadd.xlane.f32.xlu2 %v1397_v32 }
 0x626   : > { %1690 = vadd.xlane.f32.xlu0 %v1689_v47 }
 0x62e   : > { %1693 = vadd.xlane.f32.xlu0 %v1692_v46  ;;  %v4291_v37 = vpop.f32.mrf.mxu1 }
 0x636   : > { %1407 = vadd.xlane.f32.xlu0 %v1406_v36  ;;  %v4295_v21 = vpop.f32.mrf.mxu1 }
 0x63e   : > { %v1880_v28 = vpop.f32.mrf.mxu1 }
 0x63f   : > { %v4298_v0 = vadd.f32 %v3956_v14, %v1880_v28 }
 0x641   : > { %v1939_v17 = vsel %vm1044_vm12, %v4298_v0, -inf }
 0x642   : > { %v4302_v12 = vpop.f32.mrf.mxu2  ;;  %1940 = vmax.xlane.f32.xlu1 %v1939_v17 }
 0x646   : > { %v1882_v10 = vpop.f32.mrf.mxu1 }
 0x647   : > { %v4305_v54 = vadd.f32 %v3960_v19, %v1882_v10 }
 0x649   : > { %v1942_v63 = vsel %vm1044_vm12, %v4305_v54, -inf }
 0x64a   : > { %v4309_v26 = vpop.f32.mrf.mxu2  ;;  %1943 = vmax.xlane.f32.xlu2 %v1942_v63 }
 0x651   : > { %v4311_v2 = vpop.f32.mrf.mxu3 }
 0x652   : > { %v1904_v25 = vpop.f32.mrf.mxu2 }
 0x653   : > { %v4314_v6 = vadd.f32 %v3956_v14, %v1904_v25  ;;  %v1935_v30 = vpop.xlane.xlu2 %1934 }
 0x654   : > { %v1957_v44 = vsub.f32 %v1857_v52, %v1935_v30 }
 0x655   : > { %v1945_v32 = vsel %vm1044_vm12, %v4314_v6, -inf }
 0x656   : > { %1946 = vmax.xlane.f32.xlu2 %v1945_v32  ;;  %v1965_v47 = vmul.f32 1.442695, %v1957_v44 }
 0x658   : > { %3194 = vpow2.f32 %v1965_v47  ;;  %v1403_v47 = vsel %vm1044_vm12, %v4140_v1, 0.0  ;;  %v1695_v1 = vsel %vm1044_vm12, %v4241_v56, 0.0 }
 0x659   : > { %v4318_v46 = vpop.f32.mrf.mxu3 }
 0x65a   : > { %v1906_v36 = vpop.f32.mrf.mxu2 }
 0x65b   : > { %v4321_v28 = vadd.f32 %v3960_v19, %v1906_v36  ;;  %v1938_v17 = vpop.xlane.xlu0 %1937  ;;  %v2069_v10 = vpop.permute.xlu2 %2068  ;;  %2093 = vrot.lane.b32.xlu1 %v4002_v16, %s3494_s18  ;;  %s3430_s18 = scalar_lea.hbm %s4752_s12, 128 }
 0x65c   : > { %v1958_v63 = vsub.f32 %v1859_v20, %v1938_v17  ;;  %2081 = vmatpush.bf16.msrb.mxu2 %v2069_v10 }
 0x65d   : > { %v1948_v52 = vsel %vm1044_vm12, %v4321_v28, -inf }
 0x65e   : > { %v1967_v25 = vmul.f32 1.442695, %v1958_v63  ;;  %1949 = vmax.xlane.f32.xlu2 %v1948_v52  ;;  %v4327_v44 = vpop.eup %3194 }
 0x65f   : > { %v2005_v32 = vpack.c.bf16 %v4327_v44, %v4327_v44 }
 0x660   : > { %3196 = vpow2.f32 %v1967_v25 }
 0x661   : > { %v1928_v30 = vpop.f32.mrf.mxu3  ;;  %v2015_v36 = vunpack.c.l.b16 %v2005_v32  ;;  %v1412_v32 = vsel %vm1044_vm12, %v4153_v33, 0.0 }
 0x662   : > { %v4354_v56 = vadd.f32 %v3956_v14, %v1928_v30  ;;  %v1698_v14 = vsel %vm1044_vm12, %v4245_v4, 0.0 }
 0x664   : > { %v1951_v33 = vsel %vm1044_vm12, %v4354_v56, -inf }
 0x666   : > { %v4333_v20 = vpop.eup %3196  ;;  %1404 = vadd.xlane.f32.xlu2 %v1403_v47 }
 0x667   : > { %v2006_v16 = vpack.c.bf16 %v4333_v20, %v4333_v20 }
 0x669   : > { %v2016_v17 = vunpack.c.l.b16 %v2006_v16  ;;  %v1930_v10 = vpop.f32.mrf.mxu3  ;;  %v1096_v16 = vsel %vm1044_vm12, %v3998_v5, 0.0  ;;  %v1400_v5 = vsel %vm1044_vm12, %v4111_v15, 0.0 }
 0x66a   : > { %v4338_v63 = vadd.f32 %v3960_v19, %v1930_v10  ;;  %v1701_v19 = vsel %vm1044_vm12, %v4250_v50, 0.0  ;;  %v1710_v50 = vsel %vm1044_vm12, %v4265_v35, 0.0  ;;  %v1704_v35 = vsel %vm1044_vm12, %v4254_v38, 0.0 }
 0x66b   : > { %v2017_v52 = vpack.c.b16 %v2016_v17, %v2015_v36  ;;  %v1415_v36 = vsel %vm1044_vm12, %v4160_v51, 0.0  ;;  %v1707_v17 = vsel %vm1044_vm12, %v4261_v58, 0.0  ;;  %v1409_v58 = vsel %vm1044_vm12, %v4148_v9, 0.0 }
 0x66c   : > { %v1954_v25 = vsel %vm1044_vm12, %v4338_v63, -inf  ;;  %v1093_v9 = vsel %vm1044_vm12, %v3994_v49, 0.0 }
 0x66d   : > { %1955 = vmax.xlane.f32.xlu0 %v1954_v25  ;;  %2890 = vmatmul.msk.bf16.vlgmr.msrb.gmra.mxu0 %vm1044_vm12, %v2017_v52 }
 0x66e   : > { %v2044_v47 = vpop.permute.xlu0 %2043  ;;  %1696 = vadd.xlane.f32.xlu2 %v1695_v1  ;;  %v1418_v1 = vsel %vm1044_vm12, %v4165_v45, 0.0 }
 0x66f   : > { %2056 = vmatpush.bf16.msrb.mxu1 %v2044_v47 }
 0x675   : > { %1413 = vadd.xlane.f32.xlu0 %v1412_v32 }
 0x676   : > { %1702 = vadd.xlane.f32.xlu2 %v1701_v19 }
 0x67d   : > { %1097 = vadd.xlane.f32.xlu0 %v1096_v16 }
 0x67e   : > { %1416 = vadd.xlane.f32.xlu2 %v1415_v36 }
 0x685   : > { %1708 = vadd.xlane.f32.xlu0 %v1707_v17  ;;  %1952 = vmax.xlane.f32.xlu1 %v1951_v33 }
 0x686   : > { %1711 = vadd.xlane.f32.xlu2 %v1710_v50 }
 0x68d   : > { %1401 = vadd.xlane.f32.xlu1 %v1400_v5 }
 0x694   : > { %v4377_v47 = vpop.xlane.xlu2 %1398 }
 0x695   : > { %1699 = vadd.xlane.f32.xlu1 %v1698_v14 }
 0x699   : > { %v1691_v51 = vpop.xlane.xlu0 %1690 }
 0x69a   : > { %3198 = vrcp.f32 %v1691_v51 }
 0x69d   : > { %1410 = vadd.xlane.f32.xlu1 %v1409_v58 }
 0x6a0   : > { %v3199_v10 = vpop.eup %3198 }
 0x6a1   : > { %v1694_v30 = vpop.xlane.xlu0 %1693  ;;  %v1829_v15 = vmul.f32 %v3199_v10, %v4270_v13 }
 0x6a2   : > { %3200 = vrcp.f32 %v1694_v30 }
 0x6a5   : > { %1705 = vadd.xlane.f32.xlu1 %v1704_v35 }
 0x6a8   : > { %v3201_v52 = vpop.eup %3200 }
 0x6a9   : > { %v1830_v25 = vmul.f32 %v3201_v52, %v4274_v57  ;;  %v1408_v10 = vpop.xlane.xlu0 %1407  ;;  %v1102_v52 = vsel %vm1044_vm12, %v4034_v55, 0.0 }
 0x6ab   : > { %v3069_v4 = vpack.i.bf16 %v1830_v25, %v1829_v15 }
 0x6ad   : > { %3070 = vrot.lane.b32.xlu0 %v3069_v4, %s3495_s17  ;;  %1094 = vadd.xlane.f32.xlu1 %v1093_v9 }
 0x6b5   : > { %1419 = vadd.xlane.f32.xlu1 %v1418_v1  ;;  %v1941_v38 = vpop.xlane.xlu1 %1940 }
 0x6b6   : > { %v1959_v32 = vsub.f32 %v4298_v0, %v1941_v38 }
 0x6b8   : > { %v1969_v13 = vmul.f32 1.442695, %v1959_v32 }
 0x6ba   : > { %3202 = vpow2.f32 %v1969_v13 }
 0x6bd   : > { %v1944_v19 = vpop.xlane.xlu2 %1943 }
 0x6be   : > { %v1960_v57 = vsub.f32 %v4305_v54, %v1944_v19 }
 0x6c0   : > { %v1971_v16 = vmul.f32 1.442695, %v1960_v57  ;;  %v3203_v36 = vpop.eup %3202 }
 0x6c1   : > { %v2007_v17 = vpack.c.bf16 %v3203_v36, %v3203_v36 }
 0x6c2   : > { %3204 = vpow2.f32 %v1971_v16 }
 0x6c3   : > { %v2040_v5 = vunpack.c.l.b16 %v2007_v17  ;;  %v1987_v17 = vsel %vm1044_vm12, %v3203_v36, 0.0 }
 0x6c8   : > { %v4381_v49 = vpop.eup %3204 }
 0x6c9   : > { %v1947_v33 = vpop.xlane.xlu2 %1946  ;;  %v2008_v45 = vpack.c.bf16 %v4381_v49, %v4381_v49 }
 0x6ca   : > { %v1961_v50 = vsub.f32 %v4314_v6, %v1947_v33 }
 0x6cb   : > { %v2041_v14 = vunpack.c.l.b16 %v2008_v45 }
 0x6cc   : > { %v1973_v51 = vmul.f32 1.442695, %v1961_v50 }
 0x6cd   : > { %v2042_v0 = vpack.c.b16 %v2041_v14, %v2040_v5  ;;  %v2094_v58 = vpop.permute.xlu1 %2093 }
 0x6ce   : > { %2106 = vmatpush.bf16.msrb.mxu3 %v2094_v58  ;;  %3206 = vpow2.f32 %v1973_v51 }
 0x6cf   : > { %2891 = vmatmul.msk.bf16.vlgmr.msrb.gmra.mxu1 %vm1044_vm12, %v2042_v0 }
 0x6d1   : > { %v1950_v54 = vpop.xlane.xlu2 %1949 }
 0x6d2   : > { %v1962_v30 = vsub.f32 %v4321_v28, %v1950_v54  ;;  %v1984_v28 = vsel %vm1044_vm12, %v4333_v20, 0.0 }
 0x6d4   : > { %v1975_v35 = vmul.f32 1.442695, %v1962_v30  ;;  %v3207_v6 = vpop.eup %3206 }
 0x6d5   : > { %v2009_v25 = vpack.c.bf16 %v3207_v6, %v3207_v6  ;;  %v1993_v20 = vsel %vm1044_vm12, %v3207_v6, 0.0 }
 0x6d6   : > { %3208 = vpow2.f32 %v1975_v35 }
 0x6d7   : > { %1103 = vadd.xlane.f32.xlu0 %v1102_v52  ;;  %3210 = vrcp.f32 %v1408_v10  ;;  %v2065_v38 = vunpack.c.l.b16 %v2009_v25 }
 0x6d9   : > { %v1405_v15 = vpop.xlane.xlu2 %1404 }
 0x6da   : > { %3212 = vrcp.f32 %v1405_v15 }
 0x6dc   : > { %v4390_v4 = vpop.eup %3208 }
 0x6dd   : > { %v2010_v9 = vpack.c.bf16 %v4390_v4, %v4390_v4  ;;  %v3211_v1 = vpop.eup %3210 }
 0x6de   : > { %v1540_v57 = vmul.f32 %v3211_v1, %v4196_v8 }
 0x6df   : > { %v2066_v32 = vunpack.c.l.b16 %v2010_v9  ;;  %1985 = vadd.xlane.f32.xlu0 %v1984_v28 }
 0x6e0   : > { %v3213_v13 = vpop.eup %3212  ;;  %v1956_v33 = vpop.xlane.xlu0 %1955 }
 0x6e1   : > { %v2067_v55 = vpack.c.b16 %v2066_v32, %v2065_v38  ;;  %v1539_v19 = vmul.f32 %v3213_v13, %v4194_v39  ;;  %v1964_v45 = vsub.f32 %v4338_v63, %v1956_v33  ;;  %v1697_v58 = vpop.xlane.xlu2 %1696 }
 0x6e3   : > { %2892 = vmatmul.msk.bf16.vlgmr.msrb.gmra.mxu2 %vm1044_vm12, %v2067_v55  ;;  %v3074_v16 = vpack.i.bf16 %v1540_v57, %v1539_v19  ;;  %v1979_v50 = vmul.f32 1.442695, %v1964_v45  ;;  %v1981_v45 = vsel %vm1044_vm12, %v4327_v44, 0.0  ;;  %v1996_v44 = vsel %vm1044_vm12, %v4390_v4, 0.0 }
 0x6e5   : > { %3075 = vrot.lane.b32.xlu2 %v3074_v16, %s3496_s13  ;;  %3214 = vpow2.f32 %v1979_v50  ;;  %v1990_v50 = vsel %vm1044_vm12, %v4381_v49, 0.0 }
 0x6e7   : > { %1988 = vadd.xlane.f32.xlu0 %v1987_v17 }
 0x6e8   : > { %v1414_v9 = vpop.xlane.xlu0 %1413 }
 0x6eb   : > { %v4404_v14 = vpop.eup %3214 }
 0x6ec   : > { %v2012_v36 = vpack.c.bf16 %v4404_v14, %v4404_v14  ;;  %v2002_v4 = vsel %vm1044_vm12, %v4404_v14, 0.0  ;;  %v1111_v14 = vsel %vm1044_vm12, %v4045_v18, 0.0 }
 0x6ee   : > { %v2091_v35 = vunpack.c.l.b16 %v2012_v36 }
 0x6ef   : > { %1994 = vadd.xlane.f32.xlu0 %v1993_v20  ;;  %v1703_v20 = vpop.xlane.xlu2 %1702 }
 0x6f0   : > { %v1098_v17 = vpop.xlane.xlu0 %1097 }
 0x6f7   : > { %v4424_v33 = vpop.xlane.xlu2 %1416 }
 0x6f8   : > { %v1953_v5 = vpop.xlane.xlu1 %1952 }
 0x6f9   : > { %v1963_v39 = vsub.f32 %v4354_v56, %v1953_v5 }
 0x6fb   : > { %v1977_v8 = vmul.f32 1.442695, %v1963_v39 }
 0x6fd   : > { %3216 = vpow2.f32 %v1977_v8 }
 0x6fe   : > { %3218 = vrcp.f32 %v4377_v47 }
 0x700   : > { %v1402_v0 = vpop.xlane.xlu1 %1401 }
 0x701   : > { %3220 = vrcp.f32 %v1402_v0 }
 0x702   : > { %3222 = vrcp.f32 %v1697_v58 }
 0x703   : > { %v3217_v51 = vpop.eup %3216 }
 0x704   : > { %v2011_v54 = vpack.c.bf16 %v3217_v51, %v3217_v51  ;;  %v1999_v63 = vsel %vm1044_vm12, %v3217_v51, 0.0  ;;  %v3219_v30 = vpop.eup %3218 }
 0x705   : > { %2000 = vadd.xlane.f32.xlu0 %v1999_v63  ;;  %v1537_v47 = vmul.f32 %v3219_v30, %v4173_v31 }
 0x706   : > { %v2090_v56 = vunpack.c.l.b16 %v2011_v54 }
 0x707   : > { %v3221_v10 = vpop.eup %3220 }
 0x708   : > { %v2092_v52 = vpack.c.b16 %v2091_v35, %v2090_v56  ;;  %v1700_v6 = vpop.xlane.xlu1 %1699  ;;  %v1538_v15 = vmul.f32 %v3221_v10, %v4177_v43  ;;  %v3223_v1 = vpop.eup %3222 }
 0x709   : > { %3224 = vrcp.f32 %v1700_v6  ;;  %v1831_v32 = vmul.f32 %v3223_v1, %v4291_v37  ;;  %v1099_v37 = vsel %vm1044_vm12, %v4038_v60, 0.0  ;;  %v4434_v60 = vpop.xlane.xlu2 %1711 }
 0x70a   : > { %2893 = vmatmul.msk.bf16.vlgmr.msrb.gmra.mxu3 %vm1044_vm12, %v2092_v52  ;;  %v3064_v25 = vpack.i.bf16 %v1538_v15, %v1537_v47  ;;  %3226 = vrcp.f32 %v1414_v9  ;;  %v2033_v9 = vpop.f32.mrf.mxu0 }
 0x70c   : > { %3065 = vrot.lane.b32.xlu1 %v3064_v25, %s3496_s13 }
 0x70f   : > { %v3225_v28 = vpop.eup %3224 }
 0x710   : > { %v1411_v38 = vpop.xlane.xlu1 %1410  ;;  %v1832_v13 = vmul.f32 %v3225_v28, %v4295_v21  ;;  %v3227_v31 = vpop.eup %3226 }
 0x711   : > { %3228 = vrcp.f32 %v1411_v38  ;;  %v1542_v57 = vmul.f32 %v3227_v31, %v4202_v24  ;;  %v4422_v21 = vpop.xlane.xlu0 %1708 }
 0x712   : > { %v3079_v55 = vpack.i.bf16 %v1832_v13, %v1831_v32  ;;  %v2035_v13 = vpop.f32.mrf.mxu0 }
 0x714   : > { %3080 = vrot.lane.b32.xlu2 %v3079_v55, %s3495_s17 }
 0x717   : > { %v3229_v43 = vpop.eup %3228 }
 0x718   : > { %v1541_v19 = vmul.f32 %v3229_v43, %v4198_v40  ;;  %v1108_v40 = vsel %vm1044_vm12, %v4023_v59, 0.0  ;;  %v1706_v5 = vpop.xlane.xlu1 %1705 }
 0x719   : > { %3230 = vrcp.f32 %v1706_v5 }
 0x71a   : > { %v3094_v16 = vpack.i.bf16 %v1542_v57, %v1541_v19  ;;  %3232 = vrcp.f32 %v1703_v20 }
 0x71c   : > { %3095 = vrot.lane.b32.xlu0 %v3094_v16, %s3496_s13 }
 0x71f   : > { %v4430_v24 = vpop.permute.xlu0 %3070  ;;  %v3231_v8 = vpop.eup %3230 }
 0x720   : > { %v3233_v0 = vpop.eup %3232  ;;  %v1834_v58 = vmul.f32 %v3231_v8, %v4309_v26  ;;  %v4450_v35 = vpop.xlane.xlu1 %1094  ;;  %v3073_v52 = vunpack.i.h.bf16 %v4430_v24 }
 0x721   : > { %v1833_v54 = vmul.f32 %v3233_v0, %v4302_v12 }
 0x723   : > { %v3099_v30 = vpack.i.bf16 %v1834_v58, %v1833_v54  ;;  %v1114_v58 = vsel %vm1044_vm12, %v4049_v22, 0.0  ;;  %v2956_v54 = vld [vmem:[#allocation7] sm:$0xff] }
 0x728   : > { %v1420_v56 = vpop.xlane.xlu1 %1419 }
 0x736   : > { %1100 = vadd.xlane.f32.xlu1 %v1099_v37 }
 0x73d   : > { %1982 = vadd.xlane.f32.xlu2 %v1981_v45 }
 0x73e   : > { %1109 = vadd.xlane.f32.xlu1 %v1108_v40 }
 0x73f   : > { %v4438_v59 = vpop.permute.xlu2 %3075 }
 0x740   : > { %v3078_v51 = vunpack.i.h.bf16 %v4438_v59 }
 0x745   : > { %1991 = vadd.xlane.f32.xlu2 %v1990_v50 }
 0x74a   : > { %v1104_v39 = vpop.xlane.xlu0 %1103 }
 0x74b   : > { %3234 = vrcp.f32 %v1104_v39 }
 0x74c   : > { %3236 = vrcp.f32 %v1098_v17  ;;  %v2058_v38 = vpop.f32.mrf.mxu1 }
 0x74d   : > { %1997 = vadd.xlane.f32.xlu2 %v1996_v44 }
 0x751   : > { %v3235_v36 = vpop.eup %3234 }
 0x752   : > { %v1248_v49 = vmul.f32 %v3235_v36, %v4080_v62  ;;  %v3237_v10 = vpop.eup %3236  ;;  %v1986_v15 = vpop.xlane.xlu0 %1985 }
 0x753   : > { %v1246_v26 = vmul.f32 %v3237_v10, %v4059_v42  ;;  %3238 = vrcp.f32 %v1986_v15 }
 0x754   : > { %v4445_v63 = vsel %vm933_vm11, %v1248_v49, %v3078_v51  ;;  %v2060_v20 = vpop.f32.mrf.mxu1  ;;  %v1105_v51 = vsel %vm1044_vm12, %v4017_v23, 0.0  ;;  %v2957_v49 = vld [vmem:[#allocation7 + $0x8] sm:$0xff] }
 0x755   : > { %2003 = vadd.xlane.f32.xlu2 %v2002_v4  ;;  %2288 = vmatpush.bf16.msra.mxu0 %v2957_v49 }
 0x757   : > { %3100 = vrot.lane.b32.xlu1 %v3099_v30, %s3495_s17 }
 0x759   : > { %v3239_v28 = vpop.eup %3238  ;;  %2289 = vmatpush.bf16.msra.mxu0 %v2956_v54 }
 0x75a   : > { %v1989_v42 = vpop.xlane.xlu0 %1988  ;;  %v2122_v31 = vmul.f32 %v3239_v28, %v2035_v13 }
 0x762   : > { %v1995_v19 = vpop.xlane.xlu0 %1994 }
 0x766   : > { %v2083_v16 = vpop.f32.mrf.mxu2 }
 0x76e   : > { %v4463_v25 = vpop.permute.xlu2 %3080  ;;  %v2085_v44 = vpop.f32.mrf.mxu2 }
 0x77e   : > { %v4452_v62 = vpop.permute.xlu1 %3065 }
 0x77f   : > { %v3068_v12 = vunpack.i.h.bf16 %v4452_v62 }
 0x781   : > { %v2226_v6 = vsel %vm933_vm11, %v1246_v26, %v3068_v12  ;;  %1112 = vadd.xlane.f32.xlu1 %v1111_v14 }
 0x782   : > { %v4461_v47 = vsel %vm1044_vm12, %v2226_v6, %v3073_v52 }
 0x7a9   : > { %v1101_v6 = vpop.xlane.xlu1 %1100 }
 0x7b0   : > { %v1983_v1 = vpop.xlane.xlu2 %1982 }
 0x7b1   : > { %3240 = vrcp.f32 %v1983_v1 }
 0x7b2   : > { %3242 = vrcp.f32 %v1989_v42  ;;  %v3067_v42 = vunpack.i.l.bf16 %v4452_v62 }
 0x7b7   : > { %v3241_v32 = vpop.eup %3240 }
 0x7b8   : > { %v1992_v18 = vpop.xlane.xlu2 %1991  ;;  %v2121_v55 = vmul.f32 %v3241_v32, %v2033_v9  ;;  %v3243_v57 = vpop.eup %3242  ;;  %v3072_v32 = vunpack.i.l.bf16 %v4430_v24 }
 0x7b9   : > { %3244 = vrcp.f32 %v1992_v18  ;;  %v2123_v45 = vmul.f32 %v3243_v57, %v2058_v38  ;;  %v3077_v57 = vunpack.i.l.bf16 %v4438_v59 }
 0x7ba   : > { %v3084_v43 = vpack.i.bf16 %v2122_v31, %v2121_v55  ;;  %3246 = vrcp.f32 %v1995_v19 }
 0x7bc   : > { %3085 = vrot.lane.b32.xlu2 %v3084_v43, %s3497_s1 }
 0x7bf   : > { %v3245_v17 = vpop.eup %3244 }
 0x7c0   : > { %v1998_v37 = vpop.xlane.xlu2 %1997  ;;  %v2124_v40 = vmul.f32 %v3245_v17, %v2060_v20  ;;  %v3247_v5 = vpop.eup %3246  ;;  %v3082_v17 = vunpack.i.l.bf16 %v4463_v25 }
 0x7c1   : > { %3248 = vrcp.f32 %v1998_v37  ;;  %v2125_v8 = vmul.f32 %v3247_v5, %v2083_v16  ;;  %v3083_v16 = vunpack.i.h.bf16 %v4463_v25 }
 0x7c2   : > { %v3089_v50 = vpack.i.bf16 %v2124_v40, %v2123_v45  ;;  %3250 = vrcp.f32 %v1420_v56  ;;  %v2108_v56 = vpop.f32.mrf.mxu3 }
 0x7c3   : > { %3252 = vrcp.f32 %v4424_v33  ;;  %v2001_v33 = vpop.xlane.xlu0 %2000 }
 0x7c4   : > { %3090 = vrot.lane.b32.xlu2 %v3089_v50, %s3497_s1  ;;  %3254 = vrcp.f32 %v4422_v21 }
 0x7c5   : > { %3256 = vrcp.f32 %v4434_v60 }
 0x7c7   : > { %v3249_v39 = vpop.eup %3248 }
 0x7c8   : > { %v2126_v0 = vmul.f32 %v3249_v39, %v2085_v44  ;;  %v3251_v4 = vpop.eup %3250  ;;  %v2004_v12 = vpop.xlane.xlu2 %2003 }
 0x7c9   : > { %v3253_v30 = vpop.eup %3252  ;;  %v1544_v23 = vmul.f32 %v3251_v4, %v4210_v41  ;;  %3258 = vrcp.f32 %v2004_v12  ;;  %v1110_v39 = vpop.xlane.xlu1 %1109 }
 0x7ca   : > { %v3104_v36 = vpack.i.bf16 %v2126_v0, %v2125_v8  ;;  %v1543_v10 = vmul.f32 %v3253_v30, %v4206_v53  ;;  %v3255_v26 = vpop.eup %3254  ;;  %3260 = vrcp.f32 %v4450_v35  ;;  %v2110_v53 = vpop.f32.mrf.mxu3 }
 0x7cb   : > { %v3257_v22 = vpop.eup %3256  ;;  %v1835_v14 = vmul.f32 %v3255_v26, %v4311_v2  ;;  %3262 = vrcp.f32 %v2001_v33  ;;  %v3096_v5 = vpop.permute.xlu0 %3095 }
 0x7cc   : > { %3105 = vrot.lane.b32.xlu0 %v3104_v36, %s3497_s1  ;;  %v3109_v52 = vpack.i.bf16 %v1544_v23, %v1543_v10  ;;  %v1836_v21 = vmul.f32 %v3257_v22, %v4318_v46  ;;  %3264 = vrcp.f32 %v1101_v6  ;;  %v3098_v49 = vunpack.i.h.bf16 %v3096_v5 }
 0x7cd   : > { %3266 = vrcp.f32 %v1110_v39 }
 0x7ce   : > { %v3114_v60 = vpack.i.bf16 %v1836_v21, %v1835_v14 }
 0x7cf   : > { %v3259_v41 = vpop.eup %3258 }
 0x7d0   : > { %v3261_v15 = vpop.eup %3260  ;;  %v2128_v9 = vmul.f32 %v3259_v41, %v2110_v53 }
 0x7d1   : > { %v3263_v1 = vpop.eup %3262  ;;  %v1245_v2 = vmul.f32 %v3261_v15, %v4056_v34  ;;  %v3101_v0 = vpop.permute.xlu1 %3100 }
 0x7d2   : > { %v2127_v28 = vmul.f32 %v3263_v1, %v2108_v56  ;;  %v3265_v35 = vpop.eup %3264  ;;  %v3102_v23 = vunpack.i.l.bf16 %v3101_v0 }
 0x7d3   : > { %v2225_v46 = vsel %vm933_vm11, %v1245_v2, %v3067_v42  ;;  %v1247_v43 = vmul.f32 %v3265_v35, %v4076_v27  ;;  %v2236_v27 = vsel %vm1044_vm12, %v4445_v63, %v3083_v16  ;;  %v3267_v8 = vpop.eup %3266  ;;  %v4791_v16 = vld [vmem:[#allocation18_spill] sm:$0xff] }
 0x7d4   : > { %v3119_v38 = vpack.i.bf16 %v2128_v9, %v2127_v28  ;;  %v2233_v31 = vsel %vm1044_vm12, %v2225_v46, %v3072_v32  ;;  %v1250_v36 = vmul.f32 %v3267_v8, %v4078_v61 }
 0x7d5   : > { %v2227_v24 = vsel %vm933_vm11, %v1247_v43, %v3077_v57 }
 0x7d6   : > { %v2235_v40 = vsel %vm1044_vm12, %v2227_v24, %v3082_v17  ;;  %v2230_v26 = vsel %vm933_vm11, %v1250_v36, %v3098_v49 }
 0x7ed   : > { %1106 = vadd.xlane.f32.xlu2 %v1105_v51  ;;  %v3103_v51 = vunpack.i.h.bf16 %v3101_v0 }
 0x7ef   : > { %v2238_v22 = vsel %vm1044_vm12, %v2230_v26, %v3103_v51 }
 0x7f4   : > { %v1113_v56 = vpop.xlane.xlu1 %1112 }
 0x7f6   : > { %1115 = vadd.xlane.f32.xlu0 %v1114_v58  ;;  %v3097_v58 = vunpack.i.l.bf16 %v3096_v5 }
 0x805   : > { %3110 = vrot.lane.b32.xlu2 %v3109_v52, %s3496_s13 }
 0x80d   : > { %3115 = vrot.lane.b32.xlu2 %v3114_v60, %s3495_s17 }
 0x815   : > { %3120 = vrot.lane.b32.xlu2 %v3119_v38, %s3497_s1  ;;  %s4682_s1 = scalar_lea.vmem [#allocation10], %s2805_s23  ;;  %s2965_s23 = sshll.u32 %s3586_s25, 5 }
 0x816   : > { %v3086_v13 = vpop.permute.xlu2 %3085  ;;  %s2688_s19 = scalar_lea.hbm %s4752_s12, %s2965_s23  ;;  %s2689_s27 = sshll.u32 %s4682_s1, 4  ;;  %s2690_s27 = int_to_ptr.vmem [resolvable:$true] %s2689_s27 }
 0x817   : > { %v3088_v18 = vunpack.i.h.bf16 %v3086_v13  ;;  %v3087_v55 = vunpack.i.l.bf16 %v3086_v13  ;;  %s2691_s14 = sshll.u32 %s2688_s19, 4  ;;  %s2692_s14 = int_to_ptr.hbm [resolvable:$true] %s2691_s14 }
 0x818   : > { %s3424_s25 = sshra.s32 %s2692_s14, 4  ;;  %s3425_s25 = int_to_ptr.hbm [resolvable:$true] %s3424_s25 }
 0x819   : > { %v2242_v62 = vsel %vm2241_vm13, %v2233_v31, %v3087_v55  ;;  %v2243_v34 = vsel %vm2241_vm13, %v4461_v47, %v3088_v18  ;;  %s3426_s29 = scalar_lea.hbm %s3425_s25, 32  ;;  %p3431_p7 = scmp.lt.s32.totalorder %s3425_s25, %s4752_s12 }
 0x81a   : > { %v2250_v19 = vpack.c.bf16 %v2243_v34, %v2242_v62  ;;  %p3427_p1 = scmp.ne.s32.totalorder %s3425_s25, %s3426_s29  ;;  %p3432_p2 = scmp.lt.s32.totalorder %s3430_s18, %s3426_s29 }
 0x81c   : > { %2902 = vmatmul.msk.bf16.vlgmr.msra.gmra.mxu0 %vm508_vm0, %v2250_v19  ;;  %p3428_p4 = pnand %p3427_p1, %p3655_p0  ;;  %p3433_p9 = por %p3432_p2, %p3431_p7 }
 0x81e   : > { %v3091_v20 = vpop.permute.xlu2 %3090  ;;  %p3429_p8 = pneg %p3428_p4 }
 0x81f   : > { %v3093_v37 = vunpack.i.h.bf16 %v3091_v20  ;;  %v3092_v45 = vunpack.i.l.bf16 %v3091_v20  ;;  %v4792_v20 = vld [vmem:[#allocation19_spill] sm:$0xff] }
 0x820   : > { %p3434_p10 = pnand %p3433_p9, %p3429_p8 }
 0x821   : > { %v2244_v47 = vsel %vm2241_vm13, %v2235_v40, %v3092_v45  ;;  %v2245_v59 = vsel %vm2241_vm13, %v2236_v27, %v3093_v37  ;;  %v4793_v27 = vld [vmem:[#allocation21_spill] sm:$0xff] }
 0x822   : > { %v2251_v50 = vpack.c.bf16 %v2245_v59, %v2244_v47 }
 0x82c   : > { %2903 = vmatmul.msk.bf16.gmra.mxu0 %vm508_vm0, %v2251_v50  ;;  %v4794_v50 = vld [vmem:[#allocation20_spill] sm:$0xff] }
 0x83e   : > { %v3106_v25 = vpop.permute.xlu0 %3105 }
 0x83f   : > { %v3108_v54 = vunpack.i.h.bf16 %v3106_v25  ;;  %v3107_v12 = vunpack.i.l.bf16 %v3106_v25  ;;  %v4795_v25 = vld [vmem:[#allocation23_spill] sm:$0xff] }
 0x841   : > { %v2247_v33 = vsel %vm2241_vm13, %v2238_v22, %v3108_v54  ;;  %v4796_v54 = vld [vmem:[#allocation24_spill] sm:$0xff] }
 0x860   : > { %v1107_v44 = vpop.xlane.xlu2 %1106 }
 0x861   : > { %3268 = vrcp.f32 %v1107_v44 }
 0x867   : > { %v3269_v63 = vpop.eup %3268 }
 0x868   : > { %v1249_v4 = vmul.f32 %v3269_v63, %v4074_v48  ;;  %v3111_v30 = vpop.permute.xlu2 %3110 }
 0x869   : > { %v1116_v10 = vpop.xlane.xlu0 %1115  ;;  %v3113_v53 = vunpack.i.h.bf16 %v3111_v30  ;;  %v3112_v15 = vunpack.i.l.bf16 %v3111_v30 }
 0x86a   : > { %v2229_v52 = vsel %vm933_vm11, %v1249_v4, %v3097_v58  ;;  %3270 = vrcp.f32 %v1116_v10 }
 0x86b   : > { %v2237_v61 = vsel %vm1044_vm12, %v2229_v52, %v3102_v23  ;;  %3272 = vrcp.f32 %v1113_v56  ;;  %v4797_v56 = vld [vmem:[#allocation22_spill] sm:$0xff] }
 0x86c   : > { %v2246_v14 = vsel %vm2241_vm13, %v2237_v61, %v3107_v12 }
 0x86d   : > { %v2252_v21 = vpack.c.bf16 %v2247_v33, %v2246_v14 }
 0x86f   : > { %2904 = vmatmul.msk.bf16.gmra.mxu0 %vm508_vm0, %v2252_v21 }
 0x870   : > { %v3271_v48 = vpop.eup %3270  ;;  %v3116_v60 = vpop.permute.xlu2 %3115 }
 0x871   : > { %v1252_v41 = vmul.f32 %v3271_v48, %v4094_v29  ;;  %v3273_v6 = vpop.eup %3272  ;;  %v3118_v9 = vunpack.i.h.bf16 %v3116_v60  ;;  %v3117_v1 = vunpack.i.l.bf16 %v3116_v60 }
 0x872   : > { %v1251_v42 = vmul.f32 %v3273_v6, %v4087_v11 }
 0x873   : > { %v2232_v28 = vsel %vm933_vm11, %v1252_v41, %v3113_v53 }
 0x874   : > { %v2231_v38 = vsel %vm933_vm11, %v1251_v42, %v3112_v15  ;;  %v2240_v13 = vsel %vm1044_vm12, %v2232_v28, %v3118_v9 }
 0x875   : > { %v2239_v32 = vsel %vm1044_vm12, %v2231_v38, %v3117_v1 }
 0x878   : > { %v3121_v2 = vpop.permute.xlu2 %3120 }
 0x879   : > { %v3123_v46 = vunpack.i.h.bf16 %v3121_v2  ;;  %v3122_v35 = vunpack.i.l.bf16 %v3121_v2 }
 0x87b   : > { %v2248_v29 = vsel %vm2241_vm13, %v2239_v32, %v3122_v35  ;;  %v2249_v18 = vsel %vm2241_vm13, %v2240_v13, %v3123_v46 }
 0x87c   : > { %v2253_v55 = vpack.c.bf16 %v2249_v18, %v2248_v29 }
 0x87f   : > { %2905 = vmatmul.msk.bf16.gmra.mxu0 %vm508_vm0, %v2253_v55  ;;  %v2959_v55 = vld [vmem:[#allocation8 + $0x8] sm:$0xff] }
 0x880   : > { %2549 = vmatpush.bf16.msra.mxu1 %v2959_v55 }
 0x899   : > { %v2291_v31 = vpop.f32.mrf.mxu0 }
 0x89a   : > { %v4522_v11 = vadd.f32 %v2291_v31, %v3709_v3 }
 0x89c   : > { %v2313_v43 = vsel %vm508_vm0, %v4522_v11, 0.0 }
 0x89d   : > { %2314 = vadd.xlane.f32.xlu1 %v2313_v43  ;;  %v2958_v43 = vld [vmem:[#allocation8] sm:$0xff] }
 0x89e   : > { %2550 = vmatpush.bf16.msra.mxu1 %v2958_v43 }
 0x8a1   : > { %v2293_v62 = vpop.f32.mrf.mxu0 }
 0x8a2   : > { %v4527_v34 = vadd.f32 %v2293_v62, %v3717_v7 }
 0x8a4   : > { %v2316_v19 = vsel %vm508_vm0, %v4527_v34, 0.0 }
 0x8a5   : > { %2317 = vadd.xlane.f32.xlu2 %v2316_v19 }
 0x8a9   : > { %v2296_v57 = vpop.f32.mrf.mxu0 }
 0x8aa   : > { %v4532_v24 = vadd.f32 %v2296_v57, %v4791_v16 }
 0x8ac   : > { %v2319_v3 = vsel %vm508_vm0, %v4532_v24, 0.0 }
 0x8ad   : > { %2320 = vadd.xlane.f32.xlu0 %v2319_v3 }
 0x8b1   : > { %v2298_v17 = vpop.f32.mrf.mxu0 }
 0x8b2   : > { %v4537_v37 = vadd.f32 %v2298_v17, %v4792_v20 }
 0x8b4   : > { %v2322_v7 = vsel %vm508_vm0, %v4537_v37, 0.0 }
 0x8b5   : > { %2323 = vadd.xlane.f32.xlu1 %v2322_v7 }
 0x8ec   : > { %v2301_v45 = vpop.f32.mrf.mxu0 }
 0x8ed   : > { %v4542_v40 = vadd.f32 %v2301_v45, %v4793_v27 }
 0x8ef   : > { %v2325_v47 = vsel %vm508_vm0, %v4542_v40, 0.0 }
 0x8f0   : > { %2326 = vadd.xlane.f32.xlu0 %v2325_v47 }
 0x8f4   : > { %v2303_v59 = vpop.f32.mrf.mxu0 }
 0x8f5   : > { %v4547_v5 = vadd.f32 %v2303_v59, %v4794_v50 }
 0x8f7   : > { %v2328_v39 = vsel %vm508_vm0, %v4547_v5, 0.0 }
 0x8f8   : > { %2329 = vadd.xlane.f32.xlu1 %v2328_v39 }
 0x8fc   : > { %v2306_v63 = vpop.f32.mrf.mxu0 }
 0x8fd   : > { %v4560_v4 = vadd.f32 %v2306_v63, %v4796_v54 }
 0x8ff   : > { %v2331_v26 = vsel %vm508_vm0, %v4560_v4, 0.0 }
 0x904   : > { %v2308_v12 = vpop.f32.mrf.mxu0 }
 0x905   : > { %v4572_v61 = vadd.f32 %v2308_v12, %v4797_v56 }
 0x907   : > { %v2334_v21 = vsel %vm508_vm0, %v4572_v61, 0.0 }
 0x910   : > { %v2315_v44 = vpop.xlane.xlu1 %2314 }
 0x911   : > { %v2337_v8 = vmul.f32 %v2315_v44, %v4795_v25 }
 0x913   : > { %v4553_v0 = vsub.f32 %v4522_v11, %v2337_v8 }
 0x915   : > { %v2353_v36 = vmul.f32 %v4553_v0, %v4553_v0 }
 0x917   : > { %v2361_v51 = vsel %vm508_vm0, %v2353_v36, 0.0 }
 0x918   : > { %v2318_v49 = vpop.xlane.xlu2 %2317  ;;  %2362 = vadd.xlane.f32.xlu0 %v2361_v51 }
 0x919   : > { %v2338_v58 = vmul.f32 %v2318_v49, %v4795_v25 }
 0x91b   : > { %v4563_v30 = vsub.f32 %v4527_v34, %v2338_v58 }
 0x91d   : > { %v2354_v23 = vmul.f32 %v4563_v30, %v4563_v30 }
 0x91f   : > { %v2364_v10 = vsel %vm508_vm0, %v2354_v23, 0.0 }
 0x920   : > { %v2321_v52 = vpop.xlane.xlu0 %2320  ;;  %2365 = vadd.xlane.f32.xlu1 %v2364_v10  ;;  %2332 = vadd.xlane.f32.xlu0 %v2331_v26 }
 0x921   : > { %v2339_v22 = vmul.f32 %v2321_v52, %v4795_v25 }
 0x923   : > { %v4575_v33 = vsub.f32 %v4532_v24, %v2339_v22 }
 0x925   : > { %v2355_v14 = vmul.f32 %v4575_v33, %v4575_v33 }
 0x927   : > { %v2367_v48 = vsel %vm508_vm0, %v2355_v14, 0.0 }
 0x928   : > { %2335 = vadd.xlane.f32.xlu1 %v2334_v21  ;;  %2368 = vadd.xlane.f32.xlu0 %v2367_v48  ;;  %v2324_v60 = vpop.xlane.xlu1 %2323  ;;  %v4624_v48 = vld [vmem:[%s4748_s8] ss:$0 sm:$0xff] }
 0x929   : > { %v2340_v41 = vmul.f32 %v2324_v60, %v4795_v25 }
 0x92b   : > { %v4584_v6 = vsub.f32 %v4537_v37, %v2340_v41 }
 0x92d   : > { %v2356_v53 = vmul.f32 %v4584_v6, %v4584_v6 }
 0x92f   : > { %v2370_v15 = vsel %vm508_vm0, %v2356_v53, 0.0 }
 0x930   : > { %2371 = vadd.xlane.f32.xlu1 %v2370_v15 }
 0x963   : > { %v2327_v9 = vpop.xlane.xlu0 %2326 }
 0x964   : > { %v2341_v1 = vmul.f32 %v2327_v9, %v4795_v25 }
 0x966   : > { %v4591_v42 = vsub.f32 %v4542_v40, %v2341_v1 }
 0x968   : > { %v2357_v28 = vmul.f32 %v4591_v42, %v4591_v42 }
 0x96a   : > { %v2373_v2 = vsel %vm508_vm0, %v2357_v28, 0.0  ;;  %v4630_v28 = vld [vmem:[%s4749_s9] ss:$0 sm:$0xff] }
 0x96b   : > { %2374 = vadd.xlane.f32.xlu2 %v2373_v2  ;;  %v2330_v38 = vpop.xlane.xlu1 %2329 }
 0x96c   : > { %v2342_v46 = vmul.f32 %v2330_v38, %v4795_v25 }
 0x96e   : > { %v4598_v35 = vsub.f32 %v4547_v5, %v2342_v46 }
 0x970   : > { %v2358_v32 = vmul.f32 %v4598_v35, %v4598_v35 }
 0x972   : > { %v2376_v13 = vsel %vm508_vm0, %v2358_v32, 0.0 }
 0x973   : > { %2377 = vadd.xlane.f32.xlu0 %v2376_v13 }
 0x98b   : > { %v2363_v29 = vpop.xlane.xlu0 %2362 }
 0x98c   : > { %v2385_v18 = vmul.f32 %v2363_v29, %v4795_v25 }
 0x98e   : > { %v2393_v31 = vadd.f32 1e-05, %v2385_v18 }
 0x990   : > { %3274 = vrsqrt.f32 %v2393_v31  ;;  %vm2407_vm15 = vweird.f32 %v2393_v31 }
 0x993   : > { %v2333_v62 = vpop.xlane.xlu0 %2332  ;;  %v2366_v19 = vpop.xlane.xlu1 %2365 }
 0x994   : > { %v2343_v57 = vmul.f32 %v2333_v62, %v4795_v25  ;;  %v2386_v16 = vmul.f32 %v2366_v19, %v4795_v25 }
 0x996   : > { %v3275_v3 = vpop.eup %3274  ;;  %v4607_v17 = vsub.f32 %v4560_v4, %v2343_v57  ;;  %v2394_v20 = vadd.f32 1e-05, %v2386_v16 }
 0x997   : > { %v2402_v7 = vmul.f32 %v3275_v3, %v2393_v31  ;;  %vm2408_vm14 = vweird.f32 %v3275_v3 }
 0x998   : > { %3276 = vrsqrt.f32 %v2394_v20  ;;  %v2359_v45 = vmul.f32 %v4607_v17, %v4607_v17  ;;  %vm2409_vm1 = vmor %vm2407_vm15, %vm2408_vm14  ;;  %vm2417_vm3 = vweird.f32 %v2394_v20 }
 0x999   : > { %v2403_v27 = vmul.f32 %v3275_v3, %v2402_v7 }
 0x99a   : > { %v2379_v47 = vsel %vm508_vm0, %v2359_v45, 0.0 }
 0x99b   : > { %v2404_v59 = vmul.f32 0.5, %v2403_v27  ;;  %v2369_v50 = vpop.xlane.xlu0 %2368  ;;  %2380 = vadd.xlane.f32.xlu1 %v2379_v47  ;;  %v2336_v39 = vpop.xlane.xlu1 %2335 }
 0x99c   : > { %v2387_v44 = vmul.f32 %v2369_v50, %v4795_v25  ;;  %v2344_v8 = vmul.f32 %v2336_v39, %v4795_v25 }
 0x99d   : > { %v2405_v36 = vsub.f32 1.5, %v2404_v59 }
 0x99e   : > { %v3277_v63 = vpop.eup %3276  ;;  %v2395_v51 = vadd.f32 1e-05, %v2387_v44  ;;  %v4615_v49 = vsub.f32 %v4572_v61, %v2344_v8 }
 0x99f   : > { %v2406_v58 = vmul.f32 %v3275_v3, %v2405_v36  ;;  %v2412_v54 = vmul.f32 %v3277_v63, %v2394_v20  ;;  %vm2418_vm2 = vweird.f32 %v3277_v63 }
 0x9a0   : > { %3278 = vrsqrt.f32 %v2395_v51  ;;  %v2360_v23 = vmul.f32 %v4615_v49, %v4615_v49  ;;  %vm2419_vm4 = vmor %vm2417_vm3, %vm2418_vm2  ;;  %vm2427_vm6 = vweird.f32 %v2395_v51 }
 0x9a1   : > { %v2413_v10 = vmul.f32 %v3277_v63, %v2412_v54  ;;  %v2410_v12 = vsel %vm2409_vm1, %v3275_v3, %v2406_v58 }
 0x9a2   : > { %v2382_v26 = vsel %vm508_vm0, %v2360_v23, 0.0  ;;  %v2481_v60 = vmul.f32 %v2410_v12, %v4553_v0 }
 0x9a3   : > { %v2414_v52 = vmul.f32 0.5, %v2413_v10  ;;  %2383 = vadd.xlane.f32.xlu2 %v2382_v26  ;;  %v2372_v22 = vpop.xlane.xlu1 %2371 }
 0x9a4   : > { %v2388_v56 = vmul.f32 %v2372_v22, %v4795_v25  ;;  %v2492_v2 = vmul.f32 %v4624_v48, %v2481_v60 }
 0x9a5   : > { %v2415_v14 = vsub.f32 1.5, %v2414_v52 }
 0x9a6   : > { %v3279_v21 = vpop.eup %3278  ;;  %v2396_v41 = vadd.f32 1e-05, %v2388_v56  ;;  %v2503_v29 = vadd.f32 %v4630_v28, %v2492_v2 }
 0x9a7   : > { %v2416_v53 = vmul.f32 %v3277_v63, %v2415_v14  ;;  %v2422_v15 = vmul.f32 %v3279_v21, %v2395_v51  ;;  %vm2428_vm5 = vweird.f32 %v3279_v21 }
 0x9a8   : > { %3280 = vrsqrt.f32 %v2396_v41  ;;  %vm2429_vm7 = vmor %vm2427_vm6, %vm2428_vm5  ;;  %vm2437_vm9 = vweird.f32 %v2396_v41 }
 0x9a9   : > { %v2420_v9 = vsel %vm2419_vm4, %v3277_v63, %v2416_v53  ;;  %v2423_v1 = vmul.f32 %v3279_v21, %v2422_v15 }
 0x9aa   : > { %v2482_v38 = vmul.f32 %v2420_v9, %v4563_v30 }
 0x9ab   : > { %v2424_v46 = vmul.f32 0.5, %v2423_v1 }
 0x9ac   : > { %v2493_v0 = vmul.f32 %v4624_v48, %v2482_v38 }
 0x9ad   : > { %v2425_v32 = vsub.f32 1.5, %v2424_v46 }
 0x9ae   : > { %v3281_v13 = vpop.eup %3280  ;;  %v2504_v18 = vadd.f32 %v4630_v28, %v2493_v0 }
 0x9af   : > { %v2426_v55 = vmul.f32 %v3279_v21, %v2425_v32  ;;  %v2432_v31 = vmul.f32 %v3281_v13, %v2396_v41  ;;  %vm2438_vm8 = vweird.f32 %v3281_v13 }
 0x9b0   : > { %v2511_v43 = vpack.c.bf16 %v2504_v18, %v2503_v29  ;;  %vm2439_vm10 = vmor %vm2437_vm9, %vm2438_vm8  ;;  %vm2616_vm8 = vcmask 523264  }
 0x9b1   : > { %v2433_v62 = vmul.f32 %v3281_v13, %v2432_v31  ;;  %v2430_v19 = vsel %vm2429_vm7, %v3279_v21, %v2426_v55 }
 0x9b2   : > { %2914 = vmatmul.msk.bf16.vlgmr.msra.gmra.mxu1 %vm508_vm0, %v2511_v43  ;;  %v2483_v16 = vmul.f32 %v2430_v19, %v4575_v33 }
 0x9b3   : > { %v2434_v30 = vmul.f32 0.5, %v2433_v62  ;;  %v2960_v62 = vld [vmem:[%s4751_s11] sm:$0xff] }
 0x9b4   : > { %v2494_v45 = vmul.f32 %v4624_v48, %v2483_v16 }
 0x9b5   : > { %v2435_v57 = vsub.f32 1.5, %v2434_v30 }
 0x9b6   : > { %v2505_v47 = vadd.f32 %v4630_v28, %v2494_v45 }
 0x9b7   : > { %v2436_v3 = vmul.f32 %v3281_v13, %v2435_v57 }
 0x9b9   : > { %v2440_v20 = vsel %vm2439_vm10, %v3281_v13, %v2436_v3  ;;  %v2961_v13 = vld [vmem:[%s4751_s11 + $0x8] sm:$0xff] }
 0x9ba   : > { %v2484_v7 = vmul.f32 %v2440_v20, %v4584_v6 }
 0x9bc   : > { %v2495_v27 = vmul.f32 %v4624_v48, %v2484_v7 }
 0x9be   : > { %v2506_v59 = vadd.f32 %v4630_v28, %v2495_v27 }
 0x9c0   : > { %v2512_v50 = vpack.c.bf16 %v2506_v59, %v2505_v47 }
 0x9c2   : > { %2915 = vmatmul.msk.bf16.gmra.mxu1 %vm508_vm0, %v2512_v50 }
 0x9de   : > { %v2375_v39 = vpop.xlane.xlu2 %2374 }
 0x9df   : > { %v2389_v33 = vmul.f32 %v2375_v39, %v4795_v25 }
 0x9e1   : > { %v2397_v44 = vadd.f32 1e-05, %v2389_v33 }
 0x9e3   : > { %3282 = vrsqrt.f32 %v2397_v44  ;;  %vm2447_vm12 = vweird.f32 %v2397_v44 }
 0x9e6   : > { %v2378_v8 = vpop.xlane.xlu0 %2377 }
 0x9e7   : > { %v2390_v36 = vmul.f32 %v2378_v8, %v4795_v25 }
 0x9e9   : > { %v3283_v6 = vpop.eup %3282  ;;  %v2398_v63 = vadd.f32 1e-05, %v2390_v36 }
 0x9ea   : > { %v2442_v51 = vmul.f32 %v3283_v6, %v2397_v44  ;;  %vm2448_vm11 = vweird.f32 %v3283_v6 }
 0x9eb   : > { %3284 = vrsqrt.f32 %v2398_v63  ;;  %vm2449_vm13 = vmor %vm2447_vm12, %vm2448_vm11  ;;  %vm2457_vm15 = vweird.f32 %v2398_v63 }
 0x9ec   : > { %v2443_v58 = vmul.f32 %v3283_v6, %v2442_v51 }
 0x9ee   : > { %v2444_v54 = vmul.f32 0.5, %v2443_v58 }
 0x9f0   : > { %v2445_v23 = vsub.f32 1.5, %v2444_v54 }
 0x9f1   : > { %v3285_v10 = vpop.eup %3284 }
 0x9f2   : > { %v2446_v26 = vmul.f32 %v3283_v6, %v2445_v23  ;;  %v2452_v12 = vmul.f32 %v3285_v10, %v2398_v63  ;;  %vm2458_vm14 = vweird.f32 %v3285_v10 }
 0x9f3   : > { %vm2459_vm1 = vmor %vm2457_vm15, %vm2458_vm14 }
 0x9f4   : > { %v2453_v52 = vmul.f32 %v3285_v10, %v2452_v12  ;;  %v2450_v22 = vsel %vm2449_vm13, %v3283_v6, %v2446_v26 }
 0x9f5   : > { %v2485_v21 = vmul.f32 %v2450_v22, %v4591_v42  ;;  %v2963_v42 = vld [vmem:[%s4751_s11 + $0x18] sm:$0xff] }
 0x9f6   : > { %v2454_v56 = vmul.f32 0.5, %v2453_v52  ;;  %2633 = vmatpush.bf16.msra.mxu2 %v2963_v42 }
 0x9f7   : > { %v2496_v15 = vmul.f32 %v4624_v48, %v2485_v21 }
 0x9f8   : > { %v2455_v14 = vsub.f32 1.5, %v2454_v56 }
 0x9f9   : > { %v2507_v1 = vadd.f32 %v4630_v28, %v2496_v15 }
 0x9fa   : > { %v2456_v60 = vmul.f32 %v3285_v10, %v2455_v14 }
 0x9fc   : > { %v2460_v41 = vsel %vm2459_vm1, %v3285_v10, %v2456_v60 }
 0x9fd   : > { %v2486_v53 = vmul.f32 %v2460_v41, %v4598_v35  ;;  %v2962_v35 = vld [vmem:[%s4751_s11 + $0x10] sm:$0xff] }
 0x9fe   : > { %2634 = vmatpush.bf16.msra.mxu2 %v2962_v35 }
 0x9ff   : > { %v2497_v9 = vmul.f32 %v4624_v48, %v2486_v53 }
 0xa01   : > { %v2508_v2 = vadd.f32 %v4630_v28, %v2497_v9 }
 0xa02   : > { %2635 = vmatpush.bf16.msra.mxu2 %v2961_v13 }
 0xa03   : > { %v2513_v38 = vpack.c.bf16 %v2508_v2, %v2507_v1 }
 0xa05   : > { %2916 = vmatmul.msk.bf16.gmra.mxu1 %vm508_vm0, %v2513_v38 }
 0xa06   : > { %2636 = vmatpush.bf16.msra.mxu2 %v2960_v62 }
 0xa0e   : > { %v2381_v46 = vpop.xlane.xlu1 %2380 }
 0xa0f   : > { %v2391_v0 = vmul.f32 %v2381_v46, %v4795_v25 }
 0xa11   : > { %v2399_v32 = vadd.f32 1e-05, %v2391_v0 }
 0xa13   : > { %3286 = vrsqrt.f32 %v2399_v32  ;;  %vm2467_vm3 = vweird.f32 %v2399_v32 }
 0xa16   : > { %v2384_v29 = vpop.xlane.xlu2 %2383 }
 0xa17   : > { %v2392_v18 = vmul.f32 %v2384_v29, %v4795_v25 }
 0xa19   : > { %v3287_v55 = vpop.eup %3286  ;;  %v2400_v31 = vadd.f32 1e-05, %v2392_v18 }
 0xa1a   : > { %v2462_v43 = vmul.f32 %v3287_v55, %v2399_v32  ;;  %vm2468_vm2 = vweird.f32 %v3287_v55 }
 0xa1b   : > { %3288 = vrsqrt.f32 %v2400_v31  ;;  %vm2469_vm4 = vmor %vm2467_vm3, %vm2468_vm2  ;;  %vm2477_vm6 = vweird.f32 %v2400_v31 }
 0xa1c   : > { %v2463_v19 = vmul.f32 %v3287_v55, %v2462_v43 }
 0xa1e   : > { %v2464_v30 = vmul.f32 0.5, %v2463_v19 }
 0xa20   : > { %v2465_v57 = vsub.f32 1.5, %v2464_v30 }
 0xa21   : > { %v3289_v16 = vpop.eup %3288 }
 0xa22   : > { %v2466_v3 = vmul.f32 %v3287_v55, %v2465_v57  ;;  %v2472_v20 = vmul.f32 %v3289_v16, %v2400_v31  ;;  %vm2478_vm5 = vweird.f32 %v3289_v16 }
 0xa23   : > { %vm2479_vm7 = vmor %vm2477_vm6, %vm2478_vm5 }
 0xa24   : > { %v2473_v7 = vmul.f32 %v3289_v16, %v2472_v20  ;;  %v2470_v25 = vsel %vm2469_vm4, %v3287_v55, %v2466_v3 }
 0xa25   : > { %v2487_v47 = vmul.f32 %v2470_v25, %v4607_v17 }
 0xa26   : > { %v2474_v45 = vmul.f32 0.5, %v2473_v7 }
 0xa27   : > { %v2498_v33 = vmul.f32 %v4624_v48, %v2487_v47 }
 0xa28   : > { %v2475_v27 = vsub.f32 1.5, %v2474_v45 }
 0xa29   : > { %v2509_v36 = vadd.f32 %v4630_v28, %v2498_v33 }
 0xa2a   : > { %v2476_v59 = vmul.f32 %v3289_v16, %v2475_v27 }
 0xa2c   : > { %v2480_v50 = vsel %vm2479_vm7, %v3289_v16, %v2476_v59 }
 0xa2d   : > { %v2488_v39 = vmul.f32 %v2480_v50, %v4615_v49 }
 0xa2f   : > { %v2552_v44 = vpop.f32.mrf.mxu1  ;;  %v2499_v8 = vmul.f32 %v4624_v48, %v2488_v39 }
 0xa30   : > { %v2572_v17 = vmax.f32 %v2552_v44, 0.0 }
 0xa31   : > { %v2510_v6 = vadd.f32 %v4630_v28, %v2499_v8 }
 0xa33   : > { %v2514_v63 = vpack.c.bf16 %v2510_v6, %v2509_v36 }
 0xa35   : > { %2917 = vmatmul.msk.bf16.gmra.mxu1 %vm508_vm0, %v2514_v63  ;;  %vm2666_vm0 = vcmask 257024  }
 0xa37   : > { %v2554_v51 = vpop.f32.mrf.mxu1 }
 0xa38   : > { %v2573_v58 = vmax.f32 %v2554_v51, 0.0 }
 0xa3a   : > { %v2580_v54 = vpack.c.bf16 %v2573_v58, %v2572_v17 }
 0xa3c   : > { %2934 = vmatmul.msk.bf16.vlgmr.msra.gmra.mxu2 %vm2616_vm8, %v2580_v54 }
 0xa3f   : > { %v2557_v49 = vpop.f32.mrf.mxu1 }
 0xa40   : > { %v2574_v10 = vmax.f32 %v2557_v49, 0.0 }
 0xa47   : > { %v2559_v23 = vpop.f32.mrf.mxu1 }
 0xa48   : > { %v2575_v26 = vmax.f32 %v2559_v23, 0.0 }
 0xa4a   : > { %v2581_v12 = vpack.c.bf16 %v2575_v26, %v2574_v10 }
 0xa4c   : > { %2935 = vmatmul.msk.bf16.gmra.mxu2 %vm2616_vm8, %v2581_v12 }
 0xa82   : > { %v2562_v48 = vpop.f32.mrf.mxu1 }
 0xa83   : > { %v2576_v52 = vmax.f32 %v2562_v48, 0.0 }
 0xa8a   : > { %v2564_v28 = vpop.f32.mrf.mxu1 }
 0xa8b   : > { %v2577_v22 = vmax.f32 %v2564_v28, 0.0 }
 0xa8d   : > { %v2582_v56 = vpack.c.bf16 %v2577_v22, %v2576_v52 }
 0xa8f   : > { %2936 = vmatmul.msk.bf16.gmra.mxu2 %vm2616_vm8, %v2582_v56 }
 0xab2   : > { %v2567_v14 = vpop.f32.mrf.mxu1 }
 0xab3   : > { %v2578_v60 = vmax.f32 %v2567_v14, 0.0 }
 0xaba   : > { %v2569_v21 = vpop.f32.mrf.mxu1 }
 0xabb   : > { %v2579_v41 = vmax.f32 %v2569_v21, 0.0 }
 0xabd   : > { %v2583_v53 = vpack.c.bf16 %v2579_v41, %v2578_v60 }
 0xabf   : > { %v2638_v15 = vpop.f32.mrf.mxu2  ;;  %2937 = vmatmul.msk.bf16.gmra.mxu2 %vm2616_vm8, %v2583_v53 }
 0xac0   : > { %v2639_v9 = vadd.f32 %v2638_v15, %v4522_v11 }
 0xac2   : > { %v2658_v1 = vpack.c.bf16 %v2639_v9, %v2639_v9 }
 0xac4   : > { %2667 = vst.msk [vmem:[%s4682_s1] sm:$0xf] %vm2666_vm0, %v2658_v1 }
 0xac7   : > { %v2640_v2 = vpop.f32.mrf.mxu2 }
 0xac8   : > { %v2641_v38 = vadd.f32 %v2640_v2, %v4527_v34 }
 0xaca   : > { %v2659_v42 = vpack.c.bf16 %v2641_v38, %v2641_v38 }
 0xacc   : > { %2668 = vst.msk [vmem:[%s4682_s1 + $0x4] sm:$0xf] %vm2666_vm0, %v2659_v42 }
 0xacf   : > { %v2643_v11 = vpop.f32.mrf.mxu2 }
 0xad0   : > { %v2644_v46 = vadd.f32 %v2643_v11, %v4532_v24 }
 0xad2   : > { %v2660_v0 = vpack.c.bf16 %v2644_v46, %v2644_v46 }
 0xad4   : > { %2669 = vst.msk [vmem:[%s4682_s1 + $0x8] sm:$0xf] %vm2666_vm0, %v2660_v0 }
 0xad7   : > { %v2645_v35 = vpop.f32.mrf.mxu2 }
 0xad8   : > { %v2646_v32 = vadd.f32 %v2645_v35, %v4537_v37 }
 0xada   : > { %v2661_v13 = vpack.c.bf16 %v2646_v32, %v2646_v32 }
 0xadc   : > { %2670 = vst.msk [vmem:[%s4682_s1 + $0xc] sm:$0xf] %vm2666_vm0, %v2661_v13 }
 0xb12   : > { %v2648_v34 = vpop.f32.mrf.mxu2 }
 0xb13   : > { %v2649_v29 = vadd.f32 %v2648_v34, %v4542_v40 }
 0xb15   : > { %v2662_v18 = vpack.c.bf16 %v2649_v29, %v2649_v29 }
 0xb17   : > { %2671 = vst.msk [vmem:[%s4682_s1 + $0x10] sm:$0xf] %vm2666_vm0, %v2662_v18 }
 0xb1a   : > { %v2650_v55 = vpop.f32.mrf.mxu2 }
 0xb1b   : > { %v2651_v24 = vadd.f32 %v2650_v55, %v4547_v5 }
 0xb1d   : > { %v2663_v31 = vpack.c.bf16 %v2651_v24, %v2651_v24 }
 0xb1f   : > { %2672 = vst.msk [vmem:[%s4682_s1 + $0x14] sm:$0xf] %vm2666_vm0, %v2663_v31 }
 0xb42   : > { %v2653_v37 = vpop.f32.mrf.mxu2 }
 0xb43   : > { %v2654_v43 = vadd.f32 %v2653_v37, %v4560_v4 }
 0xb45   : > { %v2664_v62 = vpack.c.bf16 %v2654_v43, %v2654_v43 }
 0xb47   : > { %2673 = vst.msk [vmem:[%s4682_s1 + $0x18] sm:$0xf] %vm2666_vm0, %v2664_v62 }
 0xb4a   : > { %v2655_v40 = vpop.f32.mrf.mxu2 }
 0xb4b   : > { %v2656_v5 = vadd.f32 %v2655_v40, %v4572_v61 }
 0xb4d   : > { %v2665_v19 = vpack.c.bf16 %v2656_v5, %v2656_v5 }
 0xb4f   : > { %2674 = vst.msk [vmem:[%s4682_s1 + $0x1c] sm:$0xf] %vm2666_vm0, %v2665_v19 }
 0xb50   : > { %3437 = shalt.err (!%p3434_p10)
}
 0xb51   : > { %s3498_s10 = smov 64   ;;  %s3499_s1 = smov 4  }
 0xb52   : > { %2990 = dma.vmem_to_hbm [thread:$0]  (%p3655_p0), %s2690_s27, 512, %s2692_s14, %s2676_s26, %s3498_s10, %s3498_s10, %s3499_s1  }
 0xb53 PF: > { %p3017_p11 = scmp.ge.s32.totalorder %s3484_s24, 2  ;;  %s2706_s15 = sand.u32 1, %s3472_s21  }
 0xb54   : > { %s2707_s30 = scalar_lea.sflag [#allocation4], %s2706_s15 }
 0xb55   : > { %p3007_p12 = pnand %p3017_p11, %p3600_p6 }
 0xb57   : > { %p3008_p13 = pneg %p3007_p12 }
 0xb59   : > { %3467 = dma.done.wait (%p3008_p13), %s2707_s30, 512  }
 0xb5a   : > { %3469 = vsyncadd (%p3008_p13), %s2707_s30, 4294966784  ;;  %s4799_s19 = sld [smem:[#allocation15_spill]]  ;;  %p27_p3 = scmp.ge.s32.totalorder %s3637_s7, 6  }
 0xb5b   : > { %s4800_s23 = sld [smem:[#allocation17_spill]]  ;;  %s4801_s21 = smov %s3476_s22 }
 0xb5c   : > { %s4803_s24 = smov %s3637_s7  ;;  %29 = sbr.rel (!%p27_p3) target bundleno = 11 (0xb), region = 125 }
 0xb60   : > { %s4802_s22 = smov %s4799_s19 }
 0xb61   :  { %2713 = vsyncpa [#allocation3], 1 }
 0xb62   :  { %2715 = vsyncpa [#allocation3 + $0x1], 1 }
 0xb63   :  { %2716 = vsyncpa [#allocation6], 1 }
 0xb64   :  { %2717 = vsyncpa [#allocation9], 1 }
 0xb65   :  { %2718 = vsyncpa [#allocation4], 1 }
 0xb66   :  { %2720 = vsyncpa [#allocation4 + $0x1], 1 }

</bundles_post_ra>
